<compile_context>
chip_gen: v7x
topology: tpu7x:2x2x1
jax: 0.10.0
libtpu: 0.0.40
codegen_flags: <defaults>
</compile_context>

<pallas_src>
import math
import functools

import numpy as np
import jax
import jax.numpy as jnp
from jax.experimental import pallas as pl
from jax.experimental.pallas import tpu as pltpu

VMEM = pl.BlockSpec(memory_space=pltpu.MemorySpace.VMEM)
NEG = -1e30          # additive mask value (stands in for PyTorch's -inf)
_NUM_FIXED = 12      # non-weight kernel inputs before the flattened params


# ---------------------------------------------------------------------------
# Fused forward kernel (whole model, single pallas_call)
# ---------------------------------------------------------------------------

def _fused_transformer_kernel(*refs, treedef, n_heads, d_model, n_enc, n_dec,
                              pe_scale):
    (src_e_ref, tgt_e_ref, pe_src_ref, pe_tgt_ref,
     enc_mask_ref, dec_mask_ref,
     rep_src_ref, hm_src_ref, blk_src_ref,
     rep_tgt_ref, hm_tgt_ref, blk_tgt_ref) = refs[:_NUM_FIXED]
    out_ref = refs[-1]
    p = jax.tree_util.tree_unflatten(treedef, refs[_NUM_FIXED:-1])

    D = d_model
    dh = D // n_heads
    scale = 1.0 / math.sqrt(dh)
    f32 = jnp.float32

    def matmul(a, b):
        return jnp.dot(a, b, preferred_element_type=f32)

    def layer_norm(y, g, b):
        mu = jnp.mean(y, axis=-1, keepdims=True)
        var = jnp.mean(jnp.square(y - mu), axis=-1, keepdims=True)
        return (y - mu) * jax.lax.rsqrt(var + 1e-5) * g + b

    def attention(q, kv, w_o, b_o, rep, head_mask, blk, add_mask):
        # q: (Sq, D); kv: (Sk, 2D) -- K and V projections, lane-adjacent.
        # Heads via block-diagonal expansion: k_exp[h*Sk+s, d] = K[s, d] for d
        # in head h else 0, so every contraction is D (or H*Sk) wide instead of
        # head_dim, and no (H, S, head_dim) tensors or transposes exist.
        q = q * scale                                    # fold 1/sqrt(dh) into Q
        kv_exp = matmul(rep, kv)                         # single (H*Sk, 2D) expansion
        k_exp = kv_exp[:, :D] * head_mask                # (H*Sk, D)
        v_exp = kv_exp[:, D:] * head_mask                # (H*Sk, D)
        s = jax.lax.dot_general(q, k_exp, (((1,), (1,)), ((), ())),
                                preferred_element_type=f32)  # (Sq, H*Sk)
        if add_mask is not None:
            s = s + add_mask
        # Per-row shift is a valid stabilizer for each head-block (softmax is
        # shift-invariant within its normalization block).
        m = jnp.max(s, axis=-1, keepdims=True)
        e = jnp.exp(s - m)
        denom = matmul(e, blk)                           # per-head block sums
        prob = e * pl.reciprocal(denom, approx=True)     # EUP reciprocal
        ctx = matmul(prob, v_exp)                        # (Sq, D) heads merged
        return matmul(ctx, w_o) + b_o

    def ffn(x, w1, b1, w2, b2):
        h = jnp.maximum(matmul(x, w1) + b1, 0.0)
        return matmul(h, w2) + b2

    # ---- positional encoding (module quirk: out = emb + (emb*sqrt(d) + pe)) --
    x = src_e_ref[...] * (1.0 + pe_scale) + pe_src_ref[...]
    y = tgt_e_ref[...] * (1.0 + pe_scale) + pe_tgt_ref[...]

    enc_mask = enc_mask_ref[...]
    dec_mask = dec_mask_ref[...]
    rep_s, hm_s, blk_s = rep_src_ref[...], hm_src_ref[...], blk_src_ref[...]
    rep_t, hm_t, blk_t = rep_tgt_ref[...], hm_tgt_ref[...], blk_tgt_ref[...]

    enc_p, dec_p = p['enc'], p['dec']

    # ------------------------- encoder stack (post-LN) -----------------------
    for l in range(n_enc):
        qkv = matmul(x, enc_p['w_qkv'][l]) + enc_p['b_qkv'][l]   # fused QKV
        a = attention(qkv[:, :D], qkv[:, D:],
                      enc_p['w_o'][l], enc_p['b_o'][l],
                      rep_s, hm_s, blk_s, enc_mask)
        x = layer_norm(x + a, enc_p['ln1_g'][l], enc_p['ln1_b'][l])
        h = ffn(x, enc_p['ff1_w'][l], enc_p['ff1_b'][l],
                enc_p['ff2_w'][l], enc_p['ff2_b'][l])
        x = layer_norm(x + h, enc_p['ln2_g'][l], enc_p['ln2_b'][l])
    memory = layer_norm(x, p['enc_norm_g'][...], p['enc_norm_b'][...])

    # ------------------------------ decoder stack ----------------------------
    for l in range(n_dec):
        qkv = matmul(y, dec_p['sa_w_qkv'][l]) + dec_p['sa_b_qkv'][l]
        a = attention(qkv[:, :D], qkv[:, D:],
                      dec_p['sa_w_o'][l], dec_p['sa_b_o'][l],
                      rep_t, hm_t, blk_t, dec_mask)
        y = layer_norm(y + a, dec_p['ln1_g'][l], dec_p['ln1_b'][l])

        q = matmul(y, dec_p['ca_w_q'][l]) + dec_p['ca_b_q'][l]
        kv = matmul(memory, dec_p['ca_w_kv'][l]) + dec_p['ca_b_kv'][l]
        c = attention(q, kv,
                      dec_p['ca_w_o'][l], dec_p['ca_b_o'][l],
                      rep_s, hm_s, blk_s, None)  # memory_key_padding_mask=None
        y = layer_norm(y + c, dec_p['ln2_g'][l], dec_p['ln2_b'][l])

        h = ffn(y, dec_p['ff1_w'][l], dec_p['ff1_b'][l],
                dec_p['ff2_w'][l], dec_p['ff2_b'][l])
        y = layer_norm(y + h, dec_p['ln3_g'][l], dec_p['ln3_b'][l])
    y = layer_norm(y, p['dec_norm_g'][...], p['dec_norm_b'][...])

    # ---------------- output projection + softmax (lane-padded) --------------
    logits = matmul(y, p['out_w'][...]) + p['out_b'][...]   # (S_tgt_pad, tgt_pad)
    m = jnp.max(logits, axis=-1, keepdims=True)
    e = jnp.exp(logits - m)
    out_ref[...] = e / jnp.sum(e, axis=-1, keepdims=True)


# ---------------------------------------------------------------------------
# Wrapper (plain-JAX glue: embedding gather, mask construction, padding)
# ---------------------------------------------------------------------------

def _attn_consts(n_heads, s_k, d_model):
    """Constant matrices for the block-diagonal multi-head formulation."""
    dh = d_model // n_heads
    hs = n_heads * s_k
    r = np.arange(hs)[:, None]
    rep = (r % s_k == np.arange(s_k)[None, :]).astype(np.float32)          # (HS, Sk)
    headm = ((r // s_k) ==
             (np.arange(d_model)[None, :] // dh)).astype(np.float32)       # (HS, D)
    blk = ((r // s_k) ==
           (np.arange(hs)[None, :] // s_k)).astype(np.float32)             # (HS, HS)
    return jnp.asarray(rep), jnp.asarray(headm), jnp.asarray(blk)


def transformer_forward(params, src_tokens, tgt_tokens, n_heads):
    d_model = params['src_emb'].shape[1]
    n_enc = params['enc']['w_qkv'].shape[0]
    n_dec = params['dec']['sa_w_qkv'].shape[0]
    tgt_size = params['out_w'].shape[1]
    s_src = src_tokens.shape[0]
    s_tgt = tgt_tokens.shape[0]

    OUTPUT_PAD, INPUT_PAD = 8, 15

    # Sublane-pad the target sequence to a multiple of 8.  Padding tokens are
    # the module's output pad token, so its own key-padding mask hides them
    # from real rows; padded output rows are sliced off at the end.
    s_tgt_pad = max(8, ((s_tgt + 7) // 8) * 8)
    tgt_padded = jnp.concatenate(
        [tgt_tokens,
         jnp.full((s_tgt_pad - s_tgt,), OUTPUT_PAD, tgt_tokens.dtype)])

    tgt_pad_lanes = ((tgt_size + 127) // 128) * 128

    # Key-padding masks exactly as in the PyTorch module.
    src_kpm = src_tokens == INPUT_PAD
    tgt_kpm = tgt_padded == OUTPUT_PAD

    # Embedding gathers (plain-JAX glue).
    src_e = jnp.take(params['src_emb'], src_tokens, axis=0)
    tgt_e = jnp.take(params['tgt_emb'], tgt_padded, axis=0)
    pe_src = params['pe'][:s_src]
    pe_tgt = params['pe'][:s_tgt_pad]

    # Additive masks, pre-tiled to the kernel's (Sq, H*Sk) score layout.
    enc_mask = jnp.broadcast_to(jnp.where(src_kpm[None, :], NEG, 0.0),
                                (s_src, s_src)).astype(jnp.float32)
    enc_mask_t = jnp.tile(enc_mask, (1, n_heads))
    causal = jnp.where(
        jnp.arange(s_tgt_pad)[None, :] > jnp.arange(s_tgt_pad)[:, None],
        NEG, 0.0)
    dec_mask = (causal + jnp.where(tgt_kpm[None, :], NEG, 0.0)).astype(jnp.float32)
    dec_mask_t = jnp.tile(dec_mask, (1, n_heads))
    # Cross attention: memory_key_padding_mask=None in the module -> no mask.

    rep_s, hm_s, blk_s = _attn_consts(n_heads, s_src, d_model)
    rep_t, hm_t, blk_t = _attn_consts(n_heads, s_tgt_pad, d_model)

    # Pad the output projection to a lane-dense (multiple-of-128) width; padded
    # logits get bias NEG so the in-kernel softmax assigns them ~0 probability.
    out_w = jnp.zeros((d_model, tgt_pad_lanes), jnp.float32).at[:, :tgt_size].set(
        params['out_w'])
    out_b = jnp.full((1, tgt_pad_lanes), NEG, jnp.float32).at[:, :tgt_size].set(
        params['out_b'])

    kparams = dict(enc=params['enc'], dec=params['dec'],
                   enc_norm_g=params['enc_norm_g'],
                   enc_norm_b=params['enc_norm_b'],
                   dec_norm_g=params['dec_norm_g'],
                   dec_norm_b=params['dec_norm_b'],
                   out_w=out_w, out_b=out_b)
    leaves, treedef = jax.tree_util.tree_flatten(kparams)

    kernel = functools.partial(
        _fused_transformer_kernel, treedef=treedef, n_heads=n_heads,
        d_model=d_model, n_enc=n_enc, n_dec=n_dec,
        pe_scale=math.sqrt(d_model))

    out = pl.pallas_call(
        kernel,
        out_shape=jax.ShapeDtypeStruct((s_tgt_pad, tgt_pad_lanes), jnp.float32),
        in_specs=[VMEM] * (_NUM_FIXED + len(leaves)),
        out_specs=VMEM,
    )(src_e, tgt_e, pe_src, pe_tgt, enc_mask_t, dec_mask_t,
      rep_s, hm_s, blk_s, rep_t, hm_t, blk_t, *leaves)

    return out[:s_tgt, :tgt_size]


# ---------------------------------------------------------------------------
# Deterministic parameter construction (layer weights stacked per stack)
# ---------------------------------------------------------------------------

def make_pe(max_len, d_model):
    position = jnp.arange(max_len, dtype=jnp.float32)[:, None]
    div_term = jnp.exp(jnp.arange(0, d_model, 2, dtype=jnp.float32)
                       * (-math.log(10000.0) / d_model))
    pe = jnp.zeros((max_len, d_model), jnp.float32)
    pe = pe.at[:, 0::2].set(jnp.sin(position * div_term))
    pe = pe.at[:, 1::2].set(jnp.cos(position * div_term))
    return pe


def init_params(key, src_size, tgt_size, d_model, n_enc, n_dec, d_ff,
                max_len=64):
    keys = iter(jax.random.split(key, 64))

    def u(shape, scale=0.1):
        return jax.random.uniform(next(keys), shape, jnp.float32, -scale, scale)

    def ones(n, dim):
        return jnp.ones((n, 1, dim), jnp.float32)

    def zeros(n, dim):
        return jnp.zeros((n, 1, dim), jnp.float32)

    enc = dict(
        w_qkv=u((n_enc, d_model, 3 * d_model)), b_qkv=zeros(n_enc, 3 * d_model),
        w_o=u((n_enc, d_model, d_model)), b_o=zeros(n_enc, d_model),
        ln1_g=ones(n_enc, d_model), ln1_b=zeros(n_enc, d_model),
        ff1_w=u((n_enc, d_model, d_ff)), ff1_b=zeros(n_enc, d_ff),
        ff2_w=u((n_enc, d_ff, d_model)), ff2_b=zeros(n_enc, d_model),
        ln2_g=ones(n_enc, d_model), ln2_b=zeros(n_enc, d_model),
    )
    dec = dict(
        sa_w_qkv=u((n_dec, d_model, 3 * d_model)), sa_b_qkv=zeros(n_dec, 3 * d_model),
        sa_w_o=u((n_dec, d_model, d_model)), sa_b_o=zeros(n_dec, d_model),
        ca_w_q=u((n_dec, d_model, d_model)), ca_b_q=zeros(n_dec, d_model),
        ca_w_kv=u((n_dec, d_model, 2 * d_model)), ca_b_kv=zeros(n_dec, 2 * d_model),
        ca_w_o=u((n_dec, d_model, d_model)), ca_b_o=zeros(n_dec, d_model),
        ln1_g=ones(n_dec, d_model), ln1_b=zeros(n_dec, d_model),
        ln2_g=ones(n_dec, d_model), ln2_b=zeros(n_dec, d_model),
        ln3_g=ones(n_dec, d_model), ln3_b=zeros(n_dec, d_model),
        ff1_w=u((n_dec, d_model, d_ff)), ff1_b=zeros(n_dec, d_ff),
        ff2_w=u((n_dec, d_ff, d_model)), ff2_b=zeros(n_dec, d_model),
    )
    return dict(
        src_emb=u((src_size, d_model)),
        tgt_emb=u((tgt_size, d_model)),
        pe=make_pe(max_len, d_model),
        enc=enc, dec=dec,
        enc_norm_g=jnp.ones((1, d_model), jnp.float32),
        enc_norm_b=jnp.zeros((1, d_model), jnp.float32),
        dec_norm_g=jnp.ones((1, d_model), jnp.float32),
        dec_norm_b=jnp.zeros((1, d_model), jnp.float32),
        out_w=u((d_model, tgt_size)),
        out_b=jnp.zeros((1, tgt_size), jnp.float32),
    )


# ---------------------------------------------------------------------------
# Main
# ---------------------------------------------------------------------------

if __name__ == "__main__":
    SRC_SIZE, TGT_SIZE = 20, 10
    D_MODEL, N_HEADS = 32, 4
    N_ENC, N_DEC = 2, 2
    D_FF = 64
    S_SRC, S_TGT = 8, 6

    key = jax.random.PRNGKey(0)
    k_par, k_src, k_tgt = jax.random.split(key, 3)

    params = init_params(k_par, SRC_SIZE, TGT_SIZE, D_MODEL, N_ENC, N_DEC, D_FF)

    src = jax.random.randint(k_src, (S_SRC,), 0, SRC_SIZE, dtype=jnp.int32)
    tgt = jax.random.randint(k_tgt, (S_TGT,), 0, TGT_SIZE, dtype=jnp.int32)
    # Avoid fully-masked attention rows (same NaN concern as the PyTorch model):
    src = src.at[0].set(2)   # 15 is the input pad token
    tgt = tgt.at[0].set(1)   # 8 is the output pad token

    # TODO(synk): dropout (p=0.0 here) and generate()'s torch.multinomial
    # sampling loop are not part of the deterministic forward and are omitted.

    fwd = jax.jit(functools.partial(transformer_forward, n_heads=N_HEADS))
    out = jax.block_until_ready(fwd(params, src, tgt))

    assert out.shape == (S_TGT, TGT_SIZE)
    assert bool(jnp.all(jnp.isfinite(out)))
    # rows are softmax distributions
    assert bool(jnp.allclose(jnp.sum(out, axis=-1), 1.0, atol=1e-4))
    print("KERNEL_OK")
</pallas_src>

<mosaic_0001>
module attributes {stable_mosaic.version = 11 : i64} {
  func.func @_fused_transformer_kernel(%arg0: memref<8x32xf32, #tpu.memory_space<vmem>>, %arg1: memref<8x32xf32, #tpu.memory_space<vmem>>, %arg2: memref<8x32xf32, #tpu.memory_space<vmem>>, %arg3: memref<8x32xf32, #tpu.memory_space<vmem>>, %arg4: memref<8x32xf32, #tpu.memory_space<vmem>>, %arg5: memref<8x32xf32, #tpu.memory_space<vmem>>, %arg6: memref<32x8xf32, #tpu.memory_space<vmem>>, %arg7: memref<32x32xf32, #tpu.memory_space<vmem>>, %arg8: memref<32x32xf32, #tpu.memory_space<vmem>>, %arg9: memref<32x8xf32, #tpu.memory_space<vmem>>, %arg10: memref<32x32xf32, #tpu.memory_space<vmem>>, %arg11: memref<32x32xf32, #tpu.memory_space<vmem>>, %arg12: memref<2x1x64xf32, #tpu.memory_space<vmem>>, %arg13: memref<2x1x32xf32, #tpu.memory_space<vmem>>, %arg14: memref<2x1x32xf32, #tpu.memory_space<vmem>>, %arg15: memref<2x32x64xf32, #tpu.memory_space<vmem>>, %arg16: memref<2x32x32xf32, #tpu.memory_space<vmem>>, %arg17: memref<2x32x32xf32, #tpu.memory_space<vmem>>, %arg18: memref<2x1x64xf32, #tpu.memory_space<vmem>>, %arg19: memref<2x32x64xf32, #tpu.memory_space<vmem>>, %arg20: memref<2x1x32xf32, #tpu.memory_space<vmem>>, %arg21: memref<2x64x32xf32, #tpu.memory_space<vmem>>, %arg22: memref<2x1x32xf32, #tpu.memory_space<vmem>>, %arg23: memref<2x1x32xf32, #tpu.memory_space<vmem>>, %arg24: memref<2x1x32xf32, #tpu.memory_space<vmem>>, %arg25: memref<2x1x32xf32, #tpu.memory_space<vmem>>, %arg26: memref<2x1x32xf32, #tpu.memory_space<vmem>>, %arg27: memref<2x1x32xf32, #tpu.memory_space<vmem>>, %arg28: memref<2x1x32xf32, #tpu.memory_space<vmem>>, %arg29: memref<2x1x96xf32, #tpu.memory_space<vmem>>, %arg30: memref<2x32x32xf32, #tpu.memory_space<vmem>>, %arg31: memref<2x32x96xf32, #tpu.memory_space<vmem>>, %arg32: memref<1x32xf32, #tpu.memory_space<vmem>>, %arg33: memref<1x32xf32, #tpu.memory_space<vmem>>, %arg34: memref<2x1x32xf32, #tpu.memory_space<vmem>>, %arg35: memref<2x1x96xf32, #tpu.memory_space<vmem>>, %arg36: memref<2x1x64xf32, #tpu.memory_space<vmem>>, %arg37: memref<2x32x64xf32, #tpu.memory_space<vmem>>, %arg38: memref<2x1x32xf32, #tpu.memory_space<vmem>>, %arg39: memref<2x64x32xf32, #tpu.memory_space<vmem>>, %arg40: memref<2x1x32xf32, #tpu.memory_space<vmem>>, %arg41: memref<2x1x32xf32, #tpu.memory_space<vmem>>, %arg42: memref<2x1x32xf32, #tpu.memory_space<vmem>>, %arg43: memref<2x1x32xf32, #tpu.memory_space<vmem>>, %arg44: memref<2x32x32xf32, #tpu.memory_space<vmem>>, %arg45: memref<2x32x96xf32, #tpu.memory_space<vmem>>, %arg46: memref<1x32xf32, #tpu.memory_space<vmem>>, %arg47: memref<1x32xf32, #tpu.memory_space<vmem>>, %arg48: memref<1x128xf32, #tpu.memory_space<vmem>>, %arg49: memref<32x128xf32, #tpu.memory_space<vmem>>, %arg50: memref<8x128xf32, #tpu.memory_space<vmem>>) attributes {dimension_semantics = [], scalar_prefetch = 0 : i64, scratch_operands = 0 : i64, tpu.core_type = #tpu.core_type<tc>} {
    %c0 = arith.constant 0 : index
    %c0_0 = arith.constant 0 : index
    %0 = vector.load %arg0[%c0, %c0_0] : memref<8x32xf32, #tpu.memory_space<vmem>>, vector<8x32xf32>
    %cst = arith.constant 6.65685415 : f32
    %1 = vector.broadcast %cst : f32 to vector<8x32xf32>
    %2 = arith.mulf %0, %1 : vector<8x32xf32>
    %c0_1 = arith.constant 0 : index
    %c0_2 = arith.constant 0 : index
    %3 = vector.load %arg2[%c0_1, %c0_2] : memref<8x32xf32, #tpu.memory_space<vmem>>, vector<8x32xf32>
    %4 = arith.addf %2, %3 : vector<8x32xf32>
    %c0_3 = arith.constant 0 : index
    %c0_4 = arith.constant 0 : index
    %5 = vector.load %arg1[%c0_3, %c0_4] : memref<8x32xf32, #tpu.memory_space<vmem>>, vector<8x32xf32>
    %cst_5 = arith.constant 6.65685415 : f32
    %6 = vector.broadcast %cst_5 : f32 to vector<8x32xf32>
    %7 = arith.mulf %5, %6 : vector<8x32xf32>
    %c0_6 = arith.constant 0 : index
    %c0_7 = arith.constant 0 : index
    %8 = vector.load %arg3[%c0_6, %c0_7] : memref<8x32xf32, #tpu.memory_space<vmem>>, vector<8x32xf32>
    %9 = arith.addf %7, %8 : vector<8x32xf32>
    %c0_8 = arith.constant 0 : index
    %c0_9 = arith.constant 0 : index
    %10 = vector.load %arg4[%c0_8, %c0_9] : memref<8x32xf32, #tpu.memory_space<vmem>>, vector<8x32xf32>
    %c0_10 = arith.constant 0 : index
    %c0_11 = arith.constant 0 : index
    %11 = vector.load %arg5[%c0_10, %c0_11] : memref<8x32xf32, #tpu.memory_space<vmem>>, vector<8x32xf32>
    %c0_12 = arith.constant 0 : index
    %c0_13 = arith.constant 0 : index
    %12 = vector.load %arg6[%c0_12, %c0_13] : memref<32x8xf32, #tpu.memory_space<vmem>>, vector<32x8xf32>
    %c0_14 = arith.constant 0 : index
    %c0_15 = arith.constant 0 : index
    %13 = vector.load %arg7[%c0_14, %c0_15] : memref<32x32xf32, #tpu.memory_space<vmem>>, vector<32x32xf32>
    %c0_16 = arith.constant 0 : index
    %c0_17 = arith.constant 0 : index
    %14 = vector.load %arg8[%c0_16, %c0_17] : memref<32x32xf32, #tpu.memory_space<vmem>>, vector<32x32xf32>
    %c0_18 = arith.constant 0 : index
    %c0_19 = arith.constant 0 : index
    %15 = vector.load %arg9[%c0_18, %c0_19] : memref<32x8xf32, #tpu.memory_space<vmem>>, vector<32x8xf32>
    %c0_20 = arith.constant 0 : index
    %c0_21 = arith.constant 0 : index
    %16 = vector.load %arg10[%c0_20, %c0_21] : memref<32x32xf32, #tpu.memory_space<vmem>>, vector<32x32xf32>
    %c0_22 = arith.constant 0 : index
    %c0_23 = arith.constant 0 : index
    %17 = vector.load %arg11[%c0_22, %c0_23] : memref<32x32xf32, #tpu.memory_space<vmem>>, vector<32x32xf32>
    %c0_24 = arith.constant 0 : index
    %c0_25 = arith.constant 0 : index
    %c0_26 = arith.constant 0 : index
    %18 = vector.load %arg45[%c0_24, %c0_25, %c0_26] : memref<2x32x96xf32, #tpu.memory_space<vmem>>, vector<1x32x96xf32>
    %19 = vector.shape_cast %18 : vector<1x32x96xf32> to vector<32x96xf32>
    %cst_27 = arith.constant dense<0.000000e+00> : vector<8x96xf32>
    %20 = tpu.matmul %4, %19, %cst_27 {dimension_numbers = #tpu.dot_dimension_numbers<[1], [0], [0], [1], [0, 0, 1, 1], [], []>} : vector<8x32xf32>, vector<32x96xf32>, vector<8x96xf32> -> vector<8x96xf32>
    %c0_28 = arith.constant 0 : index
    %c0_29 = arith.constant 0 : index
    %c0_30 = arith.constant 0 : index
    %21 = vector.load %arg35[%c0_28, %c0_29, %c0_30] : memref<2x1x96xf32, #tpu.memory_space<vmem>>, vector<1x1x96xf32>
    %22 = vector.shape_cast %21 : vector<1x1x96xf32> to vector<1x96xf32>
    %23 = vector.broadcast %22 : vector<1x96xf32> to vector<8x96xf32>
    %24 = arith.addf %20, %23 : vector<8x96xf32>
    %25 = vector.extract_strided_slice %24 {offsets = [0, 0], sizes = [8, 32], strides = [1, 1]} : vector<8x96xf32> to vector<8x32xf32>
    %26 = vector.extract_strided_slice %24 {offsets = [0, 32], sizes = [8, 64], strides = [1, 1]} : vector<8x96xf32> to vector<8x64xf32>
    %c0_31 = arith.constant 0 : index
    %c0_32 = arith.constant 0 : index
    %c0_33 = arith.constant 0 : index
    %27 = vector.load %arg44[%c0_31, %c0_32, %c0_33] : memref<2x32x32xf32, #tpu.memory_space<vmem>>, vector<1x32x32xf32>
    %28 = vector.shape_cast %27 : vector<1x32x32xf32> to vector<32x32xf32>
    %c0_34 = arith.constant 0 : index
    %c0_35 = arith.constant 0 : index
    %c0_36 = arith.constant 0 : index
    %29 = vector.load %arg34[%c0_34, %c0_35, %c0_36] : memref<2x1x32xf32, #tpu.memory_space<vmem>>, vector<1x1x32xf32>
    %30 = vector.shape_cast %29 : vector<1x1x32xf32> to vector<1x32xf32>
    %cst_37 = arith.constant 0.353553385 : f32
    %31 = vector.broadcast %cst_37 : f32 to vector<8x32xf32>
    %32 = arith.mulf %25, %31 : vector<8x32xf32>
    %cst_38 = arith.constant dense<0.000000e+00> : vector<32x64xf32>
    %33 = tpu.matmul %12, %26, %cst_38 {dimension_numbers = #tpu.dot_dimension_numbers<[1], [0], [0], [1], [0, 0, 1, 1], [], []>} : vector<32x8xf32>, vector<8x64xf32>, vector<32x64xf32> -> vector<32x64xf32>
    %34 = vector.extract_strided_slice %33 {offsets = [0, 0], sizes = [32, 32], strides = [1, 1]} : vector<32x64xf32> to vector<32x32xf32>
    %35 = arith.mulf %34, %13 : vector<32x32xf32>
    %36 = vector.extract_strided_slice %33 {offsets = [0, 32], sizes = [32, 32], strides = [1, 1]} : vector<32x64xf32> to vector<32x32xf32>
    %37 = arith.mulf %36, %13 : vector<32x32xf32>
    %cst_39 = arith.constant dense<0.000000e+00> : vector<8x32xf32>
    %38 = tpu.matmul %32, %35, %cst_39 {dimension_numbers = #tpu.dot_dimension_numbers<[1], [1], [0], [0], [0, 0, 1, 0], [], []>} : vector<8x32xf32>, vector<32x32xf32>, vector<8x32xf32> -> vector<8x32xf32>
    %39 = arith.addf %38, %10 : vector<8x32xf32>
    %cst_40 = arith.constant dense<0xFF800000> : vector<8xf32>
    %40 = vector.multi_reduction <maximumf>, %39, %cst_40 [1] : vector<8x32xf32> to vector<8xf32>
    %41 = vector.shape_cast %40 : vector<8xf32> to vector<8x1xf32>
    %42 = vector.broadcast %41 : vector<8x1xf32> to vector<8x32xf32>
    %43 = arith.subf %39, %42 : vector<8x32xf32>
    %44 = math.exp %43 : vector<8x32xf32>
    %cst_41 = arith.constant dense<0.000000e+00> : vector<8x32xf32>
    %45 = tpu.matmul %44, %14, %cst_41 {dimension_numbers = #tpu.dot_dimension_numbers<[1], [0], [0], [1], [0, 0, 1, 1], [], []>} : vector<8x32xf32>, vector<32x32xf32>, vector<8x32xf32> -> vector<8x32xf32>
    %46 = tpu.reciprocal %45 {approx = true} : vector<8x32xf32> -> vector<8x32xf32>
    %47 = arith.mulf %44, %46 : vector<8x32xf32>
    %cst_42 = arith.constant dense<0.000000e+00> : vector<8x32xf32>
    %48 = tpu.matmul %47, %37, %cst_42 {dimension_numbers = #tpu.dot_dimension_numbers<[1], [0], [0], [1], [0, 0, 1, 1], [], []>} : vector<8x32xf32>, vector<32x32xf32>, vector<8x32xf32> -> vector<8x32xf32>
    %cst_43 = arith.constant dense<0.000000e+00> : vector<8x32xf32>
    %49 = tpu.matmul %48, %28, %cst_43 {dimension_numbers = #tpu.dot_dimension_numbers<[1], [0], [0], [1], [0, 0, 1, 1], [], []>} : vector<8x32xf32>, vector<32x32xf32>, vector<8x32xf32> -> vector<8x32xf32>
    %50 = vector.broadcast %30 : vector<1x32xf32> to vector<8x32xf32>
    %51 = arith.addf %49, %50 : vector<8x32xf32>
    %52 = arith.addf %4, %51 : vector<8x32xf32>
    %c0_44 = arith.constant 0 : index
    %c0_45 = arith.constant 0 : index
    %c0_46 = arith.constant 0 : index
    %53 = vector.load %arg41[%c0_44, %c0_45, %c0_46] : memref<2x1x32xf32, #tpu.memory_space<vmem>>, vector<1x1x32xf32>
    %54 = vector.shape_cast %53 : vector<1x1x32xf32> to vector<1x32xf32>
    %c0_47 = arith.constant 0 : index
    %c0_48 = arith.constant 0 : index
    %c0_49 = arith.constant 0 : index
    %55 = vector.load %arg40[%c0_47, %c0_48, %c0_49] : memref<2x1x32xf32, #tpu.memory_space<vmem>>, vector<1x1x32xf32>
    %56 = vector.shape_cast %55 : vector<1x1x32xf32> to vector<1x32xf32>
    %cst_50 = arith.constant dense<0.000000e+00> : vector<8xf32>
    %57 = vector.multi_reduction <add>, %52, %cst_50 [1] : vector<8x32xf32> to vector<8xf32>
    %58 = vector.shape_cast %57 : vector<8xf32> to vector<8x1xf32>
    %cst_51 = arith.constant 3.200000e+01 : f32
    %59 = vector.broadcast %cst_51 : f32 to vector<8x1xf32>
    %60 = arith.divf %58, %59 : vector<8x1xf32>
    %61 = vector.broadcast %60 : vector<8x1xf32> to vector<8x32xf32>
    %62 = arith.subf %52, %61 : vector<8x32xf32>
    %63 = arith.mulf %62, %62 : vector<8x32xf32>
    %cst_52 = arith.constant dense<0.000000e+00> : vector<8xf32>
    %64 = vector.multi_reduction <add>, %63, %cst_52 [1] : vector<8x32xf32> to vector<8xf32>
    %65 = vector.shape_cast %64 : vector<8xf32> to vector<8x1xf32>
    %cst_53 = arith.constant 3.200000e+01 : f32
    %66 = vector.broadcast %cst_53 : f32 to vector<8x1xf32>
    %67 = arith.divf %65, %66 : vector<8x1xf32>
    %68 = vector.broadcast %60 : vector<8x1xf32> to vector<8x32xf32>
    %69 = arith.subf %52, %68 : vector<8x32xf32>
    %cst_54 = arith.constant 9.99999974E-6 : f32
    %70 = vector.broadcast %cst_54 : f32 to vector<8x1xf32>
    %71 = arith.addf %67, %70 : vector<8x1xf32>
    %72 = math.rsqrt %71 : vector<8x1xf32>
    %73 = vector.broadcast %72 : vector<8x1xf32> to vector<8x32xf32>
    %74 = arith.mulf %69, %73 : vector<8x32xf32>
    %75 = vector.broadcast %54 : vector<1x32xf32> to vector<8x32xf32>
    %76 = arith.mulf %74, %75 : vector<8x32xf32>
    %77 = vector.broadcast %56 : vector<1x32xf32> to vector<8x32xf32>
    %78 = arith.addf %76, %77 : vector<8x32xf32>
    %c0_55 = arith.constant 0 : index
    %c0_56 = arith.constant 0 : index
    %c0_57 = arith.constant 0 : index
    %79 = vector.load %arg37[%c0_55, %c0_56, %c0_57] : memref<2x32x64xf32, #tpu.memory_space<vmem>>, vector<1x32x64xf32>
    %80 = vector.shape_cast %79 : vector<1x32x64xf32> to vector<32x64xf32>
    %c0_58 = arith.constant 0 : index
    %c0_59 = arith.constant 0 : index
    %c0_60 = arith.constant 0 : index
    %81 = vector.load %arg36[%c0_58, %c0_59, %c0_60] : memref<2x1x64xf32, #tpu.memory_space<vmem>>, vector<1x1x64xf32>
    %82 = vector.shape_cast %81 : vector<1x1x64xf32> to vector<1x64xf32>
    %c0_61 = arith.constant 0 : index
    %c0_62 = arith.constant 0 : index
    %c0_63 = arith.constant 0 : index
    %83 = vector.load %arg39[%c0_61, %c0_62, %c0_63] : memref<2x64x32xf32, #tpu.memory_space<vmem>>, vector<1x64x32xf32>
    %84 = vector.shape_cast %83 : vector<1x64x32xf32> to vector<64x32xf32>
    %c0_64 = arith.constant 0 : index
    %c0_65 = arith.constant 0 : index
    %c0_66 = arith.constant 0 : index
    %85 = vector.load %arg38[%c0_64, %c0_65, %c0_66] : memref<2x1x32xf32, #tpu.memory_space<vmem>>, vector<1x1x32xf32>
    %86 = vector.shape_cast %85 : vector<1x1x32xf32> to vector<1x32xf32>
    %cst_67 = arith.constant dense<0.000000e+00> : vector<8x64xf32>
    %87 = tpu.matmul %78, %80, %cst_67 {dimension_numbers = #tpu.dot_dimension_numbers<[1], [0], [0], [1], [0, 0, 1, 1], [], []>} : vector<8x32xf32>, vector<32x64xf32>, vector<8x64xf32> -> vector<8x64xf32>
    %88 = vector.broadcast %82 : vector<1x64xf32> to vector<8x64xf32>
    %89 = arith.addf %87, %88 : vector<8x64xf32>
    %cst_68 = arith.constant 0.000000e+00 : f32
    %90 = vector.broadcast %cst_68 : f32 to vector<8x64xf32>
    %91 = arith.maximumf %89, %90 : vector<8x64xf32>
    %cst_69 = arith.constant dense<0.000000e+00> : vector<8x32xf32>
    %92 = tpu.matmul %91, %84, %cst_69 {dimension_numbers = #tpu.dot_dimension_numbers<[1], [0], [0], [1], [0, 0, 1, 1], [], []>} : vector<8x64xf32>, vector<64x32xf32>, vector<8x32xf32> -> vector<8x32xf32>
    %93 = vector.broadcast %86 : vector<1x32xf32> to vector<8x32xf32>
    %94 = arith.addf %92, %93 : vector<8x32xf32>
    %95 = arith.addf %78, %94 : vector<8x32xf32>
    %c0_70 = arith.constant 0 : index
    %c0_71 = arith.constant 0 : index
    %c0_72 = arith.constant 0 : index
    %96 = vector.load %arg43[%c0_70, %c0_71, %c0_72] : memref<2x1x32xf32, #tpu.memory_space<vmem>>, vector<1x1x32xf32>
    %97 = vector.shape_cast %96 : vector<1x1x32xf32> to vector<1x32xf32>
    %c0_73 = arith.constant 0 : index
    %c0_74 = arith.constant 0 : index
    %c0_75 = arith.constant 0 : index
    %98 = vector.load %arg42[%c0_73, %c0_74, %c0_75] : memref<2x1x32xf32, #tpu.memory_space<vmem>>, vector<1x1x32xf32>
    %99 = vector.shape_cast %98 : vector<1x1x32xf32> to vector<1x32xf32>
    %cst_76 = arith.constant dense<0.000000e+00> : vector<8xf32>
    %100 = vector.multi_reduction <add>, %95, %cst_76 [1] : vector<8x32xf32> to vector<8xf32>
    %101 = vector.shape_cast %100 : vector<8xf32> to vector<8x1xf32>
    %cst_77 = arith.constant 3.200000e+01 : f32
    %102 = vector.broadcast %cst_77 : f32 to vector<8x1xf32>
    %103 = arith.divf %101, %102 : vector<8x1xf32>
    %104 = vector.broadcast %103 : vector<8x1xf32> to vector<8x32xf32>
    %105 = arith.subf %95, %104 : vector<8x32xf32>
    %106 = arith.mulf %105, %105 : vector<8x32xf32>
    %cst_78 = arith.constant dense<0.000000e+00> : vector<8xf32>
    %107 = vector.multi_reduction <add>, %106, %cst_78 [1] : vector<8x32xf32> to vector<8xf32>
    %108 = vector.shape_cast %107 : vector<8xf32> to vector<8x1xf32>
    %cst_79 = arith.constant 3.200000e+01 : f32
    %109 = vector.broadcast %cst_79 : f32 to vector<8x1xf32>
    %110 = arith.divf %108, %109 : vector<8x1xf32>
    %111 = vector.broadcast %103 : vector<8x1xf32> to vector<8x32xf32>
    %112 = arith.subf %95, %111 : vector<8x32xf32>
    %cst_80 = arith.constant 9.99999974E-6 : f32
    %113 = vector.broadcast %cst_80 : f32 to vector<8x1xf32>
    %114 = arith.addf %110, %113 : vector<8x1xf32>
    %115 = math.rsqrt %114 : vector<8x1xf32>
    %116 = vector.broadcast %115 : vector<8x1xf32> to vector<8x32xf32>
    %117 = arith.mulf %112, %116 : vector<8x32xf32>
    %118 = vector.broadcast %97 : vector<1x32xf32> to vector<8x32xf32>
    %119 = arith.mulf %117, %118 : vector<8x32xf32>
    %120 = vector.broadcast %99 : vector<1x32xf32> to vector<8x32xf32>
    %121 = arith.addf %119, %120 : vector<8x32xf32>
    %c1 = arith.constant 1 : index
    %c0_81 = arith.constant 0 : index
    %c0_82 = arith.constant 0 : index
    %122 = vector.load %arg45[%c1, %c0_81, %c0_82] : memref<2x32x96xf32, #tpu.memory_space<vmem>>, vector<1x32x96xf32>
    %123 = vector.shape_cast %122 : vector<1x32x96xf32> to vector<32x96xf32>
    %cst_83 = arith.constant dense<0.000000e+00> : vector<8x96xf32>
    %124 = tpu.matmul %121, %123, %cst_83 {dimension_numbers = #tpu.dot_dimension_numbers<[1], [0], [0], [1], [0, 0, 1, 1], [], []>} : vector<8x32xf32>, vector<32x96xf32>, vector<8x96xf32> -> vector<8x96xf32>
    %c1_84 = arith.constant 1 : index
    %c0_85 = arith.constant 0 : index
    %c0_86 = arith.constant 0 : index
    %125 = vector.load %arg35[%c1_84, %c0_85, %c0_86] : memref<2x1x96xf32, #tpu.memory_space<vmem>>, vector<1x1x96xf32>
    %126 = vector.shape_cast %125 : vector<1x1x96xf32> to vector<1x96xf32>
    %127 = vector.broadcast %126 : vector<1x96xf32> to vector<8x96xf32>
    %128 = arith.addf %124, %127 : vector<8x96xf32>
    %129 = vector.extract_strided_slice %128 {offsets = [0, 0], sizes = [8, 32], strides = [1, 1]} : vector<8x96xf32> to vector<8x32xf32>
    %130 = vector.extract_strided_slice %128 {offsets = [0, 32], sizes = [8, 64], strides = [1, 1]} : vector<8x96xf32> to vector<8x64xf32>
    %c1_87 = arith.constant 1 : index
    %c0_88 = arith.constant 0 : index
    %c0_89 = arith.constant 0 : index
    %131 = vector.load %arg44[%c1_87, %c0_88, %c0_89] : memref<2x32x32xf32, #tpu.memory_space<vmem>>, vector<1x32x32xf32>
    %132 = vector.shape_cast %131 : vector<1x32x32xf32> to vector<32x32xf32>
    %c1_90 = arith.constant 1 : index
    %c0_91 = arith.constant 0 : index
    %c0_92 = arith.constant 0 : index
    %133 = vector.load %arg34[%c1_90, %c0_91, %c0_92] : memref<2x1x32xf32, #tpu.memory_space<vmem>>, vector<1x1x32xf32>
    %134 = vector.shape_cast %133 : vector<1x1x32xf32> to vector<1x32xf32>
    %cst_93 = arith.constant 0.353553385 : f32
    %135 = vector.broadcast %cst_93 : f32 to vector<8x32xf32>
    %136 = arith.mulf %129, %135 : vector<8x32xf32>
    %cst_94 = arith.constant dense<0.000000e+00> : vector<32x64xf32>
    %137 = tpu.matmul %12, %130, %cst_94 {dimension_numbers = #tpu.dot_dimension_numbers<[1], [0], [0], [1], [0, 0, 1, 1], [], []>} : vector<32x8xf32>, vector<8x64xf32>, vector<32x64xf32> -> vector<32x64xf32>
    %138 = vector.extract_strided_slice %137 {offsets = [0, 0], sizes = [32, 32], strides = [1, 1]} : vector<32x64xf32> to vector<32x32xf32>
    %139 = arith.mulf %138, %13 : vector<32x32xf32>
    %140 = vector.extract_strided_slice %137 {offsets = [0, 32], sizes = [32, 32], strides = [1, 1]} : vector<32x64xf32> to vector<32x32xf32>
    %141 = arith.mulf %140, %13 : vector<32x32xf32>
    %cst_95 = arith.constant dense<0.000000e+00> : vector<8x32xf32>
    %142 = tpu.matmul %136, %139, %cst_95 {dimension_numbers = #tpu.dot_dimension_numbers<[1], [1], [0], [0], [0, 0, 1, 0], [], []>} : vector<8x32xf32>, vector<32x32xf32>, vector<8x32xf32> -> vector<8x32xf32>
    %143 = arith.addf %142, %10 : vector<8x32xf32>
    %cst_96 = arith.constant dense<0xFF800000> : vector<8xf32>
    %144 = vector.multi_reduction <maximumf>, %143, %cst_96 [1] : vector<8x32xf32> to vector<8xf32>
    %145 = vector.shape_cast %144 : vector<8xf32> to vector<8x1xf32>
    %146 = vector.broadcast %145 : vector<8x1xf32> to vector<8x32xf32>
    %147 = arith.subf %143, %146 : vector<8x32xf32>
    %148 = math.exp %147 : vector<8x32xf32>
    %cst_97 = arith.constant dense<0.000000e+00> : vector<8x32xf32>
    %149 = tpu.matmul %148, %14, %cst_97 {dimension_numbers = #tpu.dot_dimension_numbers<[1], [0], [0], [1], [0, 0, 1, 1], [], []>} : vector<8x32xf32>, vector<32x32xf32>, vector<8x32xf32> -> vector<8x32xf32>
    %150 = tpu.reciprocal %149 {approx = true} : vector<8x32xf32> -> vector<8x32xf32>
    %151 = arith.mulf %148, %150 : vector<8x32xf32>
    %cst_98 = arith.constant dense<0.000000e+00> : vector<8x32xf32>
    %152 = tpu.matmul %151, %141, %cst_98 {dimension_numbers = #tpu.dot_dimension_numbers<[1], [0], [0], [1], [0, 0, 1, 1], [], []>} : vector<8x32xf32>, vector<32x32xf32>, vector<8x32xf32> -> vector<8x32xf32>
    %cst_99 = arith.constant dense<0.000000e+00> : vector<8x32xf32>
    %153 = tpu.matmul %152, %132, %cst_99 {dimension_numbers = #tpu.dot_dimension_numbers<[1], [0], [0], [1], [0, 0, 1, 1], [], []>} : vector<8x32xf32>, vector<32x32xf32>, vector<8x32xf32> -> vector<8x32xf32>
    %154 = vector.broadcast %134 : vector<1x32xf32> to vector<8x32xf32>
    %155 = arith.addf %153, %154 : vector<8x32xf32>
    %156 = arith.addf %121, %155 : vector<8x32xf32>
    %c1_100 = arith.constant 1 : index
    %c0_101 = arith.constant 0 : index
    %c0_102 = arith.constant 0 : index
    %157 = vector.load %arg41[%c1_100, %c0_101, %c0_102] : memref<2x1x32xf32, #tpu.memory_space<vmem>>, vector<1x1x32xf32>
    %158 = vector.shape_cast %157 : vector<1x1x32xf32> to vector<1x32xf32>
    %c1_103 = arith.constant 1 : index
    %c0_104 = arith.constant 0 : index
    %c0_105 = arith.constant 0 : index
    %159 = vector.load %arg40[%c1_103, %c0_104, %c0_105] : memref<2x1x32xf32, #tpu.memory_space<vmem>>, vector<1x1x32xf32>
    %160 = vector.shape_cast %159 : vector<1x1x32xf32> to vector<1x32xf32>
    %cst_106 = arith.constant dense<0.000000e+00> : vector<8xf32>
    %161 = vector.multi_reduction <add>, %156, %cst_106 [1] : vector<8x32xf32> to vector<8xf32>
    %162 = vector.shape_cast %161 : vector<8xf32> to vector<8x1xf32>
    %cst_107 = arith.constant 3.200000e+01 : f32
    %163 = vector.broadcast %cst_107 : f32 to vector<8x1xf32>
    %164 = arith.divf %162, %163 : vector<8x1xf32>
    %165 = vector.broadcast %164 : vector<8x1xf32> to vector<8x32xf32>
    %166 = arith.subf %156, %165 : vector<8x32xf32>
    %167 = arith.mulf %166, %166 : vector<8x32xf32>
    %cst_108 = arith.constant dense<0.000000e+00> : vector<8xf32>
    %168 = vector.multi_reduction <add>, %167, %cst_108 [1] : vector<8x32xf32> to vector<8xf32>
    %169 = vector.shape_cast %168 : vector<8xf32> to vector<8x1xf32>
    %cst_109 = arith.constant 3.200000e+01 : f32
    %170 = vector.broadcast %cst_109 : f32 to vector<8x1xf32>
    %171 = arith.divf %169, %170 : vector<8x1xf32>
    %172 = vector.broadcast %164 : vector<8x1xf32> to vector<8x32xf32>
    %173 = arith.subf %156, %172 : vector<8x32xf32>
    %cst_110 = arith.constant 9.99999974E-6 : f32
    %174 = vector.broadcast %cst_110 : f32 to vector<8x1xf32>
    %175 = arith.addf %171, %174 : vector<8x1xf32>
    %176 = math.rsqrt %175 : vector<8x1xf32>
    %177 = vector.broadcast %176 : vector<8x1xf32> to vector<8x32xf32>
    %178 = arith.mulf %173, %177 : vector<8x32xf32>
    %179 = vector.broadcast %158 : vector<1x32xf32> to vector<8x32xf32>
    %180 = arith.mulf %178, %179 : vector<8x32xf32>
    %181 = vector.broadcast %160 : vector<1x32xf32> to vector<8x32xf32>
    %182 = arith.addf %180, %181 : vector<8x32xf32>
    %c1_111 = arith.constant 1 : index
    %c0_112 = arith.constant 0 : index
    %c0_113 = arith.constant 0 : index
    %183 = vector.load %arg37[%c1_111, %c0_112, %c0_113] : memref<2x32x64xf32, #tpu.memory_space<vmem>>, vector<1x32x64xf32>
    %184 = vector.shape_cast %183 : vector<1x32x64xf32> to vector<32x64xf32>
    %c1_114 = arith.constant 1 : index
    %c0_115 = arith.constant 0 : index
    %c0_116 = arith.constant 0 : index
    %185 = vector.load %arg36[%c1_114, %c0_115, %c0_116] : memref<2x1x64xf32, #tpu.memory_space<vmem>>, vector<1x1x64xf32>
    %186 = vector.shape_cast %185 : vector<1x1x64xf32> to vector<1x64xf32>
    %c1_117 = arith.constant 1 : index
    %c0_118 = arith.constant 0 : index
    %c0_119 = arith.constant 0 : index
    %187 = vector.load %arg39[%c1_117, %c0_118, %c0_119] : memref<2x64x32xf32, #tpu.memory_space<vmem>>, vector<1x64x32xf32>
    %188 = vector.shape_cast %187 : vector<1x64x32xf32> to vector<64x32xf32>
    %c1_120 = arith.constant 1 : index
    %c0_121 = arith.constant 0 : index
    %c0_122 = arith.constant 0 : index
    %189 = vector.load %arg38[%c1_120, %c0_121, %c0_122] : memref<2x1x32xf32, #tpu.memory_space<vmem>>, vector<1x1x32xf32>
    %190 = vector.shape_cast %189 : vector<1x1x32xf32> to vector<1x32xf32>
    %cst_123 = arith.constant dense<0.000000e+00> : vector<8x64xf32>
    %191 = tpu.matmul %182, %184, %cst_123 {dimension_numbers = #tpu.dot_dimension_numbers<[1], [0], [0], [1], [0, 0, 1, 1], [], []>} : vector<8x32xf32>, vector<32x64xf32>, vector<8x64xf32> -> vector<8x64xf32>
    %192 = vector.broadcast %186 : vector<1x64xf32> to vector<8x64xf32>
    %193 = arith.addf %191, %192 : vector<8x64xf32>
    %cst_124 = arith.constant 0.000000e+00 : f32
    %194 = vector.broadcast %cst_124 : f32 to vector<8x64xf32>
    %195 = arith.maximumf %193, %194 : vector<8x64xf32>
    %cst_125 = arith.constant dense<0.000000e+00> : vector<8x32xf32>
    %196 = tpu.matmul %195, %188, %cst_125 {dimension_numbers = #tpu.dot_dimension_numbers<[1], [0], [0], [1], [0, 0, 1, 1], [], []>} : vector<8x64xf32>, vector<64x32xf32>, vector<8x32xf32> -> vector<8x32xf32>
    %197 = vector.broadcast %190 : vector<1x32xf32> to vector<8x32xf32>
    %198 = arith.addf %196, %197 : vector<8x32xf32>
    %199 = arith.addf %182, %198 : vector<8x32xf32>
    %c1_126 = arith.constant 1 : index
    %c0_127 = arith.constant 0 : index
    %c0_128 = arith.constant 0 : index
    %200 = vector.load %arg43[%c1_126, %c0_127, %c0_128] : memref<2x1x32xf32, #tpu.memory_space<vmem>>, vector<1x1x32xf32>
    %201 = vector.shape_cast %200 : vector<1x1x32xf32> to vector<1x32xf32>
    %c1_129 = arith.constant 1 : index
    %c0_130 = arith.constant 0 : index
    %c0_131 = arith.constant 0 : index
    %202 = vector.load %arg42[%c1_129, %c0_130, %c0_131] : memref<2x1x32xf32, #tpu.memory_space<vmem>>, vector<1x1x32xf32>
    %203 = vector.shape_cast %202 : vector<1x1x32xf32> to vector<1x32xf32>
    %cst_132 = arith.constant dense<0.000000e+00> : vector<8xf32>
    %204 = vector.multi_reduction <add>, %199, %cst_132 [1] : vector<8x32xf32> to vector<8xf32>
    %205 = vector.shape_cast %204 : vector<8xf32> to vector<8x1xf32>
    %cst_133 = arith.constant 3.200000e+01 : f32
    %206 = vector.broadcast %cst_133 : f32 to vector<8x1xf32>
    %207 = arith.divf %205, %206 : vector<8x1xf32>
    %208 = vector.broadcast %207 : vector<8x1xf32> to vector<8x32xf32>
    %209 = arith.subf %199, %208 : vector<8x32xf32>
    %210 = arith.mulf %209, %209 : vector<8x32xf32>
    %cst_134 = arith.constant dense<0.000000e+00> : vector<8xf32>
    %211 = vector.multi_reduction <add>, %210, %cst_134 [1] : vector<8x32xf32> to vector<8xf32>
    %212 = vector.shape_cast %211 : vector<8xf32> to vector<8x1xf32>
    %cst_135 = arith.constant 3.200000e+01 : f32
    %213 = vector.broadcast %cst_135 : f32 to vector<8x1xf32>
    %214 = arith.divf %212, %213 : vector<8x1xf32>
    %215 = vector.broadcast %207 : vector<8x1xf32> to vector<8x32xf32>
    %216 = arith.subf %199, %215 : vector<8x32xf32>
    %cst_136 = arith.constant 9.99999974E-6 : f32
    %217 = vector.broadcast %cst_136 : f32 to vector<8x1xf32>
    %218 = arith.addf %214, %217 : vector<8x1xf32>
    %219 = math.rsqrt %218 : vector<8x1xf32>
    %220 = vector.broadcast %219 : vector<8x1xf32> to vector<8x32xf32>
    %221 = arith.mulf %216, %220 : vector<8x32xf32>
    %222 = vector.broadcast %201 : vector<1x32xf32> to vector<8x32xf32>
    %223 = arith.mulf %221, %222 : vector<8x32xf32>
    %224 = vector.broadcast %203 : vector<1x32xf32> to vector<8x32xf32>
    %225 = arith.addf %223, %224 : vector<8x32xf32>
    %c0_137 = arith.constant 0 : index
    %c0_138 = arith.constant 0 : index
    %226 = vector.load %arg47[%c0_137, %c0_138] : memref<1x32xf32, #tpu.memory_space<vmem>>, vector<1x32xf32>
    %c0_139 = arith.constant 0 : index
    %c0_140 = arith.constant 0 : index
    %227 = vector.load %arg46[%c0_139, %c0_140] : memref<1x32xf32, #tpu.memory_space<vmem>>, vector<1x32xf32>
    %cst_141 = arith.constant dense<0.000000e+00> : vector<8xf32>
    %228 = vector.multi_reduction <add>, %225, %cst_141 [1] : vector<8x32xf32> to vector<8xf32>
    %229 = vector.shape_cast %228 : vector<8xf32> to vector<8x1xf32>
    %cst_142 = arith.constant 3.200000e+01 : f32
    %230 = vector.broadcast %cst_142 : f32 to vector<8x1xf32>
    %231 = arith.divf %229, %230 : vector<8x1xf32>
    %232 = vector.broadcast %231 : vector<8x1xf32> to vector<8x32xf32>
    %233 = arith.subf %225, %232 : vector<8x32xf32>
    %234 = arith.mulf %233, %233 : vector<8x32xf32>
    %cst_143 = arith.constant dense<0.000000e+00> : vector<8xf32>
    %235 = vector.multi_reduction <add>, %234, %cst_143 [1] : vector<8x32xf32> to vector<8xf32>
    %236 = vector.shape_cast %235 : vector<8xf32> to vector<8x1xf32>
    %cst_144 = arith.constant 3.200000e+01 : f32
    %237 = vector.broadcast %cst_144 : f32 to vector<8x1xf32>
    %238 = arith.divf %236, %237 : vector<8x1xf32>
    %239 = vector.broadcast %231 : vector<8x1xf32> to vector<8x32xf32>
    %240 = arith.subf %225, %239 : vector<8x32xf32>
    %cst_145 = arith.constant 9.99999974E-6 : f32
    %241 = vector.broadcast %cst_145 : f32 to vector<8x1xf32>
    %242 = arith.addf %238, %241 : vector<8x1xf32>
    %243 = math.rsqrt %242 : vector<8x1xf32>
    %244 = vector.broadcast %243 : vector<8x1xf32> to vector<8x32xf32>
    %245 = arith.mulf %240, %244 : vector<8x32xf32>
    %246 = vector.broadcast %226 : vector<1x32xf32> to vector<8x32xf32>
    %247 = arith.mulf %245, %246 : vector<8x32xf32>
    %248 = vector.broadcast %227 : vector<1x32xf32> to vector<8x32xf32>
    %249 = arith.addf %247, %248 : vector<8x32xf32>
    %c0_146 = arith.constant 0 : index
    %c0_147 = arith.constant 0 : index
    %c0_148 = arith.constant 0 : index
    %250 = vector.load %arg31[%c0_146, %c0_147, %c0_148] : memref<2x32x96xf32, #tpu.memory_space<vmem>>, vector<1x32x96xf32>
    %251 = vector.shape_cast %250 : vector<1x32x96xf32> to vector<32x96xf32>
    %cst_149 = arith.constant dense<0.000000e+00> : vector<8x96xf32>
    %252 = tpu.matmul %9, %251, %cst_149 {dimension_numbers = #tpu.dot_dimension_numbers<[1], [0], [0], [1], [0, 0, 1, 1], [], []>} : vector<8x32xf32>, vector<32x96xf32>, vector<8x96xf32> -> vector<8x96xf32>
    %c0_150 = arith.constant 0 : index
    %c0_151 = arith.constant 0 : index
    %c0_152 = arith.constant 0 : index
    %253 = vector.load %arg29[%c0_150, %c0_151, %c0_152] : memref<2x1x96xf32, #tpu.memory_space<vmem>>, vector<1x1x96xf32>
    %254 = vector.shape_cast %253 : vector<1x1x96xf32> to vector<1x96xf32>
    %255 = vector.broadcast %254 : vector<1x96xf32> to vector<8x96xf32>
    %256 = arith.addf %252, %255 : vector<8x96xf32>
    %257 = vector.extract_strided_slice %256 {offsets = [0, 0], sizes = [8, 32], strides = [1, 1]} : vector<8x96xf32> to vector<8x32xf32>
    %258 = vector.extract_strided_slice %256 {offsets = [0, 32], sizes = [8, 64], strides = [1, 1]} : vector<8x96xf32> to vector<8x64xf32>
    %c0_153 = arith.constant 0 : index
    %c0_154 = arith.constant 0 : index
    %c0_155 = arith.constant 0 : index
    %259 = vector.load %arg30[%c0_153, %c0_154, %c0_155] : memref<2x32x32xf32, #tpu.memory_space<vmem>>, vector<1x32x32xf32>
    %260 = vector.shape_cast %259 : vector<1x32x32xf32> to vector<32x32xf32>
    %c0_156 = arith.constant 0 : index
    %c0_157 = arith.constant 0 : index
    %c0_158 = arith.constant 0 : index
    %261 = vector.load %arg28[%c0_156, %c0_157, %c0_158] : memref<2x1x32xf32, #tpu.memory_space<vmem>>, vector<1x1x32xf32>
    %262 = vector.shape_cast %261 : vector<1x1x32xf32> to vector<1x32xf32>
    %cst_159 = arith.constant 0.353553385 : f32
    %263 = vector.broadcast %cst_159 : f32 to vector<8x32xf32>
    %264 = arith.mulf %257, %263 : vector<8x32xf32>
    %cst_160 = arith.constant dense<0.000000e+00> : vector<32x64xf32>
    %265 = tpu.matmul %15, %258, %cst_160 {dimension_numbers = #tpu.dot_dimension_numbers<[1], [0], [0], [1], [0, 0, 1, 1], [], []>} : vector<32x8xf32>, vector<8x64xf32>, vector<32x64xf32> -> vector<32x64xf32>
    %266 = vector.extract_strided_slice %265 {offsets = [0, 0], sizes = [32, 32], strides = [1, 1]} : vector<32x64xf32> to vector<32x32xf32>
    %267 = arith.mulf %266, %16 : vector<32x32xf32>
    %268 = vector.extract_strided_slice %265 {offsets = [0, 32], sizes = [32, 32], strides = [1, 1]} : vector<32x64xf32> to vector<32x32xf32>
    %269 = arith.mulf %268, %16 : vector<32x32xf32>
    %cst_161 = arith.constant dense<0.000000e+00> : vector<8x32xf32>
    %270 = tpu.matmul %264, %267, %cst_161 {dimension_numbers = #tpu.dot_dimension_numbers<[1], [1], [0], [0], [0, 0, 1, 0], [], []>} : vector<8x32xf32>, vector<32x32xf32>, vector<8x32xf32> -> vector<8x32xf32>
    %271 = arith.addf %270, %11 : vector<8x32xf32>
    %cst_162 = arith.constant dense<0xFF800000> : vector<8xf32>
    %272 = vector.multi_reduction <maximumf>, %271, %cst_162 [1] : vector<8x32xf32> to vector<8xf32>
    %273 = vector.shape_cast %272 : vector<8xf32> to vector<8x1xf32>
    %274 = vector.broadcast %273 : vector<8x1xf32> to vector<8x32xf32>
    %275 = arith.subf %271, %274 : vector<8x32xf32>
    %276 = math.exp %275 : vector<8x32xf32>
    %cst_163 = arith.constant dense<0.000000e+00> : vector<8x32xf32>
    %277 = tpu.matmul %276, %17, %cst_163 {dimension_numbers = #tpu.dot_dimension_numbers<[1], [0], [0], [1], [0, 0, 1, 1], [], []>} : vector<8x32xf32>, vector<32x32xf32>, vector<8x32xf32> -> vector<8x32xf32>
    %278 = tpu.reciprocal %277 {approx = true} : vector<8x32xf32> -> vector<8x32xf32>
    %279 = arith.mulf %276, %278 : vector<8x32xf32>
    %cst_164 = arith.constant dense<0.000000e+00> : vector<8x32xf32>
    %280 = tpu.matmul %279, %269, %cst_164 {dimension_numbers = #tpu.dot_dimension_numbers<[1], [0], [0], [1], [0, 0, 1, 1], [], []>} : vector<8x32xf32>, vector<32x32xf32>, vector<8x32xf32> -> vector<8x32xf32>
    %cst_165 = arith.constant dense<0.000000e+00> : vector<8x32xf32>
    %281 = tpu.matmul %280, %260, %cst_165 {dimension_numbers = #tpu.dot_dimension_numbers<[1], [0], [0], [1], [0, 0, 1, 1], [], []>} : vector<8x32xf32>, vector<32x32xf32>, vector<8x32xf32> -> vector<8x32xf32>
    %282 = vector.broadcast %262 : vector<1x32xf32> to vector<8x32xf32>
    %283 = arith.addf %281, %282 : vector<8x32xf32>
    %284 = arith.addf %9, %283 : vector<8x32xf32>
    %c0_166 = arith.constant 0 : index
    %c0_167 = arith.constant 0 : index
    %c0_168 = arith.constant 0 : index
    %285 = vector.load %arg23[%c0_166, %c0_167, %c0_168] : memref<2x1x32xf32, #tpu.memory_space<vmem>>, vector<1x1x32xf32>
    %286 = vector.shape_cast %285 : vector<1x1x32xf32> to vector<1x32xf32>
    %c0_169 = arith.constant 0 : index
    %c0_170 = arith.constant 0 : index
    %c0_171 = arith.constant 0 : index
    %287 = vector.load %arg22[%c0_169, %c0_170, %c0_171] : memref<2x1x32xf32, #tpu.memory_space<vmem>>, vector<1x1x32xf32>
    %288 = vector.shape_cast %287 : vector<1x1x32xf32> to vector<1x32xf32>
    %cst_172 = arith.constant dense<0.000000e+00> : vector<8xf32>
    %289 = vector.multi_reduction <add>, %284, %cst_172 [1] : vector<8x32xf32> to vector<8xf32>
    %290 = vector.shape_cast %289 : vector<8xf32> to vector<8x1xf32>
    %cst_173 = arith.constant 3.200000e+01 : f32
    %291 = vector.broadcast %cst_173 : f32 to vector<8x1xf32>
    %292 = arith.divf %290, %291 : vector<8x1xf32>
    %293 = vector.broadcast %292 : vector<8x1xf32> to vector<8x32xf32>
    %294 = arith.subf %284, %293 : vector<8x32xf32>
    %295 = arith.mulf %294, %294 : vector<8x32xf32>
    %cst_174 = arith.constant dense<0.000000e+00> : vector<8xf32>
    %296 = vector.multi_reduction <add>, %295, %cst_174 [1] : vector<8x32xf32> to vector<8xf32>
    %297 = vector.shape_cast %296 : vector<8xf32> to vector<8x1xf32>
    %cst_175 = arith.constant 3.200000e+01 : f32
    %298 = vector.broadcast %cst_175 : f32 to vector<8x1xf32>
    %299 = arith.divf %297, %298 : vector<8x1xf32>
    %300 = vector.broadcast %292 : vector<8x1xf32> to vector<8x32xf32>
    %301 = arith.subf %284, %300 : vector<8x32xf32>
    %cst_176 = arith.constant 9.99999974E-6 : f32
    %302 = vector.broadcast %cst_176 : f32 to vector<8x1xf32>
    %303 = arith.addf %299, %302 : vector<8x1xf32>
    %304 = math.rsqrt %303 : vector<8x1xf32>
    %305 = vector.broadcast %304 : vector<8x1xf32> to vector<8x32xf32>
    %306 = arith.mulf %301, %305 : vector<8x32xf32>
    %307 = vector.broadcast %286 : vector<1x32xf32> to vector<8x32xf32>
    %308 = arith.mulf %306, %307 : vector<8x32xf32>
    %309 = vector.broadcast %288 : vector<1x32xf32> to vector<8x32xf32>
    %310 = arith.addf %308, %309 : vector<8x32xf32>
    %c0_177 = arith.constant 0 : index
    %c0_178 = arith.constant 0 : index
    %c0_179 = arith.constant 0 : index
    %311 = vector.load %arg17[%c0_177, %c0_178, %c0_179] : memref<2x32x32xf32, #tpu.memory_space<vmem>>, vector<1x32x32xf32>
    %312 = vector.shape_cast %311 : vector<1x32x32xf32> to vector<32x32xf32>
    %cst_180 = arith.constant dense<0.000000e+00> : vector<8x32xf32>
    %313 = tpu.matmul %310, %312, %cst_180 {dimension_numbers = #tpu.dot_dimension_numbers<[1], [0], [0], [1], [0, 0, 1, 1], [], []>} : vector<8x32xf32>, vector<32x32xf32>, vector<8x32xf32> -> vector<8x32xf32>
    %c0_181 = arith.constant 0 : index
    %c0_182 = arith.constant 0 : index
    %c0_183 = arith.constant 0 : index
    %314 = vector.load %arg14[%c0_181, %c0_182, %c0_183] : memref<2x1x32xf32, #tpu.memory_space<vmem>>, vector<1x1x32xf32>
    %315 = vector.shape_cast %314 : vector<1x1x32xf32> to vector<1x32xf32>
    %316 = vector.broadcast %315 : vector<1x32xf32> to vector<8x32xf32>
    %317 = arith.addf %313, %316 : vector<8x32xf32>
    %c0_184 = arith.constant 0 : index
    %c0_185 = arith.constant 0 : index
    %c0_186 = arith.constant 0 : index
    %318 = vector.load %arg15[%c0_184, %c0_185, %c0_186] : memref<2x32x64xf32, #tpu.memory_space<vmem>>, vector<1x32x64xf32>
    %319 = vector.shape_cast %318 : vector<1x32x64xf32> to vector<32x64xf32>
    %cst_187 = arith.constant dense<0.000000e+00> : vector<8x64xf32>
    %320 = tpu.matmul %249, %319, %cst_187 {dimension_numbers = #tpu.dot_dimension_numbers<[1], [0], [0], [1], [0, 0, 1, 1], [], []>} : vector<8x32xf32>, vector<32x64xf32>, vector<8x64xf32> -> vector<8x64xf32>
    %c0_188 = arith.constant 0 : index
    %c0_189 = arith.constant 0 : index
    %c0_190 = arith.constant 0 : index
    %321 = vector.load %arg12[%c0_188, %c0_189, %c0_190] : memref<2x1x64xf32, #tpu.memory_space<vmem>>, vector<1x1x64xf32>
    %322 = vector.shape_cast %321 : vector<1x1x64xf32> to vector<1x64xf32>
    %323 = vector.broadcast %322 : vector<1x64xf32> to vector<8x64xf32>
    %324 = arith.addf %320, %323 : vector<8x64xf32>
    %c0_191 = arith.constant 0 : index
    %c0_192 = arith.constant 0 : index
    %c0_193 = arith.constant 0 : index
    %325 = vector.load %arg16[%c0_191, %c0_192, %c0_193] : memref<2x32x32xf32, #tpu.memory_space<vmem>>, vector<1x32x32xf32>
    %326 = vector.shape_cast %325 : vector<1x32x32xf32> to vector<32x32xf32>
    %c0_194 = arith.constant 0 : index
    %c0_195 = arith.constant 0 : index
    %c0_196 = arith.constant 0 : index
    %327 = vector.load %arg13[%c0_194, %c0_195, %c0_196] : memref<2x1x32xf32, #tpu.memory_space<vmem>>, vector<1x1x32xf32>
    %328 = vector.shape_cast %327 : vector<1x1x32xf32> to vector<1x32xf32>
    %cst_197 = arith.constant 0.353553385 : f32
    %329 = vector.broadcast %cst_197 : f32 to vector<8x32xf32>
    %330 = arith.mulf %317, %329 : vector<8x32xf32>
    %cst_198 = arith.constant dense<0.000000e+00> : vector<32x64xf32>
    %331 = tpu.matmul %12, %324, %cst_198 {dimension_numbers = #tpu.dot_dimension_numbers<[1], [0], [0], [1], [0, 0, 1, 1], [], []>} : vector<32x8xf32>, vector<8x64xf32>, vector<32x64xf32> -> vector<32x64xf32>
    %332 = vector.extract_strided_slice %331 {offsets = [0, 0], sizes = [32, 32], strides = [1, 1]} : vector<32x64xf32> to vector<32x32xf32>
    %333 = arith.mulf %332, %13 : vector<32x32xf32>
    %334 = vector.extract_strided_slice %331 {offsets = [0, 32], sizes = [32, 32], strides = [1, 1]} : vector<32x64xf32> to vector<32x32xf32>
    %335 = arith.mulf %334, %13 : vector<32x32xf32>
    %cst_199 = arith.constant dense<0.000000e+00> : vector<8x32xf32>
    %336 = tpu.matmul %330, %333, %cst_199 {dimension_numbers = #tpu.dot_dimension_numbers<[1], [1], [0], [0], [0, 0, 1, 0], [], []>} : vector<8x32xf32>, vector<32x32xf32>, vector<8x32xf32> -> vector<8x32xf32>
    %cst_200 = arith.constant dense<0xFF800000> : vector<8xf32>
    %337 = vector.multi_reduction <maximumf>, %336, %cst_200 [1] : vector<8x32xf32> to vector<8xf32>
    %338 = vector.shape_cast %337 : vector<8xf32> to vector<8x1xf32>
    %339 = vector.broadcast %338 : vector<8x1xf32> to vector<8x32xf32>
    %340 = arith.subf %336, %339 : vector<8x32xf32>
    %341 = math.exp %340 : vector<8x32xf32>
    %cst_201 = arith.constant dense<0.000000e+00> : vector<8x32xf32>
    %342 = tpu.matmul %341, %14, %cst_201 {dimension_numbers = #tpu.dot_dimension_numbers<[1], [0], [0], [1], [0, 0, 1, 1], [], []>} : vector<8x32xf32>, vector<32x32xf32>, vector<8x32xf32> -> vector<8x32xf32>
    %343 = tpu.reciprocal %342 {approx = true} : vector<8x32xf32> -> vector<8x32xf32>
    %344 = arith.mulf %341, %343 : vector<8x32xf32>
    %cst_202 = arith.constant dense<0.000000e+00> : vector<8x32xf32>
    %345 = tpu.matmul %344, %335, %cst_202 {dimension_numbers = #tpu.dot_dimension_numbers<[1], [0], [0], [1], [0, 0, 1, 1], [], []>} : vector<8x32xf32>, vector<32x32xf32>, vector<8x32xf32> -> vector<8x32xf32>
    %cst_203 = arith.constant dense<0.000000e+00> : vector<8x32xf32>
    %346 = tpu.matmul %345, %326, %cst_203 {dimension_numbers = #tpu.dot_dimension_numbers<[1], [0], [0], [1], [0, 0, 1, 1], [], []>} : vector<8x32xf32>, vector<32x32xf32>, vector<8x32xf32> -> vector<8x32xf32>
    %347 = vector.broadcast %328 : vector<1x32xf32> to vector<8x32xf32>
    %348 = arith.addf %346, %347 : vector<8x32xf32>
    %349 = arith.addf %310, %348 : vector<8x32xf32>
    %c0_204 = arith.constant 0 : index
    %c0_205 = arith.constant 0 : index
    %c0_206 = arith.constant 0 : index
    %350 = vector.load %arg25[%c0_204, %c0_205, %c0_206] : memref<2x1x32xf32, #tpu.memory_space<vmem>>, vector<1x1x32xf32>
    %351 = vector.shape_cast %350 : vector<1x1x32xf32> to vector<1x32xf32>
    %c0_207 = arith.constant 0 : index
    %c0_208 = arith.constant 0 : index
    %c0_209 = arith.constant 0 : index
    %352 = vector.load %arg24[%c0_207, %c0_208, %c0_209] : memref<2x1x32xf32, #tpu.memory_space<vmem>>, vector<1x1x32xf32>
    %353 = vector.shape_cast %352 : vector<1x1x32xf32> to vector<1x32xf32>
    %cst_210 = arith.constant dense<0.000000e+00> : vector<8xf32>
    %354 = vector.multi_reduction <add>, %349, %cst_210 [1] : vector<8x32xf32> to vector<8xf32>
    %355 = vector.shape_cast %354 : vector<8xf32> to vector<8x1xf32>
    %cst_211 = arith.constant 3.200000e+01 : f32
    %356 = vector.broadcast %cst_211 : f32 to vector<8x1xf32>
    %357 = arith.divf %355, %356 : vector<8x1xf32>
    %358 = vector.broadcast %357 : vector<8x1xf32> to vector<8x32xf32>
    %359 = arith.subf %349, %358 : vector<8x32xf32>
    %360 = arith.mulf %359, %359 : vector<8x32xf32>
    %cst_212 = arith.constant dense<0.000000e+00> : vector<8xf32>
    %361 = vector.multi_reduction <add>, %360, %cst_212 [1] : vector<8x32xf32> to vector<8xf32>
    %362 = vector.shape_cast %361 : vector<8xf32> to vector<8x1xf32>
    %cst_213 = arith.constant 3.200000e+01 : f32
    %363 = vector.broadcast %cst_213 : f32 to vector<8x1xf32>
    %364 = arith.divf %362, %363 : vector<8x1xf32>
    %365 = vector.broadcast %357 : vector<8x1xf32> to vector<8x32xf32>
    %366 = arith.subf %349, %365 : vector<8x32xf32>
    %cst_214 = arith.constant 9.99999974E-6 : f32
    %367 = vector.broadcast %cst_214 : f32 to vector<8x1xf32>
    %368 = arith.addf %364, %367 : vector<8x1xf32>
    %369 = math.rsqrt %368 : vector<8x1xf32>
    %370 = vector.broadcast %369 : vector<8x1xf32> to vector<8x32xf32>
    %371 = arith.mulf %366, %370 : vector<8x32xf32>
    %372 = vector.broadcast %351 : vector<1x32xf32> to vector<8x32xf32>
    %373 = arith.mulf %371, %372 : vector<8x32xf32>
    %374 = vector.broadcast %353 : vector<1x32xf32> to vector<8x32xf32>
    %375 = arith.addf %373, %374 : vector<8x32xf32>
    %c0_215 = arith.constant 0 : index
    %c0_216 = arith.constant 0 : index
    %c0_217 = arith.constant 0 : index
    %376 = vector.load %arg19[%c0_215, %c0_216, %c0_217] : memref<2x32x64xf32, #tpu.memory_space<vmem>>, vector<1x32x64xf32>
    %377 = vector.shape_cast %376 : vector<1x32x64xf32> to vector<32x64xf32>
    %c0_218 = arith.constant 0 : index
    %c0_219 = arith.constant 0 : index
    %c0_220 = arith.constant 0 : index
    %378 = vector.load %arg18[%c0_218, %c0_219, %c0_220] : memref<2x1x64xf32, #tpu.memory_space<vmem>>, vector<1x1x64xf32>
    %379 = vector.shape_cast %378 : vector<1x1x64xf32> to vector<1x64xf32>
    %c0_221 = arith.constant 0 : index
    %c0_222 = arith.constant 0 : index
    %c0_223 = arith.constant 0 : index
    %380 = vector.load %arg21[%c0_221, %c0_222, %c0_223] : memref<2x64x32xf32, #tpu.memory_space<vmem>>, vector<1x64x32xf32>
    %381 = vector.shape_cast %380 : vector<1x64x32xf32> to vector<64x32xf32>
    %c0_224 = arith.constant 0 : index
    %c0_225 = arith.constant 0 : index
    %c0_226 = arith.constant 0 : index
    %382 = vector.load %arg20[%c0_224, %c0_225, %c0_226] : memref<2x1x32xf32, #tpu.memory_space<vmem>>, vector<1x1x32xf32>
    %383 = vector.shape_cast %382 : vector<1x1x32xf32> to vector<1x32xf32>
    %cst_227 = arith.constant dense<0.000000e+00> : vector<8x64xf32>
    %384 = tpu.matmul %375, %377, %cst_227 {dimension_numbers = #tpu.dot_dimension_numbers<[1], [0], [0], [1], [0, 0, 1, 1], [], []>} : vector<8x32xf32>, vector<32x64xf32>, vector<8x64xf32> -> vector<8x64xf32>
    %385 = vector.broadcast %379 : vector<1x64xf32> to vector<8x64xf32>
    %386 = arith.addf %384, %385 : vector<8x64xf32>
    %cst_228 = arith.constant 0.000000e+00 : f32
    %387 = vector.broadcast %cst_228 : f32 to vector<8x64xf32>
    %388 = arith.maximumf %386, %387 : vector<8x64xf32>
    %cst_229 = arith.constant dense<0.000000e+00> : vector<8x32xf32>
    %389 = tpu.matmul %388, %381, %cst_229 {dimension_numbers = #tpu.dot_dimension_numbers<[1], [0], [0], [1], [0, 0, 1, 1], [], []>} : vector<8x64xf32>, vector<64x32xf32>, vector<8x32xf32> -> vector<8x32xf32>
    %390 = vector.broadcast %383 : vector<1x32xf32> to vector<8x32xf32>
    %391 = arith.addf %389, %390 : vector<8x32xf32>
    %392 = arith.addf %375, %391 : vector<8x32xf32>
    %c0_230 = arith.constant 0 : index
    %c0_231 = arith.constant 0 : index
    %c0_232 = arith.constant 0 : index
    %393 = vector.load %arg27[%c0_230, %c0_231, %c0_232] : memref<2x1x32xf32, #tpu.memory_space<vmem>>, vector<1x1x32xf32>
    %394 = vector.shape_cast %393 : vector<1x1x32xf32> to vector<1x32xf32>
    %c0_233 = arith.constant 0 : index
    %c0_234 = arith.constant 0 : index
    %c0_235 = arith.constant 0 : index
    %395 = vector.load %arg26[%c0_233, %c0_234, %c0_235] : memref<2x1x32xf32, #tpu.memory_space<vmem>>, vector<1x1x32xf32>
    %396 = vector.shape_cast %395 : vector<1x1x32xf32> to vector<1x32xf32>
    %cst_236 = arith.constant dense<0.000000e+00> : vector<8xf32>
    %397 = vector.multi_reduction <add>, %392, %cst_236 [1] : vector<8x32xf32> to vector<8xf32>
    %398 = vector.shape_cast %397 : vector<8xf32> to vector<8x1xf32>
    %cst_237 = arith.constant 3.200000e+01 : f32
    %399 = vector.broadcast %cst_237 : f32 to vector<8x1xf32>
    %400 = arith.divf %398, %399 : vector<8x1xf32>
    %401 = vector.broadcast %400 : vector<8x1xf32> to vector<8x32xf32>
    %402 = arith.subf %392, %401 : vector<8x32xf32>
    %403 = arith.mulf %402, %402 : vector<8x32xf32>
    %cst_238 = arith.constant dense<0.000000e+00> : vector<8xf32>
    %404 = vector.multi_reduction <add>, %403, %cst_238 [1] : vector<8x32xf32> to vector<8xf32>
    %405 = vector.shape_cast %404 : vector<8xf32> to vector<8x1xf32>
    %cst_239 = arith.constant 3.200000e+01 : f32
    %406 = vector.broadcast %cst_239 : f32 to vector<8x1xf32>
    %407 = arith.divf %405, %406 : vector<8x1xf32>
    %408 = vector.broadcast %400 : vector<8x1xf32> to vector<8x32xf32>
    %409 = arith.subf %392, %408 : vector<8x32xf32>
    %cst_240 = arith.constant 9.99999974E-6 : f32
    %410 = vector.broadcast %cst_240 : f32 to vector<8x1xf32>
    %411 = arith.addf %407, %410 : vector<8x1xf32>
    %412 = math.rsqrt %411 : vector<8x1xf32>
    %413 = vector.broadcast %412 : vector<8x1xf32> to vector<8x32xf32>
    %414 = arith.mulf %409, %413 : vector<8x32xf32>
    %415 = vector.broadcast %394 : vector<1x32xf32> to vector<8x32xf32>
    %416 = arith.mulf %414, %415 : vector<8x32xf32>
    %417 = vector.broadcast %396 : vector<1x32xf32> to vector<8x32xf32>
    %418 = arith.addf %416, %417 : vector<8x32xf32>
    %c1_241 = arith.constant 1 : index
    %c0_242 = arith.constant 0 : index
    %c0_243 = arith.constant 0 : index
    %419 = vector.load %arg31[%c1_241, %c0_242, %c0_243] : memref<2x32x96xf32, #tpu.memory_space<vmem>>, vector<1x32x96xf32>
    %420 = vector.shape_cast %419 : vector<1x32x96xf32> to vector<32x96xf32>
    %cst_244 = arith.constant dense<0.000000e+00> : vector<8x96xf32>
    %421 = tpu.matmul %418, %420, %cst_244 {dimension_numbers = #tpu.dot_dimension_numbers<[1], [0], [0], [1], [0, 0, 1, 1], [], []>} : vector<8x32xf32>, vector<32x96xf32>, vector<8x96xf32> -> vector<8x96xf32>
    %c1_245 = arith.constant 1 : index
    %c0_246 = arith.constant 0 : index
    %c0_247 = arith.constant 0 : index
    %422 = vector.load %arg29[%c1_245, %c0_246, %c0_247] : memref<2x1x96xf32, #tpu.memory_space<vmem>>, vector<1x1x96xf32>
    %423 = vector.shape_cast %422 : vector<1x1x96xf32> to vector<1x96xf32>
    %424 = vector.broadcast %423 : vector<1x96xf32> to vector<8x96xf32>
    %425 = arith.addf %421, %424 : vector<8x96xf32>
    %426 = vector.extract_strided_slice %425 {offsets = [0, 0], sizes = [8, 32], strides = [1, 1]} : vector<8x96xf32> to vector<8x32xf32>
    %427 = vector.extract_strided_slice %425 {offsets = [0, 32], sizes = [8, 64], strides = [1, 1]} : vector<8x96xf32> to vector<8x64xf32>
    %c1_248 = arith.constant 1 : index
    %c0_249 = arith.constant 0 : index
    %c0_250 = arith.constant 0 : index
    %428 = vector.load %arg30[%c1_248, %c0_249, %c0_250] : memref<2x32x32xf32, #tpu.memory_space<vmem>>, vector<1x32x32xf32>
    %429 = vector.shape_cast %428 : vector<1x32x32xf32> to vector<32x32xf32>
    %c1_251 = arith.constant 1 : index
    %c0_252 = arith.constant 0 : index
    %c0_253 = arith.constant 0 : index
    %430 = vector.load %arg28[%c1_251, %c0_252, %c0_253] : memref<2x1x32xf32, #tpu.memory_space<vmem>>, vector<1x1x32xf32>
    %431 = vector.shape_cast %430 : vector<1x1x32xf32> to vector<1x32xf32>
    %cst_254 = arith.constant 0.353553385 : f32
    %432 = vector.broadcast %cst_254 : f32 to vector<8x32xf32>
    %433 = arith.mulf %426, %432 : vector<8x32xf32>
    %cst_255 = arith.constant dense<0.000000e+00> : vector<32x64xf32>
    %434 = tpu.matmul %15, %427, %cst_255 {dimension_numbers = #tpu.dot_dimension_numbers<[1], [0], [0], [1], [0, 0, 1, 1], [], []>} : vector<32x8xf32>, vector<8x64xf32>, vector<32x64xf32> -> vector<32x64xf32>
    %435 = vector.extract_strided_slice %434 {offsets = [0, 0], sizes = [32, 32], strides = [1, 1]} : vector<32x64xf32> to vector<32x32xf32>
    %436 = arith.mulf %435, %16 : vector<32x32xf32>
    %437 = vector.extract_strided_slice %434 {offsets = [0, 32], sizes = [32, 32], strides = [1, 1]} : vector<32x64xf32> to vector<32x32xf32>
    %438 = arith.mulf %437, %16 : vector<32x32xf32>
    %cst_256 = arith.constant dense<0.000000e+00> : vector<8x32xf32>
    %439 = tpu.matmul %433, %436, %cst_256 {dimension_numbers = #tpu.dot_dimension_numbers<[1], [1], [0], [0], [0, 0, 1, 0], [], []>} : vector<8x32xf32>, vector<32x32xf32>, vector<8x32xf32> -> vector<8x32xf32>
    %440 = arith.addf %439, %11 : vector<8x32xf32>
    %cst_257 = arith.constant dense<0xFF800000> : vector<8xf32>
    %441 = vector.multi_reduction <maximumf>, %440, %cst_257 [1] : vector<8x32xf32> to vector<8xf32>
    %442 = vector.shape_cast %441 : vector<8xf32> to vector<8x1xf32>
    %443 = vector.broadcast %442 : vector<8x1xf32> to vector<8x32xf32>
    %444 = arith.subf %440, %443 : vector<8x32xf32>
    %445 = math.exp %444 : vector<8x32xf32>
    %cst_258 = arith.constant dense<0.000000e+00> : vector<8x32xf32>
    %446 = tpu.matmul %445, %17, %cst_258 {dimension_numbers = #tpu.dot_dimension_numbers<[1], [0], [0], [1], [0, 0, 1, 1], [], []>} : vector<8x32xf32>, vector<32x32xf32>, vector<8x32xf32> -> vector<8x32xf32>
    %447 = tpu.reciprocal %446 {approx = true} : vector<8x32xf32> -> vector<8x32xf32>
    %448 = arith.mulf %445, %447 : vector<8x32xf32>
    %cst_259 = arith.constant dense<0.000000e+00> : vector<8x32xf32>
    %449 = tpu.matmul %448, %438, %cst_259 {dimension_numbers = #tpu.dot_dimension_numbers<[1], [0], [0], [1], [0, 0, 1, 1], [], []>} : vector<8x32xf32>, vector<32x32xf32>, vector<8x32xf32> -> vector<8x32xf32>
    %cst_260 = arith.constant dense<0.000000e+00> : vector<8x32xf32>
    %450 = tpu.matmul %449, %429, %cst_260 {dimension_numbers = #tpu.dot_dimension_numbers<[1], [0], [0], [1], [0, 0, 1, 1], [], []>} : vector<8x32xf32>, vector<32x32xf32>, vector<8x32xf32> -> vector<8x32xf32>
    %451 = vector.broadcast %431 : vector<1x32xf32> to vector<8x32xf32>
    %452 = arith.addf %450, %451 : vector<8x32xf32>
    %453 = arith.addf %418, %452 : vector<8x32xf32>
    %c1_261 = arith.constant 1 : index
    %c0_262 = arith.constant 0 : index
    %c0_263 = arith.constant 0 : index
    %454 = vector.load %arg23[%c1_261, %c0_262, %c0_263] : memref<2x1x32xf32, #tpu.memory_space<vmem>>, vector<1x1x32xf32>
    %455 = vector.shape_cast %454 : vector<1x1x32xf32> to vector<1x32xf32>
    %c1_264 = arith.constant 1 : index
    %c0_265 = arith.constant 0 : index
    %c0_266 = arith.constant 0 : index
    %456 = vector.load %arg22[%c1_264, %c0_265, %c0_266] : memref<2x1x32xf32, #tpu.memory_space<vmem>>, vector<1x1x32xf32>
    %457 = vector.shape_cast %456 : vector<1x1x32xf32> to vector<1x32xf32>
    %cst_267 = arith.constant dense<0.000000e+00> : vector<8xf32>
    %458 = vector.multi_reduction <add>, %453, %cst_267 [1] : vector<8x32xf32> to vector<8xf32>
    %459 = vector.shape_cast %458 : vector<8xf32> to vector<8x1xf32>
    %cst_268 = arith.constant 3.200000e+01 : f32
    %460 = vector.broadcast %cst_268 : f32 to vector<8x1xf32>
    %461 = arith.divf %459, %460 : vector<8x1xf32>
    %462 = vector.broadcast %461 : vector<8x1xf32> to vector<8x32xf32>
    %463 = arith.subf %453, %462 : vector<8x32xf32>
    %464 = arith.mulf %463, %463 : vector<8x32xf32>
    %cst_269 = arith.constant dense<0.000000e+00> : vector<8xf32>
    %465 = vector.multi_reduction <add>, %464, %cst_269 [1] : vector<8x32xf32> to vector<8xf32>
    %466 = vector.shape_cast %465 : vector<8xf32> to vector<8x1xf32>
    %cst_270 = arith.constant 3.200000e+01 : f32
    %467 = vector.broadcast %cst_270 : f32 to vector<8x1xf32>
    %468 = arith.divf %466, %467 : vector<8x1xf32>
    %469 = vector.broadcast %461 : vector<8x1xf32> to vector<8x32xf32>
    %470 = arith.subf %453, %469 : vector<8x32xf32>
    %cst_271 = arith.constant 9.99999974E-6 : f32
    %471 = vector.broadcast %cst_271 : f32 to vector<8x1xf32>
    %472 = arith.addf %468, %471 : vector<8x1xf32>
    %473 = math.rsqrt %472 : vector<8x1xf32>
    %474 = vector.broadcast %473 : vector<8x1xf32> to vector<8x32xf32>
    %475 = arith.mulf %470, %474 : vector<8x32xf32>
    %476 = vector.broadcast %455 : vector<1x32xf32> to vector<8x32xf32>
    %477 = arith.mulf %475, %476 : vector<8x32xf32>
    %478 = vector.broadcast %457 : vector<1x32xf32> to vector<8x32xf32>
    %479 = arith.addf %477, %478 : vector<8x32xf32>
    %c1_272 = arith.constant 1 : index
    %c0_273 = arith.constant 0 : index
    %c0_274 = arith.constant 0 : index
    %480 = vector.load %arg17[%c1_272, %c0_273, %c0_274] : memref<2x32x32xf32, #tpu.memory_space<vmem>>, vector<1x32x32xf32>
    %481 = vector.shape_cast %480 : vector<1x32x32xf32> to vector<32x32xf32>
    %cst_275 = arith.constant dense<0.000000e+00> : vector<8x32xf32>
    %482 = tpu.matmul %479, %481, %cst_275 {dimension_numbers = #tpu.dot_dimension_numbers<[1], [0], [0], [1], [0, 0, 1, 1], [], []>} : vector<8x32xf32>, vector<32x32xf32>, vector<8x32xf32> -> vector<8x32xf32>
    %c1_276 = arith.constant 1 : index
    %c0_277 = arith.constant 0 : index
    %c0_278 = arith.constant 0 : index
    %483 = vector.load %arg14[%c1_276, %c0_277, %c0_278] : memref<2x1x32xf32, #tpu.memory_space<vmem>>, vector<1x1x32xf32>
    %484 = vector.shape_cast %483 : vector<1x1x32xf32> to vector<1x32xf32>
    %485 = vector.broadcast %484 : vector<1x32xf32> to vector<8x32xf32>
    %486 = arith.addf %482, %485 : vector<8x32xf32>
    %c1_279 = arith.constant 1 : index
    %c0_280 = arith.constant 0 : index
    %c0_281 = arith.constant 0 : index
    %487 = vector.load %arg15[%c1_279, %c0_280, %c0_281] : memref<2x32x64xf32, #tpu.memory_space<vmem>>, vector<1x32x64xf32>
    %488 = vector.shape_cast %487 : vector<1x32x64xf32> to vector<32x64xf32>
    %cst_282 = arith.constant dense<0.000000e+00> : vector<8x64xf32>
    %489 = tpu.matmul %249, %488, %cst_282 {dimension_numbers = #tpu.dot_dimension_numbers<[1], [0], [0], [1], [0, 0, 1, 1], [], []>} : vector<8x32xf32>, vector<32x64xf32>, vector<8x64xf32> -> vector<8x64xf32>
    %c1_283 = arith.constant 1 : index
    %c0_284 = arith.constant 0 : index
    %c0_285 = arith.constant 0 : index
    %490 = vector.load %arg12[%c1_283, %c0_284, %c0_285] : memref<2x1x64xf32, #tpu.memory_space<vmem>>, vector<1x1x64xf32>
    %491 = vector.shape_cast %490 : vector<1x1x64xf32> to vector<1x64xf32>
    %492 = vector.broadcast %491 : vector<1x64xf32> to vector<8x64xf32>
    %493 = arith.addf %489, %492 : vector<8x64xf32>
    %c1_286 = arith.constant 1 : index
    %c0_287 = arith.constant 0 : index
    %c0_288 = arith.constant 0 : index
    %494 = vector.load %arg16[%c1_286, %c0_287, %c0_288] : memref<2x32x32xf32, #tpu.memory_space<vmem>>, vector<1x32x32xf32>
    %495 = vector.shape_cast %494 : vector<1x32x32xf32> to vector<32x32xf32>
    %c1_289 = arith.constant 1 : index
    %c0_290 = arith.constant 0 : index
    %c0_291 = arith.constant 0 : index
    %496 = vector.load %arg13[%c1_289, %c0_290, %c0_291] : memref<2x1x32xf32, #tpu.memory_space<vmem>>, vector<1x1x32xf32>
    %497 = vector.shape_cast %496 : vector<1x1x32xf32> to vector<1x32xf32>
    %cst_292 = arith.constant 0.353553385 : f32
    %498 = vector.broadcast %cst_292 : f32 to vector<8x32xf32>
    %499 = arith.mulf %486, %498 : vector<8x32xf32>
    %cst_293 = arith.constant dense<0.000000e+00> : vector<32x64xf32>
    %500 = tpu.matmul %12, %493, %cst_293 {dimension_numbers = #tpu.dot_dimension_numbers<[1], [0], [0], [1], [0, 0, 1, 1], [], []>} : vector<32x8xf32>, vector<8x64xf32>, vector<32x64xf32> -> vector<32x64xf32>
    %501 = vector.extract_strided_slice %500 {offsets = [0, 0], sizes = [32, 32], strides = [1, 1]} : vector<32x64xf32> to vector<32x32xf32>
    %502 = arith.mulf %501, %13 : vector<32x32xf32>
    %503 = vector.extract_strided_slice %500 {offsets = [0, 32], sizes = [32, 32], strides = [1, 1]} : vector<32x64xf32> to vector<32x32xf32>
    %504 = arith.mulf %503, %13 : vector<32x32xf32>
    %cst_294 = arith.constant dense<0.000000e+00> : vector<8x32xf32>
    %505 = tpu.matmul %499, %502, %cst_294 {dimension_numbers = #tpu.dot_dimension_numbers<[1], [1], [0], [0], [0, 0, 1, 0], [], []>} : vector<8x32xf32>, vector<32x32xf32>, vector<8x32xf32> -> vector<8x32xf32>
    %cst_295 = arith.constant dense<0xFF800000> : vector<8xf32>
    %506 = vector.multi_reduction <maximumf>, %505, %cst_295 [1] : vector<8x32xf32> to vector<8xf32>
    %507 = vector.shape_cast %506 : vector<8xf32> to vector<8x1xf32>
    %508 = vector.broadcast %507 : vector<8x1xf32> to vector<8x32xf32>
    %509 = arith.subf %505, %508 : vector<8x32xf32>
    %510 = math.exp %509 : vector<8x32xf32>
    %cst_296 = arith.constant dense<0.000000e+00> : vector<8x32xf32>
    %511 = tpu.matmul %510, %14, %cst_296 {dimension_numbers = #tpu.dot_dimension_numbers<[1], [0], [0], [1], [0, 0, 1, 1], [], []>} : vector<8x32xf32>, vector<32x32xf32>, vector<8x32xf32> -> vector<8x32xf32>
    %512 = tpu.reciprocal %511 {approx = true} : vector<8x32xf32> -> vector<8x32xf32>
    %513 = arith.mulf %510, %512 : vector<8x32xf32>
    %cst_297 = arith.constant dense<0.000000e+00> : vector<8x32xf32>
    %514 = tpu.matmul %513, %504, %cst_297 {dimension_numbers = #tpu.dot_dimension_numbers<[1], [0], [0], [1], [0, 0, 1, 1], [], []>} : vector<8x32xf32>, vector<32x32xf32>, vector<8x32xf32> -> vector<8x32xf32>
    %cst_298 = arith.constant dense<0.000000e+00> : vector<8x32xf32>
    %515 = tpu.matmul %514, %495, %cst_298 {dimension_numbers = #tpu.dot_dimension_numbers<[1], [0], [0], [1], [0, 0, 1, 1], [], []>} : vector<8x32xf32>, vector<32x32xf32>, vector<8x32xf32> -> vector<8x32xf32>
    %516 = vector.broadcast %497 : vector<1x32xf32> to vector<8x32xf32>
    %517 = arith.addf %515, %516 : vector<8x32xf32>
    %518 = arith.addf %479, %517 : vector<8x32xf32>
    %c1_299 = arith.constant 1 : index
    %c0_300 = arith.constant 0 : index
    %c0_301 = arith.constant 0 : index
    %519 = vector.load %arg25[%c1_299, %c0_300, %c0_301] : memref<2x1x32xf32, #tpu.memory_space<vmem>>, vector<1x1x32xf32>
    %520 = vector.shape_cast %519 : vector<1x1x32xf32> to vector<1x32xf32>
    %c1_302 = arith.constant 1 : index
    %c0_303 = arith.constant 0 : index
    %c0_304 = arith.constant 0 : index
    %521 = vector.load %arg24[%c1_302, %c0_303, %c0_304] : memref<2x1x32xf32, #tpu.memory_space<vmem>>, vector<1x1x32xf32>
    %522 = vector.shape_cast %521 : vector<1x1x32xf32> to vector<1x32xf32>
    %cst_305 = arith.constant dense<0.000000e+00> : vector<8xf32>
    %523 = vector.multi_reduction <add>, %518, %cst_305 [1] : vector<8x32xf32> to vector<8xf32>
    %524 = vector.shape_cast %523 : vector<8xf32> to vector<8x1xf32>
    %cst_306 = arith.constant 3.200000e+01 : f32
    %525 = vector.broadcast %cst_306 : f32 to vector<8x1xf32>
    %526 = arith.divf %524, %525 : vector<8x1xf32>
    %527 = vector.broadcast %526 : vector<8x1xf32> to vector<8x32xf32>
    %528 = arith.subf %518, %527 : vector<8x32xf32>
    %529 = arith.mulf %528, %528 : vector<8x32xf32>
    %cst_307 = arith.constant dense<0.000000e+00> : vector<8xf32>
    %530 = vector.multi_reduction <add>, %529, %cst_307 [1] : vector<8x32xf32> to vector<8xf32>
    %531 = vector.shape_cast %530 : vector<8xf32> to vector<8x1xf32>
    %cst_308 = arith.constant 3.200000e+01 : f32
    %532 = vector.broadcast %cst_308 : f32 to vector<8x1xf32>
    %533 = arith.divf %531, %532 : vector<8x1xf32>
    %534 = vector.broadcast %526 : vector<8x1xf32> to vector<8x32xf32>
    %535 = arith.subf %518, %534 : vector<8x32xf32>
    %cst_309 = arith.constant 9.99999974E-6 : f32
    %536 = vector.broadcast %cst_309 : f32 to vector<8x1xf32>
    %537 = arith.addf %533, %536 : vector<8x1xf32>
    %538 = math.rsqrt %537 : vector<8x1xf32>
    %539 = vector.broadcast %538 : vector<8x1xf32> to vector<8x32xf32>
    %540 = arith.mulf %535, %539 : vector<8x32xf32>
    %541 = vector.broadcast %520 : vector<1x32xf32> to vector<8x32xf32>
    %542 = arith.mulf %540, %541 : vector<8x32xf32>
    %543 = vector.broadcast %522 : vector<1x32xf32> to vector<8x32xf32>
    %544 = arith.addf %542, %543 : vector<8x32xf32>
    %c1_310 = arith.constant 1 : index
    %c0_311 = arith.constant 0 : index
    %c0_312 = arith.constant 0 : index
    %545 = vector.load %arg19[%c1_310, %c0_311, %c0_312] : memref<2x32x64xf32, #tpu.memory_space<vmem>>, vector<1x32x64xf32>
    %546 = vector.shape_cast %545 : vector<1x32x64xf32> to vector<32x64xf32>
    %c1_313 = arith.constant 1 : index
    %c0_314 = arith.constant 0 : index
    %c0_315 = arith.constant 0 : index
    %547 = vector.load %arg18[%c1_313, %c0_314, %c0_315] : memref<2x1x64xf32, #tpu.memory_space<vmem>>, vector<1x1x64xf32>
    %548 = vector.shape_cast %547 : vector<1x1x64xf32> to vector<1x64xf32>
    %c1_316 = arith.constant 1 : index
    %c0_317 = arith.constant 0 : index
    %c0_318 = arith.constant 0 : index
    %549 = vector.load %arg21[%c1_316, %c0_317, %c0_318] : memref<2x64x32xf32, #tpu.memory_space<vmem>>, vector<1x64x32xf32>
    %550 = vector.shape_cast %549 : vector<1x64x32xf32> to vector<64x32xf32>
    %c1_319 = arith.constant 1 : index
    %c0_320 = arith.constant 0 : index
    %c0_321 = arith.constant 0 : index
    %551 = vector.load %arg20[%c1_319, %c0_320, %c0_321] : memref<2x1x32xf32, #tpu.memory_space<vmem>>, vector<1x1x32xf32>
    %552 = vector.shape_cast %551 : vector<1x1x32xf32> to vector<1x32xf32>
    %cst_322 = arith.constant dense<0.000000e+00> : vector<8x64xf32>
    %553 = tpu.matmul %544, %546, %cst_322 {dimension_numbers = #tpu.dot_dimension_numbers<[1], [0], [0], [1], [0, 0, 1, 1], [], []>} : vector<8x32xf32>, vector<32x64xf32>, vector<8x64xf32> -> vector<8x64xf32>
    %554 = vector.broadcast %548 : vector<1x64xf32> to vector<8x64xf32>
    %555 = arith.addf %553, %554 : vector<8x64xf32>
    %cst_323 = arith.constant 0.000000e+00 : f32
    %556 = vector.broadcast %cst_323 : f32 to vector<8x64xf32>
    %557 = arith.maximumf %555, %556 : vector<8x64xf32>
    %cst_324 = arith.constant dense<0.000000e+00> : vector<8x32xf32>
    %558 = tpu.matmul %557, %550, %cst_324 {dimension_numbers = #tpu.dot_dimension_numbers<[1], [0], [0], [1], [0, 0, 1, 1], [], []>} : vector<8x64xf32>, vector<64x32xf32>, vector<8x32xf32> -> vector<8x32xf32>
    %559 = vector.broadcast %552 : vector<1x32xf32> to vector<8x32xf32>
    %560 = arith.addf %558, %559 : vector<8x32xf32>
    %561 = arith.addf %544, %560 : vector<8x32xf32>
    %c1_325 = arith.constant 1 : index
    %c0_326 = arith.constant 0 : index
    %c0_327 = arith.constant 0 : index
    %562 = vector.load %arg27[%c1_325, %c0_326, %c0_327] : memref<2x1x32xf32, #tpu.memory_space<vmem>>, vector<1x1x32xf32>
    %563 = vector.shape_cast %562 : vector<1x1x32xf32> to vector<1x32xf32>
    %c1_328 = arith.constant 1 : index
    %c0_329 = arith.constant 0 : index
    %c0_330 = arith.constant 0 : index
    %564 = vector.load %arg26[%c1_328, %c0_329, %c0_330] : memref<2x1x32xf32, #tpu.memory_space<vmem>>, vector<1x1x32xf32>
    %565 = vector.shape_cast %564 : vector<1x1x32xf32> to vector<1x32xf32>
    %cst_331 = arith.constant dense<0.000000e+00> : vector<8xf32>
    %566 = vector.multi_reduction <add>, %561, %cst_331 [1] : vector<8x32xf32> to vector<8xf32>
    %567 = vector.shape_cast %566 : vector<8xf32> to vector<8x1xf32>
    %cst_332 = arith.constant 3.200000e+01 : f32
    %568 = vector.broadcast %cst_332 : f32 to vector<8x1xf32>
    %569 = arith.divf %567, %568 : vector<8x1xf32>
    %570 = vector.broadcast %569 : vector<8x1xf32> to vector<8x32xf32>
    %571 = arith.subf %561, %570 : vector<8x32xf32>
    %572 = arith.mulf %571, %571 : vector<8x32xf32>
    %cst_333 = arith.constant dense<0.000000e+00> : vector<8xf32>
    %573 = vector.multi_reduction <add>, %572, %cst_333 [1] : vector<8x32xf32> to vector<8xf32>
    %574 = vector.shape_cast %573 : vector<8xf32> to vector<8x1xf32>
    %cst_334 = arith.constant 3.200000e+01 : f32
    %575 = vector.broadcast %cst_334 : f32 to vector<8x1xf32>
    %576 = arith.divf %574, %575 : vector<8x1xf32>
    %577 = vector.broadcast %569 : vector<8x1xf32> to vector<8x32xf32>
    %578 = arith.subf %561, %577 : vector<8x32xf32>
    %cst_335 = arith.constant 9.99999974E-6 : f32
    %579 = vector.broadcast %cst_335 : f32 to vector<8x1xf32>
    %580 = arith.addf %576, %579 : vector<8x1xf32>
    %581 = math.rsqrt %580 : vector<8x1xf32>
    %582 = vector.broadcast %581 : vector<8x1xf32> to vector<8x32xf32>
    %583 = arith.mulf %578, %582 : vector<8x32xf32>
    %584 = vector.broadcast %563 : vector<1x32xf32> to vector<8x32xf32>
    %585 = arith.mulf %583, %584 : vector<8x32xf32>
    %586 = vector.broadcast %565 : vector<1x32xf32> to vector<8x32xf32>
    %587 = arith.addf %585, %586 : vector<8x32xf32>
    %c0_336 = arith.constant 0 : index
    %c0_337 = arith.constant 0 : index
    %588 = vector.load %arg33[%c0_336, %c0_337] : memref<1x32xf32, #tpu.memory_space<vmem>>, vector<1x32xf32>
    %c0_338 = arith.constant 0 : index
    %c0_339 = arith.constant 0 : index
    %589 = vector.load %arg32[%c0_338, %c0_339] : memref<1x32xf32, #tpu.memory_space<vmem>>, vector<1x32xf32>
    %cst_340 = arith.constant dense<0.000000e+00> : vector<8xf32>
    %590 = vector.multi_reduction <add>, %587, %cst_340 [1] : vector<8x32xf32> to vector<8xf32>
    %591 = vector.shape_cast %590 : vector<8xf32> to vector<8x1xf32>
    %cst_341 = arith.constant 3.200000e+01 : f32
    %592 = vector.broadcast %cst_341 : f32 to vector<8x1xf32>
    %593 = arith.divf %591, %592 : vector<8x1xf32>
    %594 = vector.broadcast %593 : vector<8x1xf32> to vector<8x32xf32>
    %595 = arith.subf %587, %594 : vector<8x32xf32>
    %596 = arith.mulf %595, %595 : vector<8x32xf32>
    %cst_342 = arith.constant dense<0.000000e+00> : vector<8xf32>
    %597 = vector.multi_reduction <add>, %596, %cst_342 [1] : vector<8x32xf32> to vector<8xf32>
    %598 = vector.shape_cast %597 : vector<8xf32> to vector<8x1xf32>
    %cst_343 = arith.constant 3.200000e+01 : f32
    %599 = vector.broadcast %cst_343 : f32 to vector<8x1xf32>
    %600 = arith.divf %598, %599 : vector<8x1xf32>
    %601 = vector.broadcast %593 : vector<8x1xf32> to vector<8x32xf32>
    %602 = arith.subf %587, %601 : vector<8x32xf32>
    %cst_344 = arith.constant 9.99999974E-6 : f32
    %603 = vector.broadcast %cst_344 : f32 to vector<8x1xf32>
    %604 = arith.addf %600, %603 : vector<8x1xf32>
    %605 = math.rsqrt %604 : vector<8x1xf32>
    %606 = vector.broadcast %605 : vector<8x1xf32> to vector<8x32xf32>
    %607 = arith.mulf %602, %606 : vector<8x32xf32>
    %608 = vector.broadcast %588 : vector<1x32xf32> to vector<8x32xf32>
    %609 = arith.mulf %607, %608 : vector<8x32xf32>
    %610 = vector.broadcast %589 : vector<1x32xf32> to vector<8x32xf32>
    %611 = arith.addf %609, %610 : vector<8x32xf32>
    %c0_345 = arith.constant 0 : index
    %c0_346 = arith.constant 0 : index
    %612 = vector.load %arg49[%c0_345, %c0_346] : memref<32x128xf32, #tpu.memory_space<vmem>>, vector<32x128xf32>
    %cst_347 = arith.constant dense<0.000000e+00> : vector<8x128xf32>
    %613 = tpu.matmul %611, %612, %cst_347 {dimension_numbers = #tpu.dot_dimension_numbers<[1], [0], [0], [1], [0, 0, 1, 1], [], []>} : vector<8x32xf32>, vector<32x128xf32>, vector<8x128xf32> -> vector<8x128xf32>
    %c0_348 = arith.constant 0 : index
    %c0_349 = arith.constant 0 : index
    %614 = vector.load %arg48[%c0_348, %c0_349] : memref<1x128xf32, #tpu.memory_space<vmem>>, vector<1x128xf32>
    %615 = vector.broadcast %614 : vector<1x128xf32> to vector<8x128xf32>
    %616 = arith.addf %613, %615 : vector<8x128xf32>
    %cst_350 = arith.constant dense<0xFF800000> : vector<8xf32>
    %617 = vector.multi_reduction <maximumf>, %616, %cst_350 [1] : vector<8x128xf32> to vector<8xf32>
    %618 = vector.shape_cast %617 : vector<8xf32> to vector<8x1xf32>
    %619 = vector.broadcast %618 : vector<8x1xf32> to vector<8x128xf32>
    %620 = arith.subf %616, %619 : vector<8x128xf32>
    %621 = math.exp %620 : vector<8x128xf32>
    %cst_351 = arith.constant dense<0.000000e+00> : vector<8xf32>
    %622 = vector.multi_reduction <add>, %621, %cst_351 [1] : vector<8x128xf32> to vector<8xf32>
    %623 = vector.shape_cast %622 : vector<8xf32> to vector<8x1xf32>
    %624 = vector.broadcast %623 : vector<8x1xf32> to vector<8x128xf32>
    %625 = arith.divf %621, %624 : vector<8x128xf32>
    %c0_352 = arith.constant 0 : index
    %c0_353 = arith.constant 0 : index
    %626 = vector.load %arg50[%c0_352, %c0_353] : memref<8x128xf32, #tpu.memory_space<vmem>>, vector<8x128xf32>
    tpu.vector_store %arg50[%c0_352, %c0_353], %625 {strides = array<i32>} : memref<8x128xf32, #tpu.memory_space<vmem>>, vector<8x128xf32>,
    return
  }
}

</mosaic_0001>

<bundles_post_ra>
// kernel: tile.19
= control target key start
LH: loop header
LB: loop body
LE: loop exit
PB: predicated region body
PF: predicated region fallthrough
CT: control target
= control target key end

     0   :  { %vm42_vm0 = vcmask 1047556   ;;  %vm44_vm1 = vcmask 64512   ;;  %s93_s22 = smov 8   ;;  %s94_s25 = smov 16   ;;  %vm54_vm2 = vcmask 261312   ;;  %vm64_vm3 = vcmask 195712   ;;  %s146_s0 = inlined_call_operand.vmem [shape: f32[8,4,8], index: 0, kind: input, shape index: {}]   ;;  %s147_s1 = inlined_call_operand.vmem [shape: f32[8,32], index: 1, kind: output, shape index: {}]  }
   0x1   :  { %v82_v0 = vld [vmem:[%s146_s0 + $0x1c] sm:$0xf]  ;;  %v83_v1 = vld [vmem:[%s146_s0 + $0x18] sm:$0xf]  ;;  %v84_v2 = vld [vmem:[%s146_s0 + $0x14] sm:$0xf] }
   0x2   :  { %8 = vst [vmem:[#allocation0 + $0x38] sm:$0xf] %v82_v0  ;;  %13 = vst [vmem:[#allocation0 + $0x30] sm:$0xf] %v83_v1  ;;  %v85_v3 = vld [vmem:[%s146_s0 + $0x10] sm:$0xf] }
   0x3   :  { %18 = vst [vmem:[#allocation0 + $0x28] sm:$0xf] %v84_v2  ;;  %v86_v4 = vld [vmem:[%s146_s0 + $0xc] sm:$0xf]  ;;  %v87_v5 = vld [vmem:[%s146_s0 + $0x8] sm:$0xf] }
   0x4   :  { %23 = vst [vmem:[#allocation0 + $0x20] sm:$0xf] %v85_v3  ;;  %28 = vst [vmem:[#allocation0 + $0x18] sm:$0xf] %v86_v4  ;;  %v88_v6 = vld [vmem:[%s146_s0 + $0x4] sm:$0xf] }
   0x5   :  { %33 = vst [vmem:[#allocation0 + $0x10] sm:$0xf] %v87_v5  ;;  %v38_v7 = vld [vmem:[%s146_s0] sm:$0xf]  ;;  %37 = vst [vmem:[#allocation0 + $0x8] sm:$0xf] %v88_v6 }
   0x6   :  { %39 = vst [vmem:[#allocation0] sm:$0xf] %v38_v7  ;;  %s92_s0 = smov 24   ;;  %vm74_vm4 = vcmask 130112  }
   0xb   :  { %v49_v8 = vld [vmem:[#allocation0 + $0x3] ss:$8 sm:$0xf0]   ;;  %v59_v9 = vld [vmem:[#allocation0 + $0x2] ss:$8 sm:$0xf0]  }
   0xc   :  { %v69_v14 = vld [vmem:[#allocation0 + $0x1] ss:$8 sm:$0xf0]   ;;  %v41_v17 = vld [vmem:[#allocation0] ss:$8 sm:$0xf0]  }
   0xd   :  { %v47_v10 = vld [vmem:[#allocation0 + $0x3] ss:$8 sm:$0xf]   ;;  %v57_v11 = vld [vmem:[#allocation0 + $0x2] ss:$8 sm:$0xf]  }
   0xe   :  { %v51_v12 = vsel %vm42_vm0, %v49_v8, %v47_v10  ;;  %v67_v13 = vld [vmem:[#allocation0 + $0x1] ss:$8 sm:$0xf]   ;;  %v40_v16 = vld [vmem:[#allocation0] ss:$8 sm:$0xf]   ;;  %v61_v18 = vsel %vm42_vm0, %v59_v9, %v57_v11 }
   0xf   :  { %52 = vrot.lane.b32.xlu0 %v51_v12, %s92_s0  ;;  %v71_v15 = vsel %vm42_vm0, %v69_v14, %v67_v13  ;;  %v43_v19 = vsel %vm42_vm0, %v41_v17, %v40_v16 }
  0x10   :  { %72 = vrot.lane.b32.xlu1 %v71_v15, %s93_s22  ;;  %45 = vst.msk [vmem:[%s147_s1] sm:$0xff] %vm44_vm1, %v43_v19  }
  0x13   :  { %62 = vrot.lane.b32.xlu0 %v61_v18, %s94_s25 }
  0x81   :  { %v53_v20 = vpop.permute.xlu0 %52  }
  0x82   :  { %55 = vst.msk [vmem:[%s147_s1] sm:$0xff] %vm54_vm2, %v53_v20   ;;  %v73_v21 = vpop.permute.xlu1 %72  }
  0x85   :  { %v63_v22 = vpop.permute.xlu0 %62  }
  0x86   :  { %65 = vst.msk [vmem:[%s147_s1] sm:$0xff] %vm64_vm3, %v63_v22  }
  0x87   :  { %75 = vst.msk [vmem:[%s147_s1] sm:$0xff] %vm74_vm4, %v73_v21  }

// kernel: transformer_forward.1
= control target key start
LH: loop header
LB: loop body
LE: loop exit
PB: predicated region body
PF: predicated region fallthrough
CT: control target
= control target key end

     0   :  { %s6373_s6 = smov 1   ;;  %s6374_s10 = smov 2   ;;  %s7419_s0 = inlined_call_operand.smem [shape: u32[51], index: -1, kind: input, shape index: {}] }
   0x1   :  { %s6439_s5 = sld [smem:[%s7419_s0]]   ;;  %s6375_s14 = smov 3  }
   0x2   :  { %s6444_s9 = sld [smem:[%s7419_s0 + %s6373_s6]]   ;;  %s6376_s18 = smov 4  }
   0x3   :  { %s6449_s13 = sld [smem:[%s7419_s0 + %s6374_s10]]   ;;  %s6377_s22 = smov 5  }
   0x4   :  { %s6454_s17 = sld [smem:[%s7419_s0 + %s6375_s14]]   ;;  %s6378_s26 = smov 6  }
   0x5   :  { %s6459_s21 = sld [smem:[%s7419_s0 + %s6376_s18]]   ;;  %s6379_s30 = smov 7  }
   0x6   :  { %s6464_s25 = sld [smem:[%s7419_s0 + %s6377_s22]]   ;;  %s6380_s4 = smov 8  }
   0x7   :  { %s6469_s29 = sld [smem:[%s7419_s0 + %s6378_s26]]   ;;  %s6381_s10 = smov 9  }
   0x8   :  { %7448 = sst [smem:[#allocation11_spill]] %s6444_s9  ;;  %s6382_s15 = smov 10  }
   0x9   :  { %s6474_s3 = sld [smem:[%s7419_s0 + %s6379_s30]]   ;;  %s6383_s20 = smov 11  }
   0xa   :  { %7449 = sst [smem:[#allocation12_spill]] %s6454_s17  ;;  %s6384_s26 = smov 12  }
   0xb   :  { %s6479_s8 = sld [smem:[%s7419_s0 + %s6380_s4]]   ;;  %s6385_s1 = smov 13  }
   0xc   :  { %7450 = sst [smem:[#allocation13_spill]] %s6464_s25  ;;  %s6386_s7 = smov 14  }
   0xd   :  { %s6484_s14 = sld [smem:[%s7419_s0 + %s6381_s10]]   ;;  %s6388_s22 = smov 16  }
   0xe   :  { %s6489_s19 = sld [smem:[%s7419_s0 + %s6382_s15]]   ;;  %s6387_s15 = smov 15  }
   0xf   :  { %s6494_s24 = sld [smem:[%s7419_s0 + %s6383_s20]]   ;;  %s6389_s28 = smov 17  }
  0x10   :  { %s6499_s30 = sld [smem:[%s7419_s0 + %s6384_s26]]  }
  0x11   :  { %s6504_s6 = sld [smem:[%s7419_s0 + %s6385_s1]]  }
  0x12   :  { %s6509_s12 = sld [smem:[%s7419_s0 + %s6386_s7]]   ;;  %s6390_s7 = smov 18  }
  0x13   :  { %7451 = sst [smem:[#allocation14_spill]] %s6484_s14 }
  0x14   :  { %7452 = sst [smem:[#allocation15_spill]] %s6489_s19 }
  0x15   :  { %7453 = sst [smem:[#allocation16_spill]] %s6494_s24 }
  0x16   :  { %7454 = sst [smem:[#allocation17_spill]] %s6499_s30 }
  0x17   :  { %7455 = sst [smem:[#allocation18_spill]] %s6504_s6 }
  0x18   :  { %7456 = sst [smem:[#allocation19_spill]] %s6509_s12 }
  0x19   :  { %s6514_s20 = sld [smem:[%s7419_s0 + %s6387_s15]]   ;;  %s6391_s15 = smov 19  }
  0x1a   :  { %s6519_s27 = sld [smem:[%s7419_s0 + %s6388_s22]]   ;;  %s6392_s22 = smov 20  }
  0x1b   :  { %s6524_s4 = sld [smem:[%s7419_s0 + %s6389_s28]]   ;;  %s6393_s28 = smov 21  }
  0x1c   :  { %s6529_s6 = sld [smem:[%s7419_s0 + %s6390_s7]]   ;;  %s6394_s7 = smov 22  }
  0x1d   :  { %s6534_s12 = sld [smem:[%s7419_s0 + %s6391_s15]]   ;;  %s6395_s15 = smov 23  }
  0x1e   :  { %s6544_s30 = sld [smem:[%s7419_s0 + %s6393_s28]]   ;;  %s6397_s28 = smov 25  }
  0x1f   :  { %7457 = sst [smem:[#allocation20_spill]] %s6514_s20 }
  0x20   :  { %7458 = sst [smem:[#allocation21_spill]] %s6519_s27 }
  0x21   :  { %7459 = sst [smem:[#allocation22_spill]] %s6524_s4 }
  0x22   :  { %7460 = sst [smem:[#allocation23_spill]] %s6529_s6 }
  0x23   :  { %7461 = sst [smem:[#allocation24_spill]] %s6534_s12 }
  0x24   :  { %s6539_s27 = sld [smem:[%s7419_s0 + %s6392_s22]]   ;;  %s6396_s22 = smov 24  }
  0x25   :  { %7463 = sst [smem:[#allocation26_spill]] %s6544_s30 }
  0x26   :  { %s6549_s6 = sld [smem:[%s7419_s0 + %s6394_s7]]   ;;  %s6398_s7 = smov 26  }
  0x27   :  { %s6554_s12 = sld [smem:[%s7419_s0 + %s6395_s15]]   ;;  %s6399_s15 = smov 27  }
  0x28   :  { %s6564_s30 = sld [smem:[%s7419_s0 + %s6397_s28]]   ;;  %s6401_s28 = smov 29  }
  0x2a   :  { %7462 = sst [smem:[#allocation25_spill]] %s6539_s27 }
  0x2b   :  { %s6559_s27 = sld [smem:[%s7419_s0 + %s6396_s22]]   ;;  %s6400_s22 = smov 28  }
  0x2c   :  { %7464 = sst [smem:[#allocation27_spill]] %s6549_s6 }
  0x2d   :  { %7465 = sst [smem:[#allocation28_spill]] %s6554_s12 }
  0x2e   :  { %7467 = sst [smem:[#allocation30_spill]] %s6564_s30 }
  0x2f   :  { %s6569_s6 = sld [smem:[%s7419_s0 + %s6398_s7]]   ;;  %s6402_s7 = smov 30  }
  0x30   :  { %s6574_s12 = sld [smem:[%s7419_s0 + %s6399_s15]]   ;;  %s6403_s15 = smov 31  }
  0x31   :  { %7466 = sst [smem:[#allocation29_spill]] %s6559_s27 }
  0x32   :  { %s6579_s27 = sld [smem:[%s7419_s0 + %s6400_s22]]   ;;  %s6404_s22 = smov 32  }
  0x33   :  { %s6584_s30 = sld [smem:[%s7419_s0 + %s6401_s28]]   ;;  %s6405_s28 = smov 33  }
  0x34   :  { %s6599_s4 = sld [smem:[%s7419_s0 + %s6404_s22]]   ;;  %s6408_s22 = smov 36  }
  0x35   :  { %7468 = sst [smem:[#allocation31_spill]] %s6569_s6 }
  0x36   :  { %7469 = sst [smem:[#allocation32_spill]] %s6574_s12 }
  0x37   :  { %s6589_s6 = sld [smem:[%s7419_s0 + %s6402_s7]]   ;;  %s6406_s7 = smov 34  }
  0x38   :  { %7470 = sst [smem:[#allocation33_spill]] %s6579_s27 }
  0x39   :  { %7471 = sst [smem:[#allocation34_spill]] %s6584_s30 }
  0x3a   :  { %s6594_s12 = sld [smem:[%s7419_s0 + %s6403_s15]]   ;;  %s6407_s15 = smov 35  }
  0x3b   :  { %7474 = sst [smem:[#allocation37_spill]] %s6599_s4 }
  0x3c   :  { %s6604_s27 = sld [smem:[%s7419_s0 + %s6405_s28]]   ;;  %s6409_s28 = smov 37  }
  0x3d   :  { %7472 = sst [smem:[#allocation35_spill]] %s6589_s6 }
  0x3e   :  { %s6609_s20 = sld [smem:[%s7419_s0 + %s6406_s7]]   ;;  %s6410_s7 = smov 38  }
  0x3f   :  { %s6614_s6 = sld [smem:[%s7419_s0 + %s6407_s15]]   ;;  %s6411_s15 = smov 39  }
  0x40   :  { %7473 = sst [smem:[#allocation36_spill]] %s6594_s12 }
  0x41   :  { %s6619_s4 = sld [smem:[%s7419_s0 + %s6408_s22]]   ;;  %s6412_s22 = smov 40  }
  0x42   :  { %7475 = sst [smem:[#allocation38_spill]] %s6604_s27 }
  0x43   :  { %s6624_s27 = sld [smem:[%s7419_s0 + %s6409_s28]]   ;;  %s6413_s28 = smov 41  }
  0x44   :  { %s6629_s24 = sld [smem:[%s7419_s0 + %s6410_s7]]   ;;  %s6414_s7 = smov 42  }
  0x45   :  { %s6634_s25 = sld [smem:[%s7419_s0 + %s6411_s15]]   ;;  %s6415_s15 = smov 43  }
  0x46   :  { %s6639_s19 = sld [smem:[%s7419_s0 + %s6412_s22]]   ;;  %s6416_s22 = smov 44  }
  0x47   :  { %7476 = sst [smem:[#allocation39_spill]] %s6619_s4 }
  0x48   :  { %s6644_s30 = sld [smem:[%s7419_s0 + %s6413_s28]]   ;;  %s6417_s28 = smov 45  }
  0x49   :  { %s6649_s14 = sld [smem:[%s7419_s0 + %s6414_s7]]   ;;  %s6418_s7 = smov 46  }
  0x4a   :  { %7477 = sst [smem:[#allocation40_spill]] %s6629_s24 }
  0x4b   :  { %s6654_s17 = sld [smem:[%s7419_s0 + %s6415_s15]]   ;;  %s6419_s15 = smov 47  }
  0x4c   :  { %7478 = sst [smem:[#allocation41_spill]] %s6639_s19 }
  0x4d   :  { %s6659_s9 = sld [smem:[%s7419_s0 + %s6416_s22]]   ;;  %s6420_s22 = smov 48  }
  0x4e   :  { %s6664_s12 = sld [smem:[%s7419_s0 + %s6417_s28]]   ;;  %s6421_s28 = smov 49  }
  0x4f   :  { %7479 = sst [smem:[#allocation42_spill]] %s6649_s14 }
  0x50   :  { %s6669_s14 = sld [smem:[%s7419_s0 + %s6418_s7]]   ;;  %s6422_s7 = smov 50  }
  0x51   :  { %7480 = sst [smem:[#allocation43_spill]] %s6654_s17 }
  0x52   :  { %s6674_s17 = sld [smem:[%s7419_s0 + %s6419_s15]]  }
  0x53   :  { %s6679_s24 = sld [smem:[%s7419_s0 + %s6420_s22]]  }
  0x54   :  { %s6684_s4 = sld [smem:[%s7419_s0 + %s6421_s28]]  }
  0x55   :  { %s6689_s19 = sld [smem:[%s7419_s0 + %s6422_s7]]  }
  0x56   :  { %106 = vsyncpa [#allocation3], 0 }
  0x57   :  { %107 = vsyncpa [#allocation6], 0 }
  0x58   :  { %108 = vsyncpa [#allocation4], 0  ;;  %s6423_s15 = smov [#allocation2]   ;;  %s6424_s18 = smov [#allocation5]  }
  0x59   :  { %s207_s16 = sshll.u32 %s6423_s15, 4  ;;  %s217_s22 = sshll.u32 %s6424_s18, 4  ;;  %s208_s16 = int_to_ptr.vmem [resolvable:$true] %s207_s16  ;;  %s218_s22 = int_to_ptr.vmem [resolvable:$true] %s217_s22 }
  0x5a   :  { %s6301_s23 = scalar_lea.hbm %s6669_s14, 16 }
  0x5b   :  { %p6302_p0 = scmp.ne.s32.totalorder %s6669_s14, %s6301_s23  ;;  %p6305_p1 = scmp.lt.u32.totalorder %s6301_s23, %s6669_s14 }
  0x5d   :  { %p6307_p2 = pnand %p6305_p1, %p6302_p0 }
  0x5f   :  { %6310 = shalt.err (!%p6307_p2)
}
  0x60   :  { %s6311_s26 = scalar_lea.vmem %s208_s16, 16  ;;  %s6315_s0 = scalar_lea.vmem %s208_s16, 32 }
  0x61   :  { %p6312_p3 = scmp.ne.s32.totalorder %s208_s16, %s6311_s26  ;;  %p6316_p4 = scmp.lt.s32.totalorder %s208_s16, %s208_s16 }
  0x62   :  { %p6317_p5 = scmp.lt.s32.totalorder %s6315_s0, %s6311_s26 }
  0x64   :  { %p6318_p6 = por %p6317_p5, %p6316_p4 }
  0x66   :  { %p6319_p7 = pnand %p6318_p6, %p6312_p3 }
  0x68   :  { %6322 = shalt.err (!%p6319_p7)
}
  0x69   :  { %210 = dma.hbm_to_vmem [thread:$0]  %s6669_s14, 16, %s208_s16, [#allocation3]  }
  0x6a   :  { %s6323_s28 = scalar_lea.hbm %s6674_s17, 16 }
  0x6b   :  { %p6324_p8 = scmp.ne.s32.totalorder %s6674_s17, %s6323_s28  ;;  %p6327_p9 = scmp.lt.u32.totalorder %s6323_s28, %s6674_s17 }
  0x6d   :  { %p6329_p10 = pnand %p6327_p9, %p6324_p8 }
  0x6f   :  { %6332 = shalt.err (!%p6329_p10)
}
  0x70   :  { %s6333_s1 = scalar_lea.vmem %s218_s22, 16  ;;  %s6337_s2 = scalar_lea.vmem %s218_s22, 32 }
  0x71   :  { %p6334_p11 = scmp.ne.s32.totalorder %s218_s22, %s6333_s1  ;;  %p6338_p12 = scmp.lt.s32.totalorder %s218_s22, %s218_s22 }
  0x72   :  { %p6339_p13 = scmp.lt.s32.totalorder %s6337_s2, %s6333_s1 }
  0x74   :  { %p6340_p0 = por %p6339_p13, %p6338_p12 }
  0x76   :  { %p6341_p1 = pnand %p6340_p0, %p6334_p11 }
  0x78   :  { %6344 = shalt.err (!%p6341_p1)
}
  0x79   :  { %220 = dma.hbm_to_vmem [thread:$0]  %s6674_s17, 16, %s218_s22, [#allocation6]  }
  0x7a   :  { %6367 = dma.done.wait [#allocation3], 16  }
  0x7b   :  { %6368 = vsyncadd [#allocation3], 4294967280 }
  0x7c   :  { %6369 = dma.done.wait [#allocation6], 16  }
  0x7d   :  { %6370 = vsyncadd [#allocation6], 4294967280  ;;  %v6425_v0 = vmov 0.0|0.0   ;;  %vm6426_vm0 = vmmov 0   ;;  %v6427_v1 = vmov 0.0   ;;  %v265_v2 = vld [vmem:[%s6664_s12] sm:$0xff] }
  0x7e   :  { %5841 = vmatprep.subr.bf16.mxu0 %v6425_v0  ;;  %5318 = vmatprep.mubr.msk.f32.mxu0 %vm6426_vm0, %v6427_v1  ;;  %v266_v3 = vld [vmem:[%s6664_s12 + $0x8] sm:$0xff]  ;;  %v267_v4 = vld [vmem:[%s6664_s12 + $0x10] sm:$0xff]  ;;  %v268_v6 = vld [vmem:[%s6664_s12 + $0x18] sm:$0xff]  ;;  %vm276_vm1 = vcmask 261120   ;;  %vm360_vm2 = vcmask 64512   ;;  %s7483_s17 = sld [smem:[#allocation41_spill]] }
  0x7f   :  { %5847 = vmatprep.subr.bf16.mxu1 %v6425_v0  ;;  %5337 = vmatprep.mubr.msk.f32.mxu1 %vm6426_vm0, %v6427_v1  ;;  %v5842_v5 = vpack.c.bf16 %v266_v3, %v265_v2  ;;  %v231_v7 = vld [vmem:[%s6439_s5] sm:$0xff]  ;;  %v5845_v9 = vpack.c.bf16 %v268_v6, %v267_v4  ;;  %s6428_s5 = smov 32   ;;  %v6728_v15 = vld [vmem:[%s6474_s3 + $0x8] sm:$0xff]  ;;  %v6733_v19 = vld [vmem:[%s6474_s3 + $0x10] sm:$0xff]  ;;  %vm947_vm4 = vcmask 523264   ;;  %s7486_s14 = sld [smem:[#allocation43_spill]] }
  0x80   :  { %v232_v8 = vmul.f32 6.656854, %v231_v7  ;;  %v233_v10 = vld [vmem:[%s6449_s13] sm:$0xff]  ;;  %s6429_s13 = smov 96   ;;  %v6739_v20 = vld [vmem:[%s6474_s3 + $0x18] sm:$0xff]  ;;  %v6744_v22 = vld [vmem:[%s6469_s29 + $0x8] sm:$0xff] }
  0x81   :  { %5843 = vmatpush3.bf16.msra.mxu0 %v5842_v5  ;;  %v6717_v12 = vld [vmem:[%s6469_s29] sm:$0xff]  ;;  %v6747_v23 = vld [vmem:[%s6469_s29 + $0x10] sm:$0xff]  ;;  %v6755_v24 = vld [vmem:[%s6469_s29 + $0x18] sm:$0xff]  ;;  %s7487_s7 = sld [smem:[#allocation42_spill]]  ;;  %s7495_s10 = sld [smem:[#allocation16_spill]] }
  0x82   :  { %5844 = vmatprep.subr.bf16.mxu0 %v6425_v0  ;;  %v6712_v11 = vadd.f32 %v233_v10, %v232_v8  ;;  %v6722_v13 = vld [vmem:[%s6474_s3] sm:$0xff]  ;;  %vm6775_vm3 = vmpackc.low %vm276_vm1, %vm276_vm1  ;;  %v250_v53 = vld [vmem:[%s6479_s8 + $0x8] sm:$0xff]  ;;  %s7496_s11 = sld [smem:[#allocation35_spill]]  ;;  %s7497_s15 = sld [smem:[#allocation20_spill]] }
  0x83   :  { %466 = vrot.lane.b32.xlu1 %v6722_v13, %s6428_s5  ;;  %v4850_v14 = vld [vmem:[%s6614_s6] ss:$0 sm:$0xff]  ;;  %v251_v54 = vld [vmem:[%s6479_s8 + $0x10] sm:$0xff]  ;;  %v252_v56 = vld [vmem:[%s6479_s8 + $0x18] sm:$0xff]  ;;  %s7498_s16 = sld [smem:[#allocation33_spill]]  ;;  %s7499_s18 = sld [smem:[#allocation22_spill]] }
  0x84   :  { %v6795_v47 = vld [vmem:[%s6459_s21] sm:$0xff]  ;;  %v6806_v57 = vpack.c.bf16 %v252_v56, %v251_v54  ;;  %v352_v10 = vld [vmem:[%s6659_s9 + $0x10] sm:$0xff]  ;;  %v855_v56 = vld [vmem:[%s6634_s25 + $0x18] sm:$0xff]  ;;  %s7484_s21 = sld [smem:[#allocation39_spill]]  ;;  %s7500_s22 = sld [smem:[#allocation17_spill]] }
  0x85   :  { %5846 = vmatpush3.bf16.msra.mxu0 %v5845_v9  ;;  %v249_v52 = vld [vmem:[%s6479_s8] sm:$0xff]  ;;  %v351_v9 = vld [vmem:[%s6659_s9 + $0x8] sm:$0xff]  ;;  %s7485_s8 = sld [smem:[#allocation40_spill]]  ;;  %s7501_s23 = sld [smem:[#allocation28_spill]] }
  0x86   :  { %v6802_v55 = vpack.c.bf16 %v250_v53, %v249_v52  ;;  %v350_v8 = vld [vmem:[%s6659_s9] sm:$0xff]  ;;  %v853_v52 = vld [vmem:[%s6634_s25 + $0x8] sm:$0xff]  ;;  %v854_v53 = vld [vmem:[%s6634_s25 + $0x10] sm:$0xff]  ;;  %s7502_s26 = sld [smem:[#allocation27_spill]]  ;;  %s7505_s0 = sld [smem:[#allocation18_spill]] }
  0x87   :  { %468 = vrot.lane.b32.xlu1 %v6728_v15, %s6428_s5  ;;  %s7506_s28 = sld [smem:[#allocation24_spill]]  ;;  %s7507_s1 = sld [smem:[#allocation26_spill]] }
  0x88   :  { %5319 = vmatmul.mubr.msk.f32.vlgmr.msra.gmra.mrb[0].mxu0 %vm276_vm1, %v6712_v11  ;;  %s7508_s2 = sld [smem:[#allocation30_spill]] }
  0x89   :  { %5323 = vmatprep.mubr.msk.f32.mxu0 %vm360_vm2, %v6717_v12 }
  0x8b   :  { %470 = vrot.lane.b32.xlu1 %v6733_v19, %s6428_s5 }
  0x8f   :  { %472 = vrot.lane.b32.xlu1 %v6739_v20, %s6428_s5 }
  0xf5   :  { %v6761_v25 = vpop.permute.xlu1 %466 }
  0xf9   :  { %v6763_v26 = vpop.permute.xlu1 %468 }
  0xfd   :  { %v6765_v27 = vpop.permute.xlu1 %470 }
 0x101   :  { %v6771_v34 = vpop.permute.xlu1 %472 }
 0x15b   :  { %v346_v16 = vpop.f32.mrb[0].mxu0 }
 0x15c   :  { %v347_v17 = vadd.f32 %v4850_v14, %v346_v16  ;;  %v5320_v18 = vpop.f32.mrb[1].mxu0  ;;  %v5868_v14 = vpack.c.bf16 %v351_v9, %v350_v8  ;;  %v353_v16 = vld [vmem:[%s6659_s9 + $0x18] sm:$0xff]  ;;  %v858_v9 = vld [vmem:[%s6634_s25 + $0x30] sm:$0xff] }
 0x15e   :  { %357 = vrot.lane.b32.xlu0 %v347_v17, %s6429_s13  ;;  %v355_v46 = vmul.f32 0.35355338, %v347_v17  ;;  %v5871_v17 = vpack.c.bf16 %v353_v16, %v352_v10  ;;  %v859_v10 = vld [vmem:[%s6634_s25 + $0x38] sm:$0xff]  ;;  %v4867_v16 = vld [vmem:[%s7484_s21] ss:$0 sm:$0xff] }
 0x1d0   :  { %v358_v21 = vpop.permute.xlu0 %357 }
 0x1d1   :  { %5321 = vmatprep.subr.mxu0 %v358_v21 }
 0x1d2   :  { %5322 = vmatpush3.msra.mxu0 %v358_v21 }
 0x1d3   :  { %5324 = vmatmul.mubr.msk.f32.vlgmr.msra.gmra.mrb[2].mxu0 %vm360_vm2, %v6744_v22  ;;  %5855 = vmatprep.subr.bf16.mxu0 %v6425_v0 }
 0x1d4   :  { %5326 = vmatprep.mubr.msk.f32.mxu0 %vm360_vm2, %v6747_v23  ;;  %5857 = vmatpush3.bf16.msra.mxu0 %v6802_v55 }
 0x1d5   :  { %5858 = vmatprep.subr.bf16.mxu0 %v6425_v0 }
 0x1d7   :  { %5327 = vmatmul.mubr.msk.f32.gmra.mrb[4].mxu0 %vm360_vm2, %v6755_v24 }
 0x1d8   :  { %5348 = vmatprep.mubr.msk.f32.mxu0 %vm6426_vm0, %v6427_v1  ;;  %5860 = vmatpush3.bf16.msra.mxu0 %v6806_v57 }
 0x1d9   :  { %5861 = vmatprep.subr.bf16.mxu0 %v6425_v0 }
 0x2a6   :  { %v5325_v28 = vpop.f32.mrb[2].mxu0 }
 0x2a7   :  { %v459_v29 = vmul.f32 %v5325_v28, %v6728_v15  ;;  %v479_v30 = vmul.f32 %v5325_v28, %v6763_v26  ;;  %v439_v31 = vpop.f32.mrb[3].mxu0 }
 0x2a8   :  { %v478_v32 = vmul.f32 %v6761_v25, %v439_v31  ;;  %v458_v33 = vmul.f32 %v439_v31, %v6722_v13 }
 0x2aa   :  { %v6181_v36 = vpack.i.bf16 %v479_v30, %v478_v32  ;;  %v5848_v37 = vpack.c.bf16 %v459_v29, %v458_v33  ;;  %v5328_v38 = vpop.f32.mrb[4].mxu0  ;;  %v4863_v32 = vld [vmem:[%s6609_s20] ss:$0 sm:$0xff] }
 0x2ab   :  { %v461_v39 = vmul.f32 %v5328_v38, %v6739_v20  ;;  %v449_v40 = vpop.f32.mrb[5].mxu0  ;;  %v481_v41 = vmul.f32 %v5328_v38, %v6771_v34 }
 0x2ac   :  { %6182 = vrot.lane.b32.xlu1 %v6181_v36, %s6429_s13  ;;  %5850 = vmatpush3.bf16.xpose.msk.msra.mxu1 %vm6775_vm3, %v5848_v37  ;;  %v480_v42 = vmul.f32 %v6765_v27, %v449_v40  ;;  %v460_v43 = vmul.f32 %v449_v40, %v6733_v19 }
 0x2ad   :  { %5851 = vmatprep.subr.bf16.mxu1 %v6425_v0 }
 0x2ae   :  { %v6186_v44 = vpack.i.bf16 %v481_v41, %v480_v42  ;;  %v5852_v45 = vpack.c.bf16 %v461_v39, %v460_v43 }
 0x2b0   :  { %6187 = vrot.lane.b32.xlu1 %v6186_v44, %s6429_s13 }
 0x2b4   :  { %5854 = vmatpush3.bf16.xpose.msk.msra.mxu1 %vm6775_vm3, %v5852_v45  ;;  %v847_v45 = vld [vmem:[%s6624_s27] sm:$0xff] }
 0x2b5   :  { %5867 = vmatprep.subr.bf16.mxu1 %v6425_v0 }
 0x2bb   :  { %5338 = vmatmul.mubr.msk.f32.vlgmr.msra.gmra.mrb[0].mxu1 %vm276_vm1, %v355_v46  ;;  %v848_v46 = vld [vmem:[%s6624_s27 + $0x8] sm:$0xff] }
 0x2bc   :  { %5370 = vmatprep.mubr.msk.f32.mxu1 %vm6426_vm0, %v6427_v1  ;;  %5869 = vmatpush3.bf16.msra.mxu1 %v5868_v14  ;;  %v5889_v14 = vpack.c.bf16 %v859_v10, %v858_v9 }
 0x2bd   :  { %5870 = vmatprep.subr.bf16.mxu1 %v6425_v0 }
 0x2c0   :  { %5872 = vmatpush3.bf16.msra.mxu1 %v5871_v17 }
 0x2c1   :  { %5879 = vmatprep.subr.bf16.mxu1 %v6425_v0 }
 0x31e   :  { %v6183_v61 = vpop.permute.xlu1 %6182 }
 0x31f   :  { %v6185_v62 = vunpack.i.h.bf16 %v6183_v61  ;;  %v6184_v63 = vunpack.i.l.bf16 %v6183_v61 }
 0x321   :  { %v5862_v4 = vpack.c.bf16 %v6185_v62, %v6184_v63 }
 0x322   :  { %v6188_v2 = vpop.permute.xlu1 %6187 }
 0x323   :  { %v6190_v5 = vunpack.i.h.bf16 %v6188_v2  ;;  %v6189_v6 = vunpack.i.l.bf16 %v6188_v2 }
 0x325   :  { %v5865_v7 = vpack.c.bf16 %v6190_v5, %v6189_v6  ;;  %v4866_v6 = vld [vmem:[%s7483_s17] ss:$0 sm:$0xff] }
 0x38e   :  { %v563_v48 = vpop.f32.mrb[0].mxu1 }
 0x38f   :  { %v564_v49 = vadd.f32 %v563_v48, %v6795_v47  ;;  %v5339_v50 = vpop.f32.mrb[1].mxu1  ;;  %v5874_v48 = vpack.c.bf16 %v848_v46, %v847_v45  ;;  %v4875_v45 = vld [vmem:[%s6664_s12 + $0x30] sm:$0xff]  ;;  %v4876_v46 = vld [vmem:[%s6664_s12 + $0x38] sm:$0xff] }
 0x391   :  { %v567_v51 = vsel %vm276_vm1, %v564_v49, -inf }
 0x392   :  { %568 = vmax.xlane.f32.xlu0 %v567_v51  ;;  %v852_v51 = vld [vmem:[%s6634_s25] sm:$0xff] }
 0x393   :  { %v5880_v54 = vpack.c.bf16 %v853_v52, %v852_v51  ;;  %v4871_v52 = vld [vmem:[%s7486_s14] ss:$0 sm:$0xff] }
 0x41f   :  { %v569_v58 = vpop.xlane.xlu0 %568 }
 0x420   :  { %v570_v59 = vsub.f32 %v564_v49, %v569_v58  ;;  %v850_v49 = vld [vmem:[%s6624_s27 + $0x18] sm:$0xff]  ;;  %v5883_v58 = vpack.c.bf16 %v855_v56, %v854_v53 }
 0x422   :  { %v571_v60 = vmul.f32 1.442695, %v570_v59  ;;  %v856_v59 = vld [vmem:[%s6634_s25 + $0x20] sm:$0xff] }
 0x424   :  { %6241 = vpow2.f32 %v571_v60  ;;  %v857_v60 = vld [vmem:[%s6634_s25 + $0x28] sm:$0xff] }
 0x425   :  { %v5886_v61 = vpack.c.bf16 %v857_v60, %v856_v59  ;;  %v4878_v59 = vld [vmem:[%s6614_s6 + $0x1] ss:$0 sm:$0xff]  ;;  %s7489_s6 = sld [smem:[#allocation11_spill]] }
 0x42e   :  { %v6242_v3 = vpop.eup %6241 }
 0x42f   :  { %5349 = vmatmul.mubr.msk.f32.vlgmr.msra.gmra.mrb[6].mxu0 %vm276_vm1, %v6242_v3 }
 0x430   :  { %5863 = vmatpush3.bf16.msra.mxu0 %v5862_v4  ;;  %5359 = vmatprep.mubr.msk.f32.mxu0 %vm6426_vm0, %v6427_v1  ;;  %v4865_v4 = vld [vmem:[%s6644_s30] ss:$0 sm:$0xff] }
 0x431   :  { %5864 = vmatprep.subr.bf16.mxu0 %v6425_v0 }
 0x434   :  { %5866 = vmatpush3.bf16.msra.mxu0 %v5865_v7 }
 0x435   :  { %5873 = vmatprep.subr.bf16.mxu0 %v6425_v0 }
 0x502   :  { %v642_v18 = vpop.f32.mrb[6].mxu0 }
 0x503   :  { %6243 = vrcp.f32 %v642_v18  ;;  %v5350_v21 = vpop.f32.mrb[7].mxu0 }
 0x50d   :  { %v6244_v28 = vpop.eup %6243 }
 0x50e   :  { %v647_v29 = vmul.f32 %v6244_v28, %v6242_v3 }
 0x510   :  { %5360 = vmatmul.mubr.msk.f32.vlgmr.msra.gmra.mrb[8].mxu0 %vm276_vm1, %v647_v29  ;;  %v4869_v29 = vld [vmem:[%s7485_s8] ss:$0 sm:$0xff] }
 0x511   :  { %5381 = vmatprep.mubr.msk.f32.mxu0 %vm6426_vm0, %v6427_v1  ;;  %5875 = vmatpush3.bf16.msra.mxu0 %v5874_v48  ;;  %v5895_v48 = vpack.c.bf16 %v4876_v46, %v4875_v45 }
 0x512   :  { %5876 = vmatprep.subr.bf16.mxu0 %v6425_v0 }
 0x5e3   :  { %v733_v30 = vpop.f32.mrb[8].mxu0 }
 0x5e4   :  { %v5361_v31 = vpop.f32.mrb[9].mxu0  ;;  %5371 = vmatmul.mubr.msk.f32.vlgmr.msra.gmra.mrb[2].mxu1 %vm276_vm1, %v733_v30 }
 0x5e5   :  { %5400 = vmatprep.mubr.msk.f32.mxu1 %vm6426_vm0, %v6427_v1  ;;  %5881 = vmatpush3.bf16.msra.mxu1 %v5880_v54  ;;  %v4872_v54 = vld [vmem:[%s7487_s7] ss:$0 sm:$0xff] }
 0x5e6   :  { %5882 = vmatprep.subr.bf16.mxu1 %v6425_v0 }
 0x5e9   :  { %5884 = vmatpush3.bf16.msra.mxu1 %v5883_v58 }
 0x5ea   :  { %5885 = vmatprep.subr.bf16.mxu1 %v6425_v0 }
 0x5ed   :  { %5887 = vmatpush3.bf16.msra.mxu1 %v5886_v61 }
 0x5ee   :  { %5888 = vmatprep.subr.bf16.mxu1 %v6425_v0 }
 0x5f1   :  { %5890 = vmatpush3.bf16.msra.mxu1 %v5889_v14 }
 0x5f2   :  { %5897 = vmatprep.subr.bf16.mxu1 %v6425_v0 }
 0x6b7   :  { %v812_v33 = vpop.f32.mrb[2].mxu1 }
 0x6b8   :  { %v813_v36 = vadd.f32 %v4863_v32, %v812_v33  ;;  %v5372_v37 = vpop.f32.mrb[3].mxu1 }
 0x6ba   :  { %v816_v38 = vadd.f32 %v813_v36, %v6712_v11  ;;  %v849_v11 = vld [vmem:[%s6624_s27 + $0x10] sm:$0xff] }
 0x6bb   :  { %v5877_v50 = vpack.c.bf16 %v850_v49, %v849_v11 }
 0x6bc   :  { %v819_v39 = vsel %vm276_vm1, %v816_v38, 0.0 }
 0x6bd   :  { %820 = vadd.xlane.f32.xlu1 %v819_v39  ;;  %5878 = vmatpush3.bf16.msra.mxu0 %v5877_v50 }
 0x6be   :  { %5891 = vmatprep.subr.bf16.mxu0 %v6425_v0 }
 0x74a   :  { %v821_v40 = vpop.xlane.xlu1 %820 }
 0x74b   :  { %v823_v41 = vmul.f32 0.03125, %v821_v40 }
 0x74d   :  { %v824_v42 = vsub.f32 %v816_v38, %v823_v41 }
 0x74f   :  { %v825_v43 = vmul.f32 %v824_v42, %v824_v42 }
 0x751   :  { %v826_v44 = vsel %vm276_vm1, %v825_v43, 0.0  ;;  %v4874_v43 = vld [vmem:[%s6664_s12 + $0x28] sm:$0xff] }
 0x752   :  { %827 = vadd.xlane.f32.xlu0 %v826_v44 }
 0x7df   :  { %v828_v62 = vpop.xlane.xlu0 %827 }
 0x7e0   :  { %v829_v63 = vmul.f32 0.03125, %v828_v62 }
 0x7e2   :  { %v830_v2 = vadd.f32 1e-05, %v829_v63 }
 0x7e4   :  { %6245 = vrsqrt.f32 %v830_v2 }
 0x7ee   :  { %v6246_v3 = vpop.eup %6245 }
 0x7ef   :  { %v832_v5 = vmul.f32 %v6246_v3, %v824_v42  ;;  %v4873_v42 = vld [vmem:[%s6664_s12 + $0x20] sm:$0xff]  ;;  %s7490_s12 = sld [smem:[#allocation12_spill]] }
 0x7f0   :  { %v5892_v44 = vpack.c.bf16 %v4874_v43, %v4873_v42  ;;  %v4882_v42 = vld [vmem:[%s6659_s9 + $0x30] sm:$0xff] }
 0x7f1   :  { %v839_v7 = vmul.f32 %v4865_v4, %v832_v5 }
 0x7f3   :  { %v846_v8 = vadd.f32 %v4866_v6, %v839_v7 }
 0x7f5   :  { %5382 = vmatmul.mubr.msk.f32.vlgmr.msra.gmra.mrb[10].mxu0 %vm276_vm1, %v846_v8 }
 0x7f6   :  { %5411 = vmatprep.mubr.msk.f32.mxu0 %vm6426_vm0, %v6427_v1  ;;  %5893 = vmatpush3.bf16.msra.mxu0 %v5892_v44  ;;  %v4883_v44 = vld [vmem:[%s6659_s9 + $0x38] sm:$0xff] }
 0x7f7   :  { %5894 = vmatprep.subr.bf16.mxu0 %v6425_v0  ;;  %v5921_v45 = vpack.c.bf16 %v4883_v44, %v4882_v42  ;;  %v4913_v42 = vld [vmem:[%s6634_s25 + $0x70] sm:$0xff] }
 0x7fa   :  { %5896 = vmatpush3.bf16.msra.mxu0 %v5895_v48 }
 0x8c8   :  { %v936_v17 = vpop.f32.mrb[10].mxu0 }
 0x8c9   :  { %v937_v18 = vadd.f32 %v4867_v16, %v936_v17  ;;  %v5383_v21 = vpop.f32.mrb[11].mxu0 }
 0x8cb   :  { %v940_v28 = vmax.f32 %v937_v18, 0.0 }
 0x8cd   :  { %5401 = vmatmul.mubr.msk.f32.vlgmr.msra.gmra.mrb[4].mxu1 %vm947_vm4, %v940_v28 }
 0x8ce   :  { %5430 = vmatprep.mubr.msk.f32.mxu1 %vm6426_vm0, %v6427_v1 }
 0x9a0   :  { %v1017_v30 = vpop.f32.mrb[4].mxu1 }
 0x9a1   :  { %v1018_v31 = vadd.f32 %v4869_v29, %v1017_v30  ;;  %v5402_v32 = vpop.f32.mrb[5].mxu1 }
 0x9a3   :  { %v1021_v33 = vadd.f32 %v1018_v31, %v846_v8 }
 0x9a5   :  { %v1024_v36 = vsel %vm276_vm1, %v1021_v33, 0.0 }
 0x9a6   :  { %1025 = vadd.xlane.f32.xlu0 %v1024_v36 }
 0xa33   :  { %v1026_v37 = vpop.xlane.xlu0 %1025 }
 0xa34   :  { %v1027_v38 = vmul.f32 0.03125, %v1026_v37 }
 0xa36   :  { %v1028_v39 = vsub.f32 %v1021_v33, %v1027_v38 }
 0xa38   :  { %v1029_v40 = vmul.f32 %v1028_v39, %v1028_v39 }
 0xa3a   :  { %v1030_v41 = vsel %vm276_vm1, %v1029_v40, 0.0  ;;  %v4880_v40 = vld [vmem:[%s6659_s9 + $0x20] sm:$0xff] }
 0xa3b   :  { %1031 = vadd.xlane.f32.xlu0 %v1030_v41  ;;  %v4881_v41 = vld [vmem:[%s6659_s9 + $0x28] sm:$0xff]  ;;  %s7488_s9 = sld [smem:[#allocation36_spill]] }
 0xa3c   :  { %v5918_v43 = vpack.c.bf16 %v4881_v41, %v4880_v40  ;;  %v237_v40 = vld [vmem:[%s7490_s12] sm:$0xff] }
 0xac8   :  { %v1032_v11 = vpop.xlane.xlu0 %1031 }
 0xac9   :  { %v1033_v49 = vmul.f32 0.03125, %v1032_v11 }
 0xacb   :  { %v1034_v50 = vadd.f32 1e-05, %v1033_v49 }
 0xacd   :  { %6247 = vrsqrt.f32 %v1034_v50 }
 0xad7   :  { %v6248_v51 = vpop.eup %6247 }
 0xad8   :  { %v1036_v53 = vmul.f32 %v6248_v51, %v1028_v39 }
 0xada   :  { %v1043_v56 = vmul.f32 %v4871_v52, %v1036_v53  ;;  %v4896_v52 = vld [vmem:[%s6609_s20 + $0x1] ss:$0 sm:$0xff]  ;;  %s7491_s20 = sld [smem:[#allocation14_spill]] }
 0xadc   :  { %v6869_v58 = vadd.f32 %v4872_v54, %v1043_v56 }
 0xade   :  { %5412 = vmatmul.mubr.msk.f32.vlgmr.msra.gmra.mrb[12].mxu0 %vm276_vm1, %v6869_v58 }
 0xadf   :  { %5416 = vmatprep.mubr.msk.f32.mxu0 %vm360_vm2, %v6717_v12 }
 0xbb1   :  { %v1133_v60 = vpop.f32.mrb[12].mxu0 }
 0xbb2   :  { %v1134_v61 = vadd.f32 %v4878_v59, %v1133_v60  ;;  %v5413_v62 = vpop.f32.mrb[13].mxu0 }
 0xbb4   :  { %1146 = vrot.lane.b32.xlu0 %v1134_v61, %s6429_s13 }
 0xc26   :  { %v1147_v63 = vpop.permute.xlu0 %1146 }
 0xc27   :  { %5414 = vmatprep.subr.mxu0 %v1147_v63 }
 0xc28   :  { %5415 = vmatpush3.msra.mxu0 %v1147_v63 }
 0xc29   :  { %5417 = vmatmul.mubr.msk.f32.vlgmr.msra.gmra.mrb[14].mxu0 %vm360_vm2, %v6744_v22  ;;  %5905 = vmatprep.subr.bf16.mxu0 %v6425_v0 }
 0xc2a   :  { %5419 = vmatprep.mubr.msk.f32.mxu0 %vm360_vm2, %v6747_v23  ;;  %5907 = vmatpush3.bf16.msra.mxu0 %v6802_v55 }
 0xc2b   :  { %5908 = vmatprep.subr.bf16.mxu0 %v6425_v0 }
 0xc2d   :  { %5420 = vmatmul.mubr.msk.f32.gmra.mrb[16].mxu0 %vm360_vm2, %v6755_v24 }
 0xc2e   :  { %5910 = vmatpush3.bf16.msra.mxu0 %v6806_v57  ;;  %5441 = vmatprep.mubr.msk.f32.mxu0 %vm6426_vm0, %v6427_v1 }
 0xc2f   :  { %5911 = vmatprep.subr.bf16.mxu0 %v6425_v0 }
 0xcfc   :  { %v5418_v12 = vpop.f32.mrb[14].mxu0 }
 0xcfd   :  { %v1235_v22 = vmul.f32 %v5418_v12, %v6728_v15  ;;  %v1239_v2 = vmul.f32 %v5418_v12, %v6763_v26  ;;  %v1215_v23 = vpop.f32.mrb[15].mxu0 }
 0xcfe   :  { %v1238_v3 = vmul.f32 %v1215_v23, %v6761_v25  ;;  %v1234_v4 = vmul.f32 %v1215_v23, %v6722_v13  ;;  %v1144_v13 = vmul.f32 0.35355338, %v1134_v61  ;;  %v4903_v23 = vld [vmem:[%s6624_s27 + $0x28] sm:$0xff] }
 0xd00   :  { %v6191_v5 = vpack.i.bf16 %v1239_v2, %v1238_v3  ;;  %v5898_v6 = vpack.c.bf16 %v1235_v22, %v1234_v4  ;;  %v5421_v24 = vpop.f32.mrb[16].mxu0  ;;  %v4902_v2 = vld [vmem:[%s6624_s27 + $0x20] sm:$0xff]  ;;  %v4905_v4 = vld [vmem:[%s6624_s27 + $0x38] sm:$0xff] }
 0xd01   :  { %v1237_v7 = vmul.f32 %v5421_v24, %v6739_v20  ;;  %v1241_v8 = vmul.f32 %v5421_v24, %v6771_v34  ;;  %v1225_v9 = vpop.f32.mrb[17].mxu0  ;;  %v5924_v3 = vpack.c.bf16 %v4903_v23, %v4902_v2  ;;  %v4908_v24 = vld [vmem:[%s6634_s25 + $0x48] sm:$0xff] }
 0xd02   :  { %v1240_v10 = vmul.f32 %v1225_v9, %v6765_v27  ;;  %v1236_v14 = vmul.f32 %v1225_v9, %v6733_v19  ;;  %5900 = vmatpush3.bf16.xpose.msk.msra.mxu1 %vm6775_vm3, %v5898_v6  ;;  %v4907_v6 = vld [vmem:[%s6634_s25 + $0x40] sm:$0xff]  ;;  %v4910_v9 = vld [vmem:[%s6634_s25 + $0x58] sm:$0xff] }
 0xd03   :  { %5901 = vmatprep.subr.bf16.mxu1 %v6425_v0 }
 0xd04   :  { %v6196_v15 = vpack.i.bf16 %v1241_v8, %v1240_v10  ;;  %v5902_v16 = vpack.c.bf16 %v1237_v7, %v1236_v14  ;;  %v4909_v7 = vld [vmem:[%s6634_s25 + $0x50] sm:$0xff]  ;;  %v5930_v8 = vpack.c.bf16 %v4908_v24, %v4907_v6  ;;  %v4911_v14 = vld [vmem:[%s6634_s25 + $0x60] sm:$0xff] }
 0xd05   :  { %v5933_v10 = vpack.c.bf16 %v4910_v9, %v4909_v7 }
 0xd06   :  { %6197 = vrot.lane.b32.xlu0 %v6196_v15, %s6429_s13  ;;  %v4912_v15 = vld [vmem:[%s6634_s25 + $0x68] sm:$0xff] }
 0xd0a   :  { %5904 = vmatpush3.bf16.xpose.msk.msra.mxu1 %vm6775_vm3, %v5902_v16  ;;  %v5936_v16 = vpack.c.bf16 %v4912_v15, %v4911_v14 }
 0xd0b   :  { %5917 = vmatprep.subr.bf16.mxu1 %v6425_v0 }
 0xd11   :  { %5431 = vmatmul.mubr.msk.f32.vlgmr.msra.gmra.mrb[6].mxu1 %vm276_vm1, %v1144_v13 }
 0xd12   :  { %5463 = vmatprep.mubr.msk.f32.mxu1 %vm6426_vm0, %v6427_v1  ;;  %5919 = vmatpush3.bf16.msra.mxu1 %v5918_v43  ;;  %v4914_v43 = vld [vmem:[%s6634_s25 + $0x78] sm:$0xff]  ;;  %s7494_s25 = sld [smem:[#allocation13_spill]] }
 0xd13   :  { %5920 = vmatprep.subr.bf16.mxu1 %v6425_v0  ;;  %v5939_v44 = vpack.c.bf16 %v4914_v43, %v4913_v42 }
 0xd16   :  { %5922 = vmatpush3.bf16.msra.mxu1 %v5921_v45  ;;  %v4916_v45 = vld [vmem:[%s7484_s21 + $0x1] ss:$0 sm:$0xff]  ;;  %s7511_s21 = sld [smem:[#allocation25_spill]] }
 0xd17   :  { %5929 = vmatprep.subr.bf16.mxu1 %v6425_v0 }
 0xd78   :  { %v6198_v33 = vpop.permute.xlu0 %6197 }
 0xd79   :  { %v6199_v37 = vunpack.i.l.bf16 %v6198_v33 }
 0xde4   :  { %v1323_v19 = vpop.f32.mrb[6].mxu1 }
 0xde5   :  { %v1324_v20 = vadd.f32 %v1323_v19, %v6795_v47  ;;  %v5432_v17 = vpop.f32.mrb[7].mxu1  ;;  %v6200_v47 = vunpack.i.h.bf16 %v6198_v33  ;;  %v235_v33 = vld [vmem:[%s7489_s6] sm:$0xff] }
 0xde7   :  { %v1327_v18 = vsel %vm276_vm1, %v1324_v20, -inf  ;;  %v5915_v39 = vpack.c.bf16 %v6200_v47, %v6199_v37  ;;  %v1848_v47 = vld [vmem:[%s7488_s9 + $0x10] sm:$0xff]  ;;  %v1849_v37 = vld [vmem:[%s7488_s9 + $0x18] sm:$0xff] }
 0xde8   :  { %1328 = vmax.xlane.f32.xlu1 %v1327_v18  ;;  %v4900_v18 = vld [vmem:[%s6644_s30 + $0x1] ss:$0 sm:$0xff]  ;;  %s7492_s30 = sld [smem:[#allocation34_spill]] }
 0xdf9   :  { %6192 = vrot.lane.b32.xlu1 %v6191_v5, %s6429_s13 }
 0xe75   :  { %v1329_v21 = vpop.xlane.xlu1 %1328 }
 0xe76   :  { %v1330_v28 = vsub.f32 %v1324_v20, %v1329_v21 }
 0xe78   :  { %v1331_v29 = vmul.f32 1.442695, %v1330_v28  ;;  %v1846_v28 = vld [vmem:[%s7488_s9] sm:$0xff] }
 0xe79   :  { %v6193_v30 = vpop.permute.xlu1 %6192 }
 0xe7a   :  { %6249 = vpow2.f32 %v1331_v29  ;;  %v6195_v31 = vunpack.i.h.bf16 %v6193_v30  ;;  %v6194_v32 = vunpack.i.l.bf16 %v6193_v30  ;;  %v1847_v29 = vld [vmem:[%s7488_s9 + $0x8] sm:$0xff]  ;;  %v4901_v30 = vld [vmem:[%s7483_s17 + $0x1] ss:$0 sm:$0xff]  ;;  %s7510_s17 = sld [smem:[#allocation23_spill]] }
 0xe7c   :  { %v5912_v38 = vpack.c.bf16 %v6195_v31, %v6194_v32  ;;  %v5942_v32 = vpack.c.bf16 %v1847_v29, %v1846_v28 }
 0xe84   :  { %v6250_v36 = vpop.eup %6249 }
 0xe85   :  { %5442 = vmatmul.mubr.msk.f32.vlgmr.msra.gmra.mrb[18].mxu0 %vm276_vm1, %v6250_v36 }
 0xe86   :  { %5913 = vmatpush3.bf16.msra.mxu0 %v5912_v38  ;;  %5452 = vmatprep.mubr.msk.f32.mxu0 %vm6426_vm0, %v6427_v1  ;;  %v236_v38 = vmul.f32 6.656854, %v235_v33 }
 0xe87   :  { %5914 = vmatprep.subr.bf16.mxu0 %v6425_v0 }
 0xe88   :  { %v6962_v41 = vadd.f32 %v237_v40, %v236_v38 }
 0xe8a   :  { %5916 = vmatpush3.bf16.msra.mxu0 %v5915_v39  ;;  %v5945_v39 = vpack.c.bf16 %v1849_v37, %v1848_v47  ;;  %v263_v47 = vld [vmem:[%s7495_s10 + $0x10] sm:$0xff]  ;;  %v264_v37 = vld [vmem:[%s7495_s10 + $0x18] sm:$0xff] }
 0xe8b   :  { %5923 = vmatprep.subr.bf16.mxu0 %v6425_v0  ;;  %v7053_v38 = vpack.c.bf16 %v264_v37, %v263_v47  ;;  %v4922_v37 = vld [vmem:[%s7486_s14 + $0x1] ss:$0 sm:$0xff]  ;;  %s7513_s14 = sld [smem:[#allocation31_spill]] }
 0xf58   :  { %v1402_v46 = vpop.f32.mrb[18].mxu0 }
 0xf59   :  { %6251 = vrcp.f32 %v1402_v46  ;;  %v5443_v48 = vpop.f32.mrb[19].mxu0  ;;  %v6971_v46 = vld [vmem:[%s7491_s20] sm:$0xff] }
 0xf63   :  { %v6252_v11 = vpop.eup %6251 }
 0xf64   :  { %v1407_v49 = vmul.f32 %v6252_v11, %v6250_v36 }
 0xf66   :  { %5453 = vmatmul.mubr.msk.f32.vlgmr.msra.gmra.mrb[20].mxu0 %vm276_vm1, %v1407_v49 }
 0xf67   :  { %5474 = vmatprep.mubr.msk.f32.mxu0 %vm6426_vm0, %v6427_v1  ;;  %5925 = vmatpush3.bf16.msra.mxu0 %v5924_v3 }
 0xf68   :  { %5926 = vmatprep.subr.bf16.mxu0 %v6425_v0 }
0x1039   :  { %v1493_v50 = vpop.f32.mrb[20].mxu0 }
0x103a   :  { %v5454_v51 = vpop.f32.mrb[21].mxu0  ;;  %5464 = vmatmul.mubr.msk.f32.vlgmr.msra.gmra.mrb[8].mxu1 %vm276_vm1, %v1493_v50 }
0x103b   :  { %5493 = vmatprep.mubr.msk.f32.mxu1 %vm6426_vm0, %v6427_v1  ;;  %5931 = vmatpush3.bf16.msra.mxu1 %v5930_v8  ;;  %v4926_v51 = vld [vmem:[%s7492_s30] ss:$0 sm:$0xff] }
0x103c   :  { %5932 = vmatprep.subr.bf16.mxu1 %v6425_v0 }
0x103f   :  { %5934 = vmatpush3.bf16.msra.mxu1 %v5933_v10 }
0x1040   :  { %5935 = vmatprep.subr.bf16.mxu1 %v6425_v0 }
0x1043   :  { %5937 = vmatpush3.bf16.msra.mxu1 %v5936_v16 }
0x1044   :  { %5938 = vmatprep.subr.bf16.mxu1 %v6425_v0 }
0x1047   :  { %5940 = vmatpush3.bf16.msra.mxu1 %v5939_v44 }
0x1048   :  { %5955 = vmatprep.subr.bf16.mxu1 %v6425_v0 }
0x110d   :  { %v1572_v53 = vpop.f32.mrb[8].mxu1 }
0x110e   :  { %v1573_v54 = vadd.f32 %v4896_v52, %v1572_v53  ;;  %v5465_v56 = vpop.f32.mrb[9].mxu1 }
0x1110   :  { %v1576_v59 = vadd.f32 %v1573_v54, %v6869_v58  ;;  %v4904_v58 = vld [vmem:[%s6624_s27 + $0x30] sm:$0xff]  ;;  %s7493_s27 = sld [smem:[#allocation15_spill]] }
0x1111   :  { %v5927_v5 = vpack.c.bf16 %v4905_v4, %v4904_v58 }
0x1112   :  { %v1581_v60 = vsel %vm276_vm1, %v1576_v59, 0.0 }
0x1113   :  { %1582 = vadd.xlane.f32.xlu0 %v1581_v60  ;;  %5928 = vmatpush3.bf16.msra.mxu0 %v5927_v5 }
0x1114   :  { %5941 = vmatprep.subr.bf16.mxu0 %v6425_v0 }
0x1116   :  { %v6981_v56 = vld [vmem:[%s7493_s27 + $0x8] sm:$0xff]  ;;  %v6991_v60 = vld [vmem:[%s7493_s27 + $0x18] sm:$0xff]  ;;  %v7018_v58 = vld [vmem:[%s7493_s27] sm:$0xff] }
0x11a0   :  { %v1583_v61 = vpop.xlane.xlu0 %1582 }
0x11a1   :  { %v1584_v62 = vmul.f32 0.03125, %v1583_v61 }
0x11a3   :  { %v1585_v63 = vsub.f32 %v1576_v59, %v1584_v62  ;;  %v6986_v59 = vld [vmem:[%s7493_s27 + $0x10] sm:$0xff]  ;;  %v6996_v62 = vld [vmem:[%s7491_s20 + $0x8] sm:$0xff] }
0x11a5   :  { %v1586_v12 = vmul.f32 %v1585_v63, %v1585_v63 }
0x11a7   :  { %v1587_v22 = vsel %vm276_vm1, %v1586_v12, 0.0  ;;  %v7007_v12 = vld [vmem:[%s7491_s20 + $0x18] sm:$0xff] }
0x11a8   :  { %1588 = vadd.xlane.f32.xlu1 %v1587_v22 }
0x1235   :  { %v1589_v13 = vpop.xlane.xlu1 %1588 }
0x1236   :  { %v1590_v19 = vmul.f32 0.03125, %v1589_v13 }
0x1238   :  { %v1591_v20 = vadd.f32 1e-05, %v1590_v19 }
0x123a   :  { %6253 = vrsqrt.f32 %v1591_v20 }
0x1244   :  { %v6254_v17 = vpop.eup %6253 }
0x1245   :  { %v1593_v21 = vmul.f32 %v6254_v17, %v1585_v63  ;;  %v6999_v63 = vld [vmem:[%s7491_s20 + $0x10] sm:$0xff] }
0x1247   :  { %v1600_v31 = vmul.f32 %v4900_v18, %v1593_v21  ;;  %v7038_v18 = vld [vmem:[%s7494_s25] sm:$0xff] }
0x1249   :  { %v6952_v36 = vadd.f32 %v4901_v30, %v1600_v31  ;;  %v261_v31 = vld [vmem:[%s7495_s10] sm:$0xff] }
0x124b   :  { %5475 = vmatmul.mubr.msk.f32.vlgmr.msra.gmra.mrb[22].mxu0 %vm276_vm1, %v6952_v36 }
0x124c   :  { %5943 = vmatpush3.bf16.msra.mxu0 %v5942_v32  ;;  %5504 = vmatprep.mubr.msk.f32.mxu0 %vm6426_vm0, %v6427_v1  ;;  %v262_v32 = vld [vmem:[%s7495_s10 + $0x8] sm:$0xff] }
0x124d   :  { %5944 = vmatprep.subr.bf16.mxu0 %v6425_v0  ;;  %v7046_v33 = vpack.c.bf16 %v262_v32, %v261_v31 }
0x1250   :  { %5946 = vmatpush3.bf16.msra.mxu0 %v5945_v39 }
0x1253   :  { %5505 = vmatmul.mubr.msk.f32.vlgmr.msra.gmra.mrb[24].mxu0 %vm276_vm1, %v6962_v41 }
0x1254   :  { %5509 = vmatprep.mubr.msk.f32.mxu0 %vm360_vm2, %v6971_v46 }
0x131e   :  { %v1701_v48 = vpop.f32.mrb[22].mxu0 }
0x131f   :  { %v1702_v11 = vadd.f32 %v4916_v45, %v1701_v48  ;;  %v5476_v49 = vpop.f32.mrb[23].mxu0 }
0x1320   :  { %v4918_v49 = vld [vmem:[%s7485_s8 + $0x1] ss:$0 sm:$0xff]  ;;  %s7512_s8 = sld [smem:[#allocation32_spill]] }
0x1321   :  { %v1705_v50 = vmax.f32 %v1702_v11, 0.0 }
0x1323   :  { %5494 = vmatmul.mubr.msk.f32.vlgmr.msra.gmra.mrb[10].mxu1 %vm947_vm4, %v1705_v50 }
0x1324   :  { %5534 = vmatprep.mubr.msk.f32.mxu1 %vm6426_vm0, %v6427_v1  ;;  %5957 = vmatpush3.bf16.msra.mxu1 %v7046_v33 }
0x1325   :  { %5958 = vmatprep.subr.bf16.mxu1 %v6425_v0 }
0x1326   :  { %v1926_v52 = vpop.f32.mrb[24].mxu0 }
0x1327   :  { %v1927_v53 = vadd.f32 %v4926_v51, %v1926_v52  ;;  %v5506_v54 = vpop.f32.mrb[25].mxu0 }
0x1328   :  { %5960 = vmatpush3.bf16.msra.mxu1 %v7053_v38 }
0x1329   :  { %1937 = vrot.lane.b32.xlu0 %v1927_v53, %s6429_s13  ;;  %v1935_v17 = vmul.f32 0.35355338, %v1927_v53  ;;  %5961 = vmatprep.subr.bf16.mxu1 %v6425_v0 }
0x132d   :  { %2047 = vrot.lane.b32.xlu0 %v6981_v56, %s6428_s5 }
0x1331   :  { %2049 = vrot.lane.b32.xlu0 %v6986_v59, %s6428_s5 }
0x1335   :  { %2051 = vrot.lane.b32.xlu0 %v6991_v60, %s6428_s5 }
0x139b   :  { %v1938_v61 = vpop.permute.xlu0 %1937 }
0x139c   :  { %5507 = vmatprep.subr.mxu0 %v1938_v61 }
0x139d   :  { %5508 = vmatpush3.msra.mxu0 %v1938_v61 }
0x139e   :  { %5510 = vmatmul.mubr.msk.f32.vlgmr.msra.gmra.mrb[26].mxu0 %vm360_vm2, %v6996_v62  ;;  %5947 = vmatprep.subr.bf16.mxu0 %v6425_v0 }
0x139f   :  { %5512 = vmatprep.mubr.msk.f32.mxu0 %vm360_vm2, %v6999_v63  ;;  %v7013_v23 = vpop.permute.xlu0 %2047 }
0x13a2   :  { %5513 = vmatmul.mubr.msk.f32.gmra.mrb[28].mxu0 %vm360_vm2, %v7007_v12 }
0x13a3   :  { %5523 = vmatprep.mubr.msk.f32.mxu0 %vm6426_vm0, %v6427_v1  ;;  %v7015_v3 = vpop.permute.xlu0 %2049 }
0x13a7   :  { %v7022_v7 = vpop.permute.xlu0 %2051 }
0x13f6   :  { %v1781_v22 = vpop.f32.mrb[10].mxu1 }
0x13f7   :  { %v5495_v2 = vpop.f32.mrb[11].mxu1  ;;  %v1782_v50 = vadd.f32 %v4918_v49, %v1781_v22 }
0x13f9   :  { %v1785_v51 = vadd.f32 %v1782_v50, %v6952_v36 }
0x13fb   :  { %v1790_v52 = vsel %vm276_vm1, %v1785_v51, 0.0 }
0x1471   :  { %v5511_v4 = vpop.f32.mrb[26].mxu0 }
0x1472   :  { %v2038_v5 = vmul.f32 %v5511_v4, %v6981_v56  ;;  %v2018_v6 = vpop.f32.mrb[27].mxu0  ;;  %v2058_v44 = vmul.f32 %v5511_v4, %v7013_v23 }
0x1473   :  { %v2037_v24 = vmul.f32 %v2018_v6, %v7018_v58 }
0x1475   :  { %v5948_v8 = vpack.c.bf16 %v2038_v5, %v2037_v24  ;;  %v5514_v9 = vpop.f32.mrb[28].mxu0 }
0x1476   :  { %v2040_v10 = vmul.f32 %v5514_v9, %v6991_v60  ;;  %v2060_v14 = vmul.f32 %v5514_v9, %v7022_v7  ;;  %v2028_v15 = vpop.f32.mrb[29].mxu0 }
0x1477   :  { %5950 = vmatpush3.bf16.xpose.msk.msra.mxu0 %vm6775_vm3, %v5948_v8  ;;  %v2059_v16 = vmul.f32 %v7015_v3, %v2028_v15  ;;  %v2039_v13 = vmul.f32 %v2028_v15, %v6986_v59  ;;  %v1931_v15 = vld [vmem:[%s7496_s11 + $0x8] sm:$0xff] }
0x1478   :  { %5951 = vmatprep.subr.bf16.mxu0 %v6425_v0 }
0x1479   :  { %v6206_v19 = vpack.i.bf16 %v2060_v14, %v2059_v16  ;;  %v5952_v20 = vpack.c.bf16 %v2040_v10, %v2039_v13  ;;  %v1930_v14 = vld [vmem:[%s7496_s11] sm:$0xff]  ;;  %v1932_v16 = vld [vmem:[%s7496_s11 + $0x10] sm:$0xff] }
0x147a   :  { %v5968_v13 = vpack.c.bf16 %v1931_v15, %v1930_v14  ;;  %v4925_v14 = vld [vmem:[#allocation2] ss:$0 sm:$0xff] }
0x147f   :  { %5954 = vmatpush3.bf16.xpose.msk.msra.mxu0 %vm6775_vm3, %v5952_v20 }
0x1480   :  { %5967 = vmatprep.subr.bf16.mxu0 %v6425_v0 }
0x1486   :  { %5524 = vmatmul.mubr.msk.f32.vlgmr.msra.gmra.mrb[30].mxu0 %vm276_vm1, %v1935_v17 }
0x1487   :  { %5556 = vmatprep.mubr.msk.f32.mxu0 %vm6426_vm0, %v6427_v1  ;;  %5969 = vmatpush3.bf16.msra.mxu0 %v5968_v13 }
0x1488   :  { %5970 = vmatprep.subr.bf16.mxu0 %v6425_v0 }
0x1559   :  { %v2142_v21 = vpop.f32.mrb[30].mxu0 }
0x155a   :  { %v2143_v28 = vadd.f32 %v2142_v21, %v7038_v18  ;;  %v5525_v29 = vpop.f32.mrb[31].mxu0 }
0x155c   :  { %v2146_v30 = vsel %vm276_vm1, %v2143_v28, -inf }
0x155d   :  { %2147 = vmax.xlane.f32.xlu1 %v2146_v30 }
0x156e   :  { %2045 = vrot.lane.b32.xlu1 %v7018_v58, %s6428_s5  ;;  %s7509_s5 = sld [smem:[#allocation29_spill]] }
0x1572   :  { %6207 = vrot.lane.b32.xlu1 %v6206_v19, %s6429_s13  ;;  %v1933_v19 = vld [vmem:[%s7496_s11 + $0x18] sm:$0xff] }
0x1573   :  { %v5971_v21 = vpack.c.bf16 %v1933_v19, %v1932_v16  ;;  %v4939_v16 = vld [vmem:[%s7498_s16] ss:$0 sm:$0xff] }
0x1575   :  { %5972 = vmatpush3.bf16.msra.mxu0 %v5971_v21 }
0x1576   :  { %5979 = vmatprep.subr.bf16.mxu0 %v6425_v0 }
0x15ea   :  { %v2148_v39 = vpop.xlane.xlu1 %2147 }
0x15eb   :  { %v2149_v40 = vsub.f32 %v2143_v28, %v2148_v39 }
0x15ed   :  { %v2150_v42 = vmul.f32 1.442695, %v2149_v40  ;;  %v4923_v40 = vld [vmem:[%s7487_s7 + $0x1] ss:$0 sm:$0xff]  ;;  %s7515_s7 = sld [smem:[#allocation37_spill]] }
0x15ee   :  { %v7057_v43 = vpop.permute.xlu1 %2045 }
0x15ef   :  { %6255 = vpow2.f32 %v2150_v42  ;;  %v2057_v45 = vmul.f32 %v7057_v43, %v2018_v6 }
0x15f1   :  { %v6201_v48 = vpack.i.bf16 %v2058_v44, %v2057_v45 }
0x15f2   :  { %v6208_v53 = vpop.permute.xlu1 %6207 }
0x15f3   :  { %6202 = vrot.lane.b32.xlu0 %v6201_v48, %s6429_s13  ;;  %v6210_v4 = vunpack.i.h.bf16 %v6208_v53  ;;  %v6209_v5 = vunpack.i.l.bf16 %v6208_v53 }
0x15f5   :  { %v5965_v22 = vpack.c.bf16 %v6210_v4, %v6209_v5  ;;  %v2511_v4 = vld [vmem:[%s7497_s15 + $0x10] sm:$0xff]  ;;  %v2512_v5 = vld [vmem:[%s7497_s15 + $0x18] sm:$0xff] }
0x15f9   :  { %v6256_v11 = vpop.eup %6255 }
0x15fa   :  { %5535 = vmatmul.mubr.msk.f32.vlgmr.msra.gmra.mrb[12].mxu1 %vm276_vm1, %v6256_v11 }
0x15fb   :  { %5545 = vmatprep.mubr.msk.f32.mxu1 %vm6426_vm0, %v6427_v1 }
0x1612   :  { %1791 = vadd.xlane.f32.xlu0 %v1790_v52 }
0x1665   :  { %v6203_v54 = vpop.permute.xlu0 %6202 }
0x1666   :  { %v6205_v61 = vunpack.i.h.bf16 %v6203_v54  ;;  %v6204_v2 = vunpack.i.l.bf16 %v6203_v54  ;;  %v2509_v54 = vld [vmem:[%s7497_s15] sm:$0xff] }
0x1668   :  { %v5962_v6 = vpack.c.bf16 %v6205_v61, %v6204_v2  ;;  %v2510_v61 = vld [vmem:[%s7497_s15 + $0x8] sm:$0xff] }
0x1669   :  { %v5980_v2 = vpack.c.bf16 %v2510_v61, %v2509_v54  ;;  %v4941_v54 = vld [vmem:[%s7501_s23] ss:$0 sm:$0xff] }
0x166a   :  { %5963 = vmatpush3.bf16.msra.mxu1 %v5962_v6  ;;  %v5983_v6 = vpack.c.bf16 %v2512_v5, %v2511_v4 }
0x166b   :  { %5964 = vmatprep.subr.bf16.mxu1 %v6425_v0 }
0x166e   :  { %5966 = vmatpush3.bf16.msra.mxu1 %v5965_v22 }
0x166f   :  { %5973 = vmatprep.subr.bf16.mxu1 %v6425_v0 }
0x169f   :  { %v1792_v36 = vpop.xlane.xlu0 %1791 }
0x16a0   :  { %v1793_v24 = vmul.f32 0.03125, %v1792_v36 }
0x16a2   :  { %v1794_v8 = vsub.f32 %v1785_v51, %v1793_v24 }
0x16a4   :  { %v1795_v9 = vmul.f32 %v1794_v8, %v1794_v8 }
0x16a6   :  { %v1796_v10 = vsel %vm276_vm1, %v1795_v9, 0.0  ;;  %v4924_v9 = vld [vmem:[#allocation5] ss:$0 sm:$0xff] }
0x16a7   :  { %1797 = vadd.xlane.f32.xlu1 %v1796_v10 }
0x16cd   :  { %v2221_v20 = vpop.f32.mrb[12].mxu1 }
0x16ce   :  { %6257 = vrcp.f32 %v2221_v20  ;;  %v5536_v17 = vpop.f32.mrb[13].mxu1 }
0x16d8   :  { %v6258_v28 = vpop.eup %6257 }
0x16d9   :  { %v2226_v29 = vmul.f32 %v6258_v28, %v6256_v11 }
0x16db   :  { %5546 = vmatmul.mubr.msk.f32.vlgmr.msra.gmra.mrb[14].mxu1 %vm276_vm1, %v2226_v29  ;;  %v2425_v29 = vld [vmem:[%s7499_s18] sm:$0xff] }
0x16dc   :  { %5567 = vmatprep.mubr.msk.f32.mxu1 %vm6426_vm0, %v6427_v1 }
0x1734   :  { %v1798_v30 = vpop.xlane.xlu1 %1797 }
0x1735   :  { %v1799_v31 = vmul.f32 0.03125, %v1798_v30  ;;  %v2426_v30 = vld [vmem:[%s7499_s18 + $0x8] sm:$0xff] }
0x1737   :  { %v1800_v32 = vadd.f32 1e-05, %v1799_v31  ;;  %v5974_v31 = vpack.c.bf16 %v2426_v30, %v2425_v29 }
0x1739   :  { %6259 = vrsqrt.f32 %v1800_v32  ;;  %5975 = vmatpush3.bf16.msra.mxu1 %v5974_v31  ;;  %v2427_v32 = vld [vmem:[%s7499_s18 + $0x10] sm:$0xff]  ;;  %v7153_v31 = vld [vmem:[%s6474_s3 + $0x18] sm:$0xff] }
0x173a   :  { %5976 = vmatprep.subr.bf16.mxu1 %v6425_v0 }
0x1743   :  { %v6260_v47 = vpop.eup %6259 }
0x1744   :  { %v1802_v39 = vmul.f32 %v6260_v47, %v1794_v8  ;;  %v2428_v47 = vld [vmem:[%s7499_s18 + $0x18] sm:$0xff] }
0x1746   :  { %v1809_v42 = vmul.f32 %v4922_v37, %v1802_v39  ;;  %v5977_v37 = vpack.c.bf16 %v2428_v47, %v2427_v32 }
0x1748   :  { %v1816_v44 = vadd.f32 %v4923_v40, %v1809_v42  ;;  %5978 = vmatpush3.bf16.msra.mxu1 %v5977_v37 }
0x174a   :  { %v1819_v45 = vsel %vm276_vm1, %v1816_v44, 0.0 }
0x174b   :  { %1820 = vadd.xlane.f32.xlu0 %v1819_v45  ;;  %v4945_v45 = vld [vmem:[%s7500_s22] ss:$0 sm:$0xff] }
0x17ae   :  { %v2312_v48 = vpop.f32.mrb[14].mxu1 }
0x17af   :  { %v5547_v11 = vpop.f32.mrb[15].mxu1  ;;  %5557 = vmatmul.mubr.msk.f32.vlgmr.msra.gmra.mrb[32].mxu0 %vm276_vm1, %v2312_v48 }
0x17b0   :  { %5578 = vmatprep.mubr.msk.f32.mxu0 %vm6426_vm0, %v6427_v1  ;;  %5981 = vmatpush3.bf16.msra.mxu0 %v5980_v2  ;;  %v4942_v2 = vld [vmem:[%s7502_s26] ss:$0 sm:$0xff] }
0x17b1   :  { %5982 = vmatprep.subr.bf16.mxu0 %v6425_v0 }
0x17b4   :  { %5984 = vmatpush3.bf16.msra.mxu0 %v5983_v6  ;;  %v7120_v6 = vld [vmem:[%s6469_s29] sm:$0xff] }
0x17b5   :  { %5993 = vmatprep.subr.bf16.mxu0 %v6425_v0 }
0x17d8   :  { %v1821_v49 = vpop.xlane.xlu0 %1820 }
0x17d9   :  { %v1822_v50 = vmul.f32 0.03125, %v1821_v49 }
0x17db   :  { %v1823_v51 = vsub.f32 %v1816_v44, %v1822_v50 }
0x17dd   :  { %v1824_v52 = vmul.f32 %v1823_v51, %v1823_v51 }
0x17df   :  { %v1825_v53 = vsel %vm276_vm1, %v1824_v52, 0.0 }
0x17e0   :  { %1826 = vadd.xlane.f32.xlu0 %v1825_v53 }
0x186d   :  { %v1827_v22 = vpop.xlane.xlu0 %1826 }
0x186e   :  { %v1828_v36 = vmul.f32 0.03125, %v1827_v22  ;;  %v7126_v22 = vld [vmem:[%s6469_s29 + $0x8] sm:$0xff] }
0x1870   :  { %v1829_v24 = vadd.f32 1e-05, %v1828_v36  ;;  %v7131_v36 = vld [vmem:[%s6469_s29 + $0x10] sm:$0xff] }
0x1872   :  { %6261 = vrsqrt.f32 %v1829_v24  ;;  %v7136_v24 = vld [vmem:[%s6469_s29 + $0x18] sm:$0xff]  ;;  %s7503_s29 = sld [smem:[#allocation19_spill]] }
0x187c   :  { %v6262_v8 = vpop.eup %6261 }
0x187d   :  { %v1831_v10 = vmul.f32 %v6262_v8, %v1823_v51 }
0x187f   :  { %v1838_v15 = vmul.f32 %v4924_v9, %v1831_v10 }
0x1881   :  { %v7094_v13 = vadd.f32 %v4925_v14, %v1838_v15  ;;  %v7143_v14 = vld [vmem:[%s6474_s3 + $0x8] sm:$0xff] }
0x1882   :  { %v2391_v19 = vpop.f32.mrb[32].mxu0 }
0x1883   :  { %v2392_v20 = vadd.f32 %v4939_v16, %v2391_v19  ;;  %v5558_v17 = vpop.f32.mrb[33].mxu0  ;;  %5579 = vmatmul.mubr.msk.f32.vlgmr.msra.gmra.mrb[34].mxu0 %vm276_vm1, %v7094_v13 }
0x1884   :  { %5995 = vmatpush3.bf16.msra.mxu0 %v6802_v55  ;;  %5608 = vmatprep.mubr.msk.f32.mxu0 %vm6426_vm0, %v6427_v1  ;;  %v7149_v17 = vld [vmem:[%s6474_s3] sm:$0xff] }
0x1885   :  { %v2395_v21 = vadd.f32 %v2392_v20, %v6962_v41  ;;  %5996 = vmatprep.subr.bf16.mxu0 %v6425_v0 }
0x1887   :  { %v2398_v28 = vsel %vm276_vm1, %v2395_v21, 0.0 }
0x1888   :  { %2399 = vadd.xlane.f32.xlu1 %v2398_v28  ;;  %5998 = vmatpush3.bf16.msra.mxu0 %v6806_v57 }
0x1889   :  { %5999 = vmatprep.subr.bf16.mxu0 %v6425_v0 }
0x1915   :  { %v2400_v41 = vpop.xlane.xlu1 %2399 }
0x1916   :  { %v2401_v39 = vmul.f32 0.03125, %v2400_v41 }
0x1918   :  { %v2402_v40 = vsub.f32 %v2395_v21, %v2401_v39  ;;  %v7159_v39 = vld [vmem:[%s6474_s3 + $0x10] sm:$0xff]  ;;  %s7504_s3 = sld [smem:[#allocation21_spill]] }
0x191a   :  { %v2403_v42 = vmul.f32 %v2402_v40, %v2402_v40 }
0x191c   :  { %v2404_v44 = vsel %vm276_vm1, %v2403_v42, 0.0 }
0x191d   :  { %2405 = vadd.xlane.f32.xlu0 %v2404_v44 }
0x1956   :  { %v2589_v48 = vpop.f32.mrb[34].mxu0 }
0x1957   :  { %v2590_v11 = vadd.f32 %v4945_v45, %v2589_v48  ;;  %v5580_v49 = vpop.f32.mrb[35].mxu0  ;;  %v4943_v45 = vld [vmem:[%s7503_s29] ss:$0 sm:$0xff] }
0x1959   :  { %5581 = vmatprep.subr.mxu1 %v2590_v11 }
0x19aa   :  { %v2406_v50 = vpop.xlane.xlu0 %2405 }
0x19ab   :  { %v2407_v51 = vmul.f32 0.03125, %v2406_v50 }
0x19ad   :  { %v2408_v52 = vadd.f32 1e-05, %v2407_v51 }
0x19af   :  { %6263 = vrsqrt.f32 %v2408_v52 }
0x19b9   :  { %v6264_v53 = vpop.eup %6263 }
0x19ba   :  { %v2410_v61 = vmul.f32 %v6264_v53, %v2402_v40 }
0x19bc   :  { %v2417_v4 = vmul.f32 %v4941_v54, %v2410_v61 }
0x19be   :  { %v7115_v5 = vadd.f32 %v4942_v2, %v2417_v4 }
0x19c0   :  { %5568 = vmatmul.mubr.msk.f32.vlgmr.msra.gmra.mrb[16].mxu1 %vm276_vm1, %v7115_v5 }
0x19c1   :  { %5582 = vmatpush3.msra.mxu1 %v2590_v11  ;;  %5583 = vmatprep.mubr.msk.f32.mxu1 %vm360_vm2, %v7120_v6 }
0x19c2   :  { %5985 = vmatprep.subr.bf16.mxu1 %v6425_v0 }
0x19c4   :  { %5584 = vmatmul.mubr.msk.f32.vlgmr.msra.gmra.mrb[18].mxu1 %vm360_vm2, %v7126_v22 }
0x19c5   :  { %5586 = vmatprep.mubr.msk.f32.mxu1 %vm360_vm2, %v7131_v36 }
0x19c8   :  { %5587 = vmatmul.mubr.msk.f32.gmra.mrb[20].mxu1 %vm360_vm2, %v7136_v24 }
0x19c9   :  { %5597 = vmatprep.mubr.msk.f32.mxu1 %vm6426_vm0, %v6427_v1 }
0x1a93   :  { %v2505_v8 = vpop.f32.mrb[16].mxu1 }
0x1a94   :  { %v5569_v9 = vpop.f32.mrb[17].mxu1  ;;  %v2506_v48 = vadd.f32 %v4943_v45, %v2505_v8  ;;  %v4958_v45 = vld [vmem:[%s7505_s0] ss:$0 sm:$0xff] }
0x1a96   :  { %v2598_v11 = vmul.f32 0.35355338, %v2506_v48 }
0x1a97   :  { %v5585_v10 = vpop.f32.mrb[18].mxu1 }
0x1a98   :  { %v2685_v15 = vmul.f32 %v7143_v14, %v5585_v10  ;;  %v2689_v16 = vmul.f32 %v5585_v10, %v6763_v26  ;;  %v2665_v19 = vpop.f32.mrb[19].mxu1 }
0x1a99   :  { %v2688_v20 = vmul.f32 %v2665_v19, %v6761_v25  ;;  %v2684_v21 = vmul.f32 %v7149_v17, %v2665_v19 }
0x1a9b   :  { %v6211_v28 = vpack.i.bf16 %v2689_v16, %v2688_v20  ;;  %v5986_v29 = vpack.c.bf16 %v2685_v15, %v2684_v21  ;;  %v5588_v30 = vpop.f32.mrb[20].mxu1  ;;  %v2593_v20 = vld [vmem:[%s7504_s3] sm:$0xff]  ;;  %v2594_v21 = vld [vmem:[%s7504_s3 + $0x8] sm:$0xff] }
0x1a9c   :  { %v2687_v32 = vmul.f32 %v7153_v31, %v5588_v30  ;;  %v2691_v47 = vmul.f32 %v5588_v30, %v6771_v34  ;;  %v2675_v37 = vpop.f32.mrb[21].mxu1  ;;  %v2596_v30 = vld [vmem:[%s7504_s3 + $0x18] sm:$0xff] }
0x1a9d   :  { %v2690_v41 = vmul.f32 %v2675_v37, %v6765_v27  ;;  %v2686_v40 = vmul.f32 %v7159_v39, %v2675_v37  ;;  %6212 = vrot.lane.b32.xlu0 %v6211_v28, %s6429_s13  ;;  %5988 = vmatpush3.bf16.xpose.msk.msra.mxu1 %vm6775_vm3, %v5986_v29  ;;  %v2595_v28 = vld [vmem:[%s7504_s3 + $0x10] sm:$0xff]  ;;  %v6006_v29 = vpack.c.bf16 %v2594_v21, %v2593_v20 }
0x1a9e   :  { %5989 = vmatprep.subr.bf16.mxu1 %v6425_v0  ;;  %v3063_v20 = vld [vmem:[%s7507_s1 + $0x10] sm:$0xff] }
0x1a9f   :  { %v6216_v42 = vpack.i.bf16 %v2691_v47, %v2690_v41  ;;  %v5990_v44 = vpack.c.bf16 %v2687_v32, %v2686_v40  ;;  %v6009_v32 = vpack.c.bf16 %v2596_v30, %v2595_v28  ;;  %v3064_v28 = vld [vmem:[%s7507_s1 + $0x18] sm:$0xff]  ;;  %v3065_v30 = vld [vmem:[%s7507_s1 + $0x20] sm:$0xff] }
0x1aa5   :  { %5992 = vmatpush3.bf16.xpose.msk.msra.mxu1 %vm6775_vm3, %v5990_v44 }
0x1aa6   :  { %6005 = vmatprep.subr.bf16.mxu1 %v6425_v0 }
0x1aac   :  { %5598 = vmatmul.mubr.msk.f32.vlgmr.msra.gmra.mrb[22].mxu1 %vm276_vm1, %v2598_v11 }
0x1aad   :  { %5630 = vmatprep.mubr.msk.f32.mxu1 %vm6426_vm0, %v6427_v1  ;;  %6007 = vmatpush3.bf16.msra.mxu1 %v6006_v29  ;;  %v6021_v29 = vpack.c.bf16 %v3064_v28, %v3063_v20 }
0x1aae   :  { %6008 = vmatprep.subr.bf16.mxu1 %v6425_v0 }
0x1ab1   :  { %6010 = vmatpush3.bf16.msra.mxu1 %v6009_v32  ;;  %v3066_v32 = vld [vmem:[%s7507_s1 + $0x28] sm:$0xff] }
0x1ab2   :  { %6017 = vmatprep.subr.bf16.mxu1 %v6425_v0 }
0x1b0f   :  { %v6213_v61 = vpop.permute.xlu0 %6212 }
0x1b10   :  { %v6215_v2 = vunpack.i.h.bf16 %v6213_v61  ;;  %v6214_v4 = vunpack.i.l.bf16 %v6213_v61 }
0x1b12   :  { %v6000_v10 = vpack.c.bf16 %v6215_v2, %v6214_v4  ;;  %v3056_v4 = vld [vmem:[%s7506_s28] sm:$0xff] }
0x1b7f   :  { %v2773_v49 = vpop.f32.mrb[22].mxu1 }
0x1b80   :  { %v5599_v50 = vpop.f32.mrb[23].mxu1  ;;  %v2777_v51 = vsel %vm276_vm1, %v2773_v49, -inf }
0x1b81   :  { %2778 = vmax.xlane.f32.xlu1 %v2777_v51 }
0x1b92   :  { %6217 = vrot.lane.b32.xlu1 %v6216_v42, %s6429_s13 }
0x1c0e   :  { %v2779_v52 = vpop.xlane.xlu1 %2778 }
0x1c0f   :  { %v2780_v53 = vsub.f32 %v2773_v49, %v2779_v52 }
0x1c11   :  { %v2781_v54 = vmul.f32 1.442695, %v2780_v53 }
0x1c12   :  { %v6218_v8 = vpop.permute.xlu1 %6217 }
0x1c13   :  { %6265 = vpow2.f32 %v2781_v54  ;;  %v6220_v15 = vunpack.i.h.bf16 %v6218_v8  ;;  %v6219_v16 = vunpack.i.l.bf16 %v6218_v8  ;;  %v3057_v8 = vld [vmem:[%s7506_s28 + $0x8] sm:$0xff] }
0x1c15   :  { %v6003_v19 = vpack.c.bf16 %v6220_v15, %v6219_v16  ;;  %v3061_v16 = vld [vmem:[%s7507_s1] sm:$0xff] }
0x1c1d   :  { %v6266_v9 = vpop.eup %6265 }
0x1c1e   :  { %5609 = vmatmul.mubr.msk.f32.vlgmr.msra.gmra.mrb[36].mxu0 %vm276_vm1, %v6266_v9 }
0x1c1f   :  { %6001 = vmatpush3.bf16.msra.mxu0 %v6000_v10  ;;  %5619 = vmatprep.mubr.msk.f32.mxu0 %vm6426_vm0, %v6427_v1  ;;  %v3059_v10 = vld [vmem:[%s7506_s28 + $0x18] sm:$0xff] }
0x1c20   :  { %6002 = vmatprep.subr.bf16.mxu0 %v6425_v0 }
0x1c23   :  { %6004 = vmatpush3.bf16.msra.mxu0 %v6003_v19  ;;  %v3062_v19 = vld [vmem:[%s7507_s1 + $0x8] sm:$0xff] }
0x1c24   :  { %6011 = vmatprep.subr.bf16.mxu0 %v6425_v0  ;;  %v6018_v21 = vpack.c.bf16 %v3062_v19, %v3061_v16 }
0x1cf1   :  { %v2852_v47 = vpop.f32.mrb[36].mxu0 }
0x1cf2   :  { %6267 = vrcp.f32 %v2852_v47  ;;  %v5610_v37 = vpop.f32.mrb[37].mxu0  ;;  %v6024_v47 = vpack.c.bf16 %v3066_v32, %v3065_v30  ;;  %v4970_v32 = vld [vmem:[%s7488_s9 + $0x30] sm:$0xff] }
0x1cfc   :  { %v6268_v41 = vpop.eup %6267 }
0x1cfd   :  { %v2857_v40 = vmul.f32 %v6268_v41, %v6266_v9  ;;  %v6012_v9 = vpack.c.bf16 %v3057_v8, %v3056_v4  ;;  %v4964_v8 = vld [vmem:[%s7511_s21] ss:$0 sm:$0xff] }
0x1cff   :  { %5620 = vmatmul.mubr.msk.f32.vlgmr.msra.gmra.mrb[38].mxu0 %vm276_vm1, %v2857_v40 }
0x1d00   :  { %5641 = vmatprep.mubr.msk.f32.mxu0 %vm6426_vm0, %v6427_v1  ;;  %6013 = vmatpush3.bf16.msra.mxu0 %v6012_v9 }
0x1d01   :  { %6014 = vmatprep.subr.bf16.mxu0 %v6425_v0 }
0x1dd2   :  { %v2943_v42 = vpop.f32.mrb[38].mxu0 }
0x1dd3   :  { %v5621_v44 = vpop.f32.mrb[39].mxu0  ;;  %5631 = vmatmul.mubr.msk.f32.vlgmr.msra.gmra.mrb[24].mxu1 %vm276_vm1, %v2943_v42 }
0x1dd4   :  { %5660 = vmatprep.mubr.msk.f32.mxu1 %vm6426_vm0, %v6427_v1  ;;  %6019 = vmatpush3.bf16.msra.mxu1 %v6018_v21  ;;  %v4960_v44 = vld [vmem:[%s7508_s2] ss:$0 sm:$0xff] }
0x1dd5   :  { %6020 = vmatprep.subr.bf16.mxu1 %v6425_v0 }
0x1dd8   :  { %6022 = vmatpush3.bf16.msra.mxu1 %v6021_v29  ;;  %v4969_v29 = vld [vmem:[%s7488_s9 + $0x28] sm:$0xff] }
0x1dd9   :  { %6023 = vmatprep.subr.bf16.mxu1 %v6425_v0 }
0x1ddc   :  { %6025 = vmatpush3.bf16.msra.mxu1 %v6024_v47  ;;  %v4971_v47 = vld [vmem:[%s7488_s9 + $0x38] sm:$0xff] }
0x1ddd   :  { %6026 = vmatprep.subr.bf16.mxu1 %v6425_v0 }
0x1ea6   :  { %v3022_v48 = vpop.f32.mrb[24].mxu1 }
0x1ea7   :  { %v3023_v11 = vadd.f32 %v4958_v45, %v3022_v48  ;;  %v5632_v49 = vpop.f32.mrb[25].mxu1  ;;  %v4961_v48 = vld [vmem:[%s7509_s5] ss:$0 sm:$0xff] }
0x1ea9   :  { %v3026_v50 = vadd.f32 %v3023_v11, %v7115_v5  ;;  %v3058_v5 = vld [vmem:[%s7506_s28 + $0x10] sm:$0xff] }
0x1eaa   :  { %v6015_v15 = vpack.c.bf16 %v3059_v10, %v3058_v5 }
0x1eab   :  { %v3029_v51 = vsel %vm276_vm1, %v3026_v50, 0.0 }
0x1eac   :  { %3030 = vadd.xlane.f32.xlu1 %v3029_v51  ;;  %6016 = vmatpush3.bf16.msra.mxu0 %v6015_v15  ;;  %v3068_v51 = vld [vmem:[%s7507_s1 + $0x38] sm:$0xff] }
0x1ead   :  { %6029 = vmatprep.subr.bf16.mxu0 %v6425_v0 }
0x1f39   :  { %v3031_v52 = vpop.xlane.xlu1 %3030 }
0x1f3a   :  { %v3032_v53 = vmul.f32 0.03125, %v3031_v52 }
0x1f3c   :  { %v3033_v54 = vsub.f32 %v3026_v50, %v3032_v53  ;;  %v3067_v50 = vld [vmem:[%s7507_s1 + $0x30] sm:$0xff]  ;;  %v4962_v53 = vld [vmem:[%s7510_s17] ss:$0 sm:$0xff] }
0x1f3d   :  { %v6027_v52 = vpack.c.bf16 %v3068_v51, %v3067_v50  ;;  %v4973_v51 = vld [vmem:[%s7492_s30 + $0x1] ss:$0 sm:$0xff] }
0x1f3e   :  { %v3034_v61 = vmul.f32 %v3033_v54, %v3033_v54 }
0x1f3f   :  { %6028 = vmatpush3.bf16.msra.mxu1 %v6027_v52 }
0x1f40   :  { %v3035_v2 = vsel %vm276_vm1, %v3034_v61, 0.0  ;;  %6043 = vmatprep.subr.bf16.mxu1 %v6425_v0 }
0x1f41   :  { %3036 = vadd.xlane.f32.xlu0 %v3035_v2 }
0x1fce   :  { %v3037_v37 = vpop.xlane.xlu0 %3036 }
0x1fcf   :  { %v3038_v41 = vmul.f32 0.03125, %v3037_v37  ;;  %v6033_v37 = vpack.c.bf16 %v4971_v47, %v4970_v32 }
0x1fd1   :  { %v3039_v40 = vadd.f32 1e-05, %v3038_v41 }
0x1fd3   :  { %6269 = vrsqrt.f32 %v3039_v40 }
0x1fdd   :  { %v6270_v42 = vpop.eup %6269 }
0x1fde   :  { %v3041_v45 = vmul.f32 %v6270_v42, %v3033_v54 }
0x1fe0   :  { %v3048_v11 = vmul.f32 %v4960_v44, %v3041_v45  ;;  %v4966_v45 = vld [vmem:[%s7512_s8] ss:$0 sm:$0xff] }
0x1fe2   :  { %v3055_v49 = vadd.f32 %v4961_v48, %v3048_v11  ;;  %v4967_v11 = vld [vmem:[%s7513_s14] ss:$0 sm:$0xff] }
0x1fe4   :  { %5642 = vmatmul.mubr.msk.f32.vlgmr.msra.gmra.mrb[40].mxu0 %vm276_vm1, %v3055_v49 }
0x1fe5   :  { %5671 = vmatprep.mubr.msk.f32.mxu0 %vm6426_vm0, %v6427_v1 }
0x20b7   :  { %v3145_v61 = vpop.f32.mrb[40].mxu0 }
0x20b8   :  { %v3146_v2 = vadd.f32 %v4962_v53, %v3145_v61  ;;  %v5643_v4 = vpop.f32.mrb[41].mxu0 }
0x20ba   :  { %v3149_v54 = vmax.f32 %v3146_v2, 0.0 }
0x20bc   :  { %5661 = vmatmul.mubr.msk.f32.vlgmr.msra.gmra.mrb[26].mxu1 %vm947_vm4, %v3149_v54 }
0x20bd   :  { %6045 = vmatpush3.bf16.msra.mxu1 %v7046_v33  ;;  %5701 = vmatprep.mubr.msk.f32.mxu1 %vm6426_vm0, %v6427_v1 }
0x20be   :  { %6046 = vmatprep.subr.bf16.mxu1 %v6425_v0 }
0x20c1   :  { %6048 = vmatpush3.bf16.msra.mxu1 %v7053_v38  ;;  %v4968_v38 = vld [vmem:[%s7488_s9 + $0x20] sm:$0xff] }
0x20c2   :  { %6049 = vmatprep.subr.bf16.mxu1 %v6425_v0  ;;  %v6030_v30 = vpack.c.bf16 %v4969_v29, %v4968_v38 }
0x20c4   :  { %6031 = vmatpush3.bf16.msra.mxu0 %v6030_v30 }
0x20c5   :  { %6032 = vmatprep.subr.bf16.mxu0 %v6425_v0 }
0x20c8   :  { %6034 = vmatpush3.bf16.msra.mxu0 %v6033_v37 }
0x218f   :  { %v3225_v9 = vpop.f32.mrb[26].mxu1 }
0x2190   :  { %v3226_v5 = vadd.f32 %v4964_v8, %v3225_v9  ;;  %v5662_v10 = vpop.f32.mrb[27].mxu1 }
0x2192   :  { %v3229_v15 = vadd.f32 %v3226_v5, %v3055_v49 }
0x2194   :  { %v3232_v33 = vsel %vm276_vm1, %v3229_v15, 0.0 }
0x2195   :  { %3233 = vadd.xlane.f32.xlu0 %v3232_v33 }
0x2222   :  { %v3234_v16 = vpop.xlane.xlu0 %3233 }
0x2223   :  { %v3235_v19 = vmul.f32 0.03125, %v3234_v16 }
0x2225   :  { %v3236_v20 = vsub.f32 %v3229_v15, %v3235_v19 }
0x2227   :  { %v3237_v21 = vmul.f32 %v3236_v20, %v3236_v20 }
0x2229   :  { %v3238_v28 = vsel %vm276_vm1, %v3237_v21, 0.0 }
0x222a   :  { %3239 = vadd.xlane.f32.xlu1 %v3238_v28 }
0x22b7   :  { %v3240_v41 = vpop.xlane.xlu1 %3239 }
0x22b8   :  { %v3241_v40 = vmul.f32 0.03125, %v3240_v41 }
0x22ba   :  { %v3242_v42 = vadd.f32 1e-05, %v3241_v40  ;;  %v4975_v40 = vld [vmem:[%s7496_s11 + $0x20] sm:$0xff] }
0x22bc   :  { %6271 = vrsqrt.f32 %v3242_v42  ;;  %v4976_v42 = vld [vmem:[%s7496_s11 + $0x28] sm:$0xff] }
0x22c6   :  { %v6272_v44 = vpop.eup %6271 }
0x22c7   :  { %v3244_v48 = vmul.f32 %v6272_v44, %v3236_v20  ;;  %v4977_v44 = vld [vmem:[%s7496_s11 + $0x30] sm:$0xff] }
0x22c9   :  { %v3251_v49 = vmul.f32 %v4966_v45, %v3244_v48  ;;  %v6056_v45 = vpack.c.bf16 %v4976_v42, %v4975_v40  ;;  %v4978_v48 = vld [vmem:[%s7496_s11 + $0x38] sm:$0xff] }
0x22cb   :  { %v7237_v50 = vadd.f32 %v4967_v11, %v3251_v49  ;;  %v6059_v11 = vpack.c.bf16 %v4978_v48, %v4977_v44 }
0x22cd   :  { %5672 = vmatmul.mubr.msk.f32.vlgmr.msra.gmra.mrb[42].mxu0 %vm276_vm1, %v7237_v50 }
0x22ce   :  { %5676 = vmatprep.mubr.msk.f32.mxu0 %vm360_vm2, %v6971_v46 }
0x23a0   :  { %v3341_v52 = vpop.f32.mrb[42].mxu0 }
0x23a1   :  { %v3342_v53 = vadd.f32 %v4973_v51, %v3341_v52  ;;  %v5673_v61 = vpop.f32.mrb[43].mxu0 }
0x23a2   :  { %v5004_v61 = vld [vmem:[%s7497_s15 + $0x20] sm:$0xff] }
0x23a3   :  { %3354 = vrot.lane.b32.xlu0 %v3342_v53, %s6429_s13 }
0x2415   :  { %v3355_v2 = vpop.permute.xlu0 %3354 }
0x2416   :  { %5674 = vmatprep.subr.mxu0 %v3355_v2 }
0x2417   :  { %5675 = vmatpush3.msra.mxu0 %v3355_v2  ;;  %v5005_v2 = vld [vmem:[%s7497_s15 + $0x28] sm:$0xff] }
0x2418   :  { %5677 = vmatmul.mubr.msk.f32.vlgmr.msra.gmra.mrb[44].mxu0 %vm360_vm2, %v6996_v62  ;;  %6035 = vmatprep.subr.bf16.mxu0 %v6425_v0 }
0x2419   :  { %5679 = vmatprep.mubr.msk.f32.mxu0 %vm360_vm2, %v6999_v63 }
0x241c   :  { %5680 = vmatmul.mubr.msk.f32.gmra.mrb[46].mxu0 %vm360_vm2, %v7007_v12 }
0x241d   :  { %5690 = vmatprep.mubr.msk.f32.mxu0 %vm6426_vm0, %v6427_v1 }
0x24eb   :  { %v5678_v46 = vpop.f32.mrb[44].mxu0 }
0x24ec   :  { %v3443_v4 = vmul.f32 %v5678_v46, %v6981_v56  ;;  %v3447_v54 = vmul.f32 %v5678_v46, %v7013_v23  ;;  %v3423_v8 = vpop.f32.mrb[45].mxu0  ;;  %v6068_v46 = vpack.c.bf16 %v5005_v2, %v5004_v61 }
0x24ed   :  { %v3446_v9 = vmul.f32 %v3423_v8, %v7057_v43  ;;  %v3442_v62 = vmul.f32 %v3423_v8, %v7018_v58 }
0x24ef   :  { %v6221_v5 = vpack.i.bf16 %v3447_v54, %v3446_v9  ;;  %v6036_v10 = vpack.c.bf16 %v3443_v4, %v3442_v62  ;;  %v5681_v15 = vpop.f32.mrb[46].mxu0  ;;  %v5006_v4 = vld [vmem:[%s7497_s15 + $0x30] sm:$0xff]  ;;  %v5007_v54 = vld [vmem:[%s7497_s15 + $0x38] sm:$0xff] }
0x24f0   :  { %v3445_v63 = vmul.f32 %v5681_v15, %v6991_v60  ;;  %v3449_v12 = vmul.f32 %v5681_v15, %v7022_v7  ;;  %v3433_v33 = vpop.f32.mrb[47].mxu0  ;;  %v3352_v60 = vmul.f32 0.35355338, %v3342_v53  ;;  %v6071_v62 = vpack.c.bf16 %v5007_v54, %v5006_v4 }
0x24f1   :  { %v3448_v16 = vmul.f32 %v3433_v33, %v7015_v3  ;;  %v3444_v19 = vmul.f32 %v3433_v33, %v6986_v59  ;;  %6038 = vmatpush3.bf16.xpose.msk.msra.mxu0 %vm6775_vm3, %v6036_v10  ;;  %v4998_v10 = vld [vmem:[%s7499_s18 + $0x28] sm:$0xff] }
0x24f2   :  { %6039 = vmatprep.subr.bf16.mxu0 %v6425_v0 }
0x24f3   :  { %v6226_v56 = vpack.i.bf16 %v3449_v12, %v3448_v16  ;;  %v6040_v23 = vpack.c.bf16 %v3445_v63, %v3444_v19  ;;  %v4999_v63 = vld [vmem:[%s7499_s18 + $0x30] sm:$0xff] }
0x24f5   :  { %6227 = vrot.lane.b32.xlu0 %v6226_v56, %s6429_s13 }
0x24f9   :  { %6042 = vmatpush3.bf16.xpose.msk.msra.mxu0 %vm6775_vm3, %v6040_v23  ;;  %v5009_v23 = vld [vmem:[%s7500_s22 + $0x1] ss:$0 sm:$0xff] }
0x24fa   :  { %6055 = vmatprep.subr.bf16.mxu0 %v6425_v0 }
0x2500   :  { %5691 = vmatmul.mubr.msk.f32.vlgmr.msra.gmra.mrb[48].mxu0 %vm276_vm1, %v3352_v60 }
0x2501   :  { %5723 = vmatprep.mubr.msk.f32.mxu0 %vm6426_vm0, %v6427_v1  ;;  %6057 = vmatpush3.bf16.msra.mxu0 %v6056_v45 }
0x2502   :  { %6058 = vmatprep.subr.bf16.mxu0 %v6425_v0 }
0x2505   :  { %6060 = vmatpush3.bf16.msra.mxu0 %v6059_v11 }
0x2506   :  { %6067 = vmatprep.subr.bf16.mxu0 %v6425_v0 }
0x2567   :  { %v6228_v30 = vpop.permute.xlu0 %6227 }
0x2568   :  { %v6229_v47 = vunpack.i.l.bf16 %v6228_v30 }
0x25d3   :  { %v3531_v59 = vpop.f32.mrb[48].mxu0 }
0x25d4   :  { %v3532_v3 = vadd.f32 %v3531_v59, %v7038_v18  ;;  %v5692_v58 = vpop.f32.mrb[49].mxu0  ;;  %v6230_v18 = vunpack.i.h.bf16 %v6228_v30  ;;  %v4995_v30 = vld [vmem:[%s7501_s23 + $0x1] ss:$0 sm:$0xff] }
0x25d6   :  { %v3535_v7 = vsel %vm276_vm1, %v3532_v3, -inf  ;;  %v6053_v41 = vpack.c.bf16 %v6230_v18, %v6229_v47  ;;  %v4996_v18 = vld [vmem:[%s7502_s26 + $0x1] ss:$0 sm:$0xff] }
0x25d7   :  { %3536 = vmax.xlane.f32.xlu1 %v3535_v7 }
0x25e8   :  { %6222 = vrot.lane.b32.xlu1 %v6221_v5, %s6429_s13  ;;  %v4997_v5 = vld [vmem:[%s7499_s18 + $0x20] sm:$0xff] }
0x25e9   :  { %v6062_v15 = vpack.c.bf16 %v4998_v10, %v4997_v5 }
0x2664   :  { %v3537_v43 = vpop.xlane.xlu1 %3536 }
0x2665   :  { %v3538_v20 = vsub.f32 %v3532_v3, %v3537_v43 }
0x2667   :  { %v3539_v21 = vmul.f32 1.442695, %v3538_v20 }
0x2668   :  { %v6223_v28 = vpop.permute.xlu1 %6222 }
0x2669   :  { %6273 = vpow2.f32 %v3539_v21  ;;  %v6225_v38 = vunpack.i.h.bf16 %v6223_v28  ;;  %v6224_v29 = vunpack.i.l.bf16 %v6223_v28 }
0x266b   :  { %v6050_v37 = vpack.c.bf16 %v6225_v38, %v6224_v29 }
0x2673   :  { %v6274_v32 = vpop.eup %6273 }
0x2674   :  { %5702 = vmatmul.mubr.msk.f32.vlgmr.msra.gmra.mrb[28].mxu1 %vm276_vm1, %v6274_v32 }
0x2675   :  { %6051 = vmatpush3.bf16.msra.mxu1 %v6050_v37  ;;  %5712 = vmatprep.mubr.msk.f32.mxu1 %vm6426_vm0, %v6427_v1 }
0x2676   :  { %6052 = vmatprep.subr.bf16.mxu1 %v6425_v0 }
0x2679   :  { %6054 = vmatpush3.bf16.msra.mxu1 %v6053_v41 }
0x267a   :  { %6061 = vmatprep.subr.bf16.mxu1 %v6425_v0 }
0x2747   :  { %v3610_v49 = vpop.f32.mrb[28].mxu1 }
0x2748   :  { %6275 = vrcp.f32 %v3610_v49  ;;  %v5703_v51 = vpop.f32.mrb[29].mxu1 }
0x2752   :  { %v6276_v52 = vpop.eup %6275 }
0x2753   :  { %v3615_v53 = vmul.f32 %v6276_v52, %v6274_v32 }
0x2755   :  { %5713 = vmatmul.mubr.msk.f32.vlgmr.msra.gmra.mrb[30].mxu1 %vm276_vm1, %v3615_v53 }
0x2756   :  { %5734 = vmatprep.mubr.msk.f32.mxu1 %vm6426_vm0, %v6427_v1  ;;  %6063 = vmatpush3.bf16.msra.mxu1 %v6062_v15 }
0x2757   :  { %6064 = vmatprep.subr.bf16.mxu1 %v6425_v0 }
0x2828   :  { %v3701_v8 = vpop.f32.mrb[30].mxu1 }
0x2829   :  { %v5714_v9 = vpop.f32.mrb[31].mxu1  ;;  %5724 = vmatmul.mubr.msk.f32.vlgmr.msra.gmra.mrb[50].mxu0 %vm276_vm1, %v3701_v8 }
0x282a   :  { %6069 = vmatpush3.bf16.msra.mxu0 %v6068_v46  ;;  %5745 = vmatprep.mubr.msk.f32.mxu0 %vm6426_vm0, %v6427_v1 }
0x282b   :  { %6070 = vmatprep.subr.bf16.mxu0 %v6425_v0 }
0x282e   :  { %6072 = vmatpush3.bf16.msra.mxu0 %v6071_v62 }
0x282f   :  { %6081 = vmatprep.subr.bf16.mxu0 %v6425_v0 }
0x2831   :  { %5746 = vmatmul.mubr.msk.f32.vlgmr.msra.gmra.mrb[52].mxu0 %vm276_vm1, %v7094_v13  ;;  %v5000_v13 = vld [vmem:[%s7499_s18 + $0x38] sm:$0xff] }
0x2832   :  { %6083 = vmatpush3.bf16.msra.mxu0 %v6802_v55  ;;  %5775 = vmatprep.mubr.msk.f32.mxu0 %vm6426_vm0, %v6427_v1  ;;  %v6065_v12 = vpack.c.bf16 %v5000_v13, %v4999_v63  ;;  %v4991_v55 = vld [vmem:[%s7498_s16 + $0x1] ss:$0 sm:$0xff] }
0x2833   :  { %6084 = vmatprep.subr.bf16.mxu0 %v6425_v0  ;;  %v5011_v13 = vld [vmem:[%s7504_s3 + $0x20] sm:$0xff] }
0x2834   :  { %6066 = vmatpush3.bf16.msra.mxu1 %v6065_v12  ;;  %v5012_v12 = vld [vmem:[%s7504_s3 + $0x28] sm:$0xff] }
0x2836   :  { %6086 = vmatpush3.bf16.msra.mxu0 %v6806_v57 }
0x2837   :  { %6087 = vmatprep.subr.bf16.mxu0 %v6425_v0 }
0x28fc   :  { %v3780_v33 = vpop.f32.mrb[50].mxu0 }
0x28fd   :  { %v3781_v16 = vadd.f32 %v4991_v55, %v3780_v33  ;;  %v5725_v19 = vpop.f32.mrb[51].mxu0  ;;  %v5013_v55 = vld [vmem:[%s7504_s3 + $0x30] sm:$0xff]  ;;  %v6094_v33 = vpack.c.bf16 %v5012_v12, %v5011_v13 }
0x28ff   :  { %v3784_v56 = vadd.f32 %v3781_v16, %v7237_v50  ;;  %v5014_v16 = vld [vmem:[%s7504_s3 + $0x38] sm:$0xff] }
0x2900   :  { %v6097_v19 = vpack.c.bf16 %v5014_v16, %v5013_v55 }
0x2901   :  { %v3789_v57 = vsel %vm276_vm1, %v3784_v56, 0.0 }
0x2902   :  { %3790 = vadd.xlane.f32.xlu1 %v3789_v57 }
0x2904   :  { %v3981_v60 = vpop.f32.mrb[52].mxu0 }
0x2905   :  { %v3982_v59 = vadd.f32 %v5009_v23, %v3981_v60  ;;  %v5747_v3 = vpop.f32.mrb[53].mxu0 }
0x2907   :  { %5748 = vmatprep.subr.mxu1 %v3982_v59 }
0x298f   :  { %v3791_v58 = vpop.xlane.xlu1 %3790 }
0x2990   :  { %v3792_v7 = vmul.f32 0.03125, %v3791_v58  ;;  %v5027_v58 = vld [vmem:[%s7505_s0 + $0x1] ss:$0 sm:$0xff] }
0x2992   :  { %v3793_v43 = vsub.f32 %v3784_v56, %v3792_v7 }
0x2994   :  { %v3794_v20 = vmul.f32 %v3793_v43, %v3793_v43 }
0x2996   :  { %v3795_v21 = vsel %vm276_vm1, %v3794_v20, 0.0 }
0x2997   :  { %3796 = vadd.xlane.f32.xlu0 %v3795_v21 }
0x2a24   :  { %v3797_v28 = vpop.xlane.xlu0 %3796 }
0x2a25   :  { %v3798_v38 = vmul.f32 0.03125, %v3797_v28 }
0x2a27   :  { %v3799_v50 = vadd.f32 1e-05, %v3798_v38 }
0x2a29   :  { %6277 = vrsqrt.f32 %v3799_v50 }
0x2a33   :  { %v6278_v29 = vpop.eup %6277 }
0x2a34   :  { %v3801_v32 = vmul.f32 %v6278_v29, %v3793_v43 }
0x2a36   :  { %v3808_v47 = vmul.f32 %v4995_v30, %v3801_v32 }
0x2a38   :  { %v7318_v37 = vadd.f32 %v4996_v18, %v3808_v47  ;;  %v5033_v18 = vld [vmem:[%s7506_s28 + $0x20] sm:$0xff]  ;;  %v5034_v47 = vld [vmem:[%s7506_s28 + $0x28] sm:$0xff] }
0x2a3a   :  { %5735 = vmatmul.mubr.msk.f32.vlgmr.msra.gmra.mrb[32].mxu1 %vm276_vm1, %v7318_v37 }
0x2a3b   :  { %5749 = vmatpush3.msra.mxu1 %v3982_v59  ;;  %5750 = vmatprep.mubr.msk.f32.mxu1 %vm360_vm2, %v7120_v6 }
0x2a3c   :  { %6073 = vmatprep.subr.bf16.mxu1 %v6425_v0 }
0x2a3e   :  { %5751 = vmatmul.mubr.msk.f32.vlgmr.msra.gmra.mrb[34].mxu1 %vm360_vm2, %v7126_v22 }
0x2a3f   :  { %5753 = vmatprep.mubr.msk.f32.mxu1 %vm360_vm2, %v7131_v36 }
0x2a42   :  { %5754 = vmatmul.mubr.msk.f32.gmra.mrb[36].mxu1 %vm360_vm2, %v7136_v24 }
0x2a43   :  { %5764 = vmatprep.mubr.msk.f32.mxu1 %vm6426_vm0, %v6427_v1 }
0x2b0d   :  { %v3898_v41 = vpop.f32.mrb[32].mxu1 }
0x2b0e   :  { %v5736_v40 = vpop.f32.mrb[33].mxu1 }
0x2b0f   :  { %v5036_v40 = vld [vmem:[%s7506_s28 + $0x38] sm:$0xff] }
0x2b11   :  { %v5752_v42 = vpop.f32.mrb[34].mxu1 }
0x2b12   :  { %v4079_v44 = vmul.f32 %v7143_v14, %v5752_v42  ;;  %v4083_v6 = vmul.f32 %v5752_v42, %v6763_v26  ;;  %v4059_v45 = vpop.f32.mrb[35].mxu1 }
0x2b13   :  { %v4082_v22 = vmul.f32 %v4059_v45, %v6761_v25  ;;  %v4078_v48 = vmul.f32 %v7149_v17, %v4059_v45  ;;  %v5002_v17 = vld [vmem:[%s7503_s29 + $0x1] ss:$0 sm:$0xff]  ;;  %v5040_v45 = vld [vmem:[%s7507_s1 + $0x50] sm:$0xff] }
0x2b15   :  { %v6231_v36 = vpack.i.bf16 %v4083_v6, %v4082_v22  ;;  %v6074_v11 = vpack.c.bf16 %v4079_v44, %v4078_v48  ;;  %v5755_v49 = vpop.f32.mrb[36].mxu1  ;;  %v5038_v44 = vld [vmem:[%s7507_s1 + $0x40] sm:$0xff]  ;;  %v5039_v6 = vld [vmem:[%s7507_s1 + $0x48] sm:$0xff]  ;;  %v5041_v48 = vld [vmem:[%s7507_s1 + $0x58] sm:$0xff] }
0x2b16   :  { %v4081_v24 = vmul.f32 %v7153_v31, %v5755_v49  ;;  %v4085_v51 = vmul.f32 %v5755_v49, %v6771_v34  ;;  %v4069_v52 = vpop.f32.mrb[37].mxu1  ;;  %v3899_v31 = vadd.f32 %v5002_v17, %v3898_v41  ;;  %v6100_v41 = vpack.c.bf16 %v5034_v47, %v5033_v18  ;;  %v5043_v49 = vld [vmem:[%s7507_s1 + $0x68] sm:$0xff]  ;;  %v5032_v17 = vld [vmem:[%s7509_s5 + $0x1] ss:$0 sm:$0xff] }
0x2b17   :  { %v4084_v53 = vmul.f32 %v4069_v52, %v6765_v27  ;;  %v4080_v14 = vmul.f32 %v7159_v39, %v4069_v52  ;;  %6232 = vrot.lane.b32.xlu1 %v6231_v36, %s6429_s13  ;;  %6076 = vmatpush3.bf16.xpose.msk.msra.mxu1 %vm6775_vm3, %v6074_v11  ;;  %v6106_v22 = vpack.c.bf16 %v5039_v6, %v5038_v44  ;;  %v5042_v11 = vld [vmem:[%s7507_s1 + $0x60] sm:$0xff] }
0x2b18   :  { %6077 = vmatprep.subr.bf16.mxu1 %v6425_v0  ;;  %v3992_v34 = vmul.f32 0.35355338, %v3899_v31  ;;  %v6109_v36 = vpack.c.bf16 %v5041_v48, %v5040_v45  ;;  %v5056_v6 = vld [vmem:[%s7515_s7] ss:$0 sm:$0xff] }
0x2b19   :  { %v6236_v25 = vpack.i.bf16 %v4085_v51, %v4084_v53  ;;  %v6078_v26 = vpack.c.bf16 %v4081_v24, %v4080_v14  ;;  %v6112_v24 = vpack.c.bf16 %v5043_v49, %v5042_v11  ;;  %v5057_v48 = vld [vmem:[%s6679_s24] ss:$0 sm:$0xff] }
0x2b1f   :  { %6080 = vmatpush3.bf16.xpose.msk.msra.mxu1 %vm6775_vm3, %v6078_v26 }
0x2b20   :  { %6093 = vmatprep.subr.bf16.mxu1 %v6425_v0 }
0x2b26   :  { %5765 = vmatmul.mubr.msk.f32.vlgmr.msra.gmra.mrb[38].mxu1 %vm276_vm1, %v3992_v34 }
0x2b27   :  { %5797 = vmatprep.mubr.msk.f32.mxu1 %vm6426_vm0, %v6427_v1  ;;  %6095 = vmatpush3.bf16.msra.mxu1 %v6094_v33 }
0x2b28   :  { %6096 = vmatprep.subr.bf16.mxu1 %v6425_v0 }
0x2b2b   :  { %6098 = vmatpush3.bf16.msra.mxu1 %v6097_v19 }
0x2b2c   :  { %6105 = vmatprep.subr.bf16.mxu1 %v6425_v0 }
0x2b89   :  { %v6233_v4 = vpop.permute.xlu1 %6232 }
0x2b8a   :  { %v6235_v54 = vunpack.i.h.bf16 %v6233_v4  ;;  %v6234_v8 = vunpack.i.l.bf16 %v6233_v4 }
0x2b8c   :  { %v6088_v5 = vpack.c.bf16 %v6235_v54, %v6234_v8  ;;  %v5049_v8 = vld [vmem:[%s7511_s21 + $0x1] ss:$0 sm:$0xff] }
0x2bf9   :  { %v4167_v27 = vpop.f32.mrb[38].mxu1 }
0x2bfa   :  { %v5766_v39 = vpop.f32.mrb[39].mxu1  ;;  %v4171_v61 = vsel %vm276_vm1, %v4167_v27, -inf }
0x2bfb   :  { %4172 = vmax.xlane.f32.xlu0 %v4171_v61  ;;  %v5045_v39 = vld [vmem:[%s7507_s1 + $0x78] sm:$0xff] }
0x2c11   :  { %6237 = vrot.lane.b32.xlu0 %v6236_v25, %s6429_s13  ;;  %v5031_v25 = vld [vmem:[%s7508_s2 + $0x1] ss:$0 sm:$0xff]  ;;  %s7514_s13 = sld [smem:[#allocation38_spill]] }
0x2c88   :  { %v4173_v2 = vpop.xlane.xlu0 %4172 }
0x2c89   :  { %v4174_v46 = vsub.f32 %v4167_v27, %v4173_v2  ;;  %v5044_v27 = vld [vmem:[%s7507_s1 + $0x70] sm:$0xff]  ;;  %v5047_v2 = vld [vmem:[%s7510_s17 + $0x1] ss:$0 sm:$0xff] }
0x2c8a   :  { %v6115_v61 = vpack.c.bf16 %v5045_v39, %v5044_v27 }
0x2c8b   :  { %v4175_v35 = vmul.f32 1.442695, %v4174_v46 }
0x2c8c   :  { %v6238_v9 = vpop.permute.xlu0 %6237 }
0x2c8d   :  { %6279 = vpow2.f32 %v4175_v35  ;;  %v6240_v10 = vunpack.i.h.bf16 %v6238_v9  ;;  %v6239_v15 = vunpack.i.l.bf16 %v6238_v9 }
0x2c8f   :  { %v6091_v63 = vpack.c.bf16 %v6240_v10, %v6239_v15 }
0x2c97   :  { %v6280_v62 = vpop.eup %6279 }
0x2c98   :  { %5776 = vmatmul.mubr.msk.f32.vlgmr.msra.gmra.mrb[54].mxu0 %vm276_vm1, %v6280_v62 }
0x2c99   :  { %6089 = vmatpush3.bf16.msra.mxu0 %v6088_v5  ;;  %5786 = vmatprep.mubr.msk.f32.mxu0 %vm6426_vm0, %v6427_v1 }
0x2c9a   :  { %6090 = vmatprep.subr.bf16.mxu0 %v6425_v0 }
0x2c9d   :  { %6092 = vmatpush3.bf16.msra.mxu0 %v6091_v63 }
0x2c9e   :  { %6099 = vmatprep.subr.bf16.mxu0 %v6425_v0 }
0x2d6b   :  { %v4246_v56 = vpop.f32.mrb[54].mxu0 }
0x2d6c   :  { %6281 = vrcp.f32 %v4246_v56  ;;  %v5777_v57 = vpop.f32.mrb[55].mxu0 }
0x2d6d   :  { %v5053_v57 = vld [vmem:[%s7512_s8 + $0x1] ss:$0 sm:$0xff] }
0x2d76   :  { %v6282_v23 = vpop.eup %6281 }
0x2d77   :  { %v4251_v60 = vmul.f32 %v6282_v23, %v6280_v62 }
0x2d79   :  { %5787 = vmatmul.mubr.msk.f32.vlgmr.msra.gmra.mrb[56].mxu0 %vm276_vm1, %v4251_v60  ;;  %v5054_v60 = vld [vmem:[%s7513_s14 + $0x1] ss:$0 sm:$0xff] }
0x2d7a   :  { %5808 = vmatprep.mubr.msk.f32.mxu0 %vm6426_vm0, %v6427_v1  ;;  %6101 = vmatpush3.bf16.msra.mxu0 %v6100_v41 }
0x2d7b   :  { %6102 = vmatprep.subr.bf16.mxu0 %v6425_v0 }
0x2e4c   :  { %v4337_v59 = vpop.f32.mrb[56].mxu0 }
0x2e4d   :  { %v5788_v3 = vpop.f32.mrb[57].mxu0  ;;  %5798 = vmatmul.mubr.msk.f32.vlgmr.msra.gmra.mrb[40].mxu1 %vm276_vm1, %v4337_v59 }
0x2e4e   :  { %5827 = vmatprep.mubr.msk.f32.mxu1 %vm6426_vm0, %v6427_v1  ;;  %6107 = vmatpush3.bf16.msra.mxu1 %v6106_v22 }
0x2e4f   :  { %6108 = vmatprep.subr.bf16.mxu1 %v6425_v0 }
0x2e52   :  { %6110 = vmatpush3.bf16.msra.mxu1 %v6109_v36 }
0x2e53   :  { %6111 = vmatprep.subr.bf16.mxu1 %v6425_v0 }
0x2e56   :  { %6113 = vmatpush3.bf16.msra.mxu1 %v6112_v24 }
0x2e57   :  { %6114 = vmatprep.subr.bf16.mxu1 %v6425_v0 }
0x2e5a   :  { %6116 = vmatpush3.bf16.msra.mxu1 %v6115_v61 }
0x2f20   :  { %v4416_v7 = vpop.f32.mrb[40].mxu1 }
0x2f21   :  { %v4417_v43 = vadd.f32 %v5027_v58, %v4416_v7  ;;  %v5799_v20 = vpop.f32.mrb[41].mxu1 }
0x2f23   :  { %v4420_v21 = vadd.f32 %v4417_v43, %v7318_v37  ;;  %v5035_v37 = vld [vmem:[%s7506_s28 + $0x30] sm:$0xff] }
0x2f24   :  { %v6103_v42 = vpack.c.bf16 %v5036_v40, %v5035_v37 }
0x2f25   :  { %v4425_v28 = vsel %vm276_vm1, %v4420_v21, 0.0 }
0x2f26   :  { %4426 = vadd.xlane.f32.xlu1 %v4425_v28  ;;  %6104 = vmatpush3.bf16.msra.mxu0 %v6103_v42  ;;  %v5055_v42 = vld [vmem:[%s7514_s13] ss:$0 sm:$0xff] }
0x2f27   :  { %6117 = vmatprep.subr.bf16.mxu0 %v6425_v0 }
0x2fb3   :  { %v4427_v38 = vpop.xlane.xlu1 %4426 }
0x2fb4   :  { %v4428_v50 = vmul.f32 0.03125, %v4427_v38  ;;  %v4690_v38 = vld [vmem:[%s6684_s4] sm:$0xff] }
0x2fb6   :  { %v4429_v29 = vsub.f32 %v4420_v21, %v4428_v50  ;;  %v4691_v50 = vld [vmem:[%s6684_s4 + $0x8] sm:$0xff] }
0x2fb8   :  { %v4430_v30 = vmul.f32 %v4429_v29, %v4429_v29 }
0x2fba   :  { %v4431_v32 = vsel %vm276_vm1, %v4430_v30, 0.0  ;;  %v4692_v30 = vld [vmem:[%s6684_s4 + $0x10] sm:$0xff] }
0x2fbb   :  { %4432 = vadd.xlane.f32.xlu0 %v4431_v32  ;;  %v4693_v32 = vld [vmem:[%s6684_s4 + $0x18] sm:$0xff]  ;;  %s6430_s4 = smov [#allocation7]  }
0x2fbc   :  { %v6121_v18 = vpack.c.bf16 %v4693_v32, %v4692_v30  ;;  %s4790_s9 = sshll.u32 %s6430_s4, 4  ;;  %s4791_s9 = int_to_ptr.vmem [resolvable:$true] %s4790_s9 }
0x2fbd   :  { %s6345_s6 = scalar_lea.vmem %s4791_s9, 128  ;;  %p6350_p3 = scmp.lt.s32.totalorder %s4791_s9, %s4791_s9 }
0x2fbe   :  { %p6346_p2 = scmp.ne.s32.totalorder %s4791_s9, %s6345_s6  ;;  %p6351_p4 = scmp.lt.s32.totalorder %s6345_s6, %s6345_s6 }
0x2fc0   :  { %p6352_p5 = por %p6351_p4, %p6350_p3 }
0x2fc2   :  { %p6353_p6 = pnand %p6352_p5, %p6346_p2 }
0x3048   :  { %v4433_v51 = vpop.xlane.xlu0 %4432 }
0x3049   :  { %v4434_v52 = vmul.f32 0.03125, %v4433_v51 }
0x304b   :  { %v4435_v53 = vadd.f32 1e-05, %v4434_v52 }
0x304d   :  { %6283 = vrsqrt.f32 %v4435_v53 }
0x3057   :  { %v6284_v14 = vpop.eup %6283 }
0x3058   :  { %v4437_v26 = vmul.f32 %v6284_v14, %v4429_v29  ;;  %v6118_v29 = vpack.c.bf16 %v4691_v50, %v4690_v38 }
0x305a   :  { %v4444_v31 = vmul.f32 %v5031_v25, %v4437_v26 }
0x305c   :  { %v4451_v34 = vadd.f32 %v5032_v17, %v4444_v31 }
0x305e   :  { %5809 = vmatmul.mubr.msk.f32.vlgmr.msra.gmra.mrb[58].mxu0 %vm276_vm1, %v4451_v34 }
0x305f   :  { %5838 = vmatprep.mubr.msk.f32.mxu0 %vm6426_vm0, %v6427_v1  ;;  %6119 = vmatpush3.bf16.msra.mxu0 %v6118_v29 }
0x3060   :  { %6120 = vmatprep.subr.bf16.mxu0 %v6425_v0 }
0x3063   :  { %6122 = vmatpush3.bf16.msra.mxu0 %v6121_v18 }
0x3131   :  { %v4545_v46 = vpop.f32.mrb[58].mxu0 }
0x3132   :  { %v4546_v35 = vadd.f32 %v5047_v2, %v4545_v46  ;;  %v5810_v4 = vpop.f32.mrb[59].mxu0 }
0x3134   :  { %v4549_v54 = vmax.f32 %v4546_v35, 0.0 }
0x3136   :  { %5828 = vmatmul.mubr.msk.f32.vlgmr.msra.gmra.mrb[42].mxu1 %vm947_vm4, %v4549_v54 }
0x3209   :  { %v4625_v9 = vpop.f32.mrb[42].mxu1 }
0x320a   :  { %v4626_v62 = vadd.f32 %v5049_v8, %v4625_v9  ;;  %v5829_v5 = vpop.f32.mrb[43].mxu1 }
0x320c   :  { %v4629_v10 = vadd.f32 %v4626_v62, %v4451_v34 }
0x320e   :  { %v4634_v1 = vsel %vm276_vm1, %v4629_v10, 0.0 }
0x320f   :  { %4635 = vadd.xlane.f32.xlu1 %v4634_v1 }
0x329c   :  { %v4636_v15 = vpop.xlane.xlu1 %4635 }
0x329d   :  { %v4637_v63 = vmul.f32 0.03125, %v4636_v15 }
0x329f   :  { %v4638_v13 = vsub.f32 %v4629_v10, %v4637_v63 }
0x32a1   :  { %v4639_v12 = vmul.f32 %v4638_v13, %v4638_v13 }
0x32a3   :  { %v4640_v55 = vsel %vm276_vm1, %v4639_v12, 0.0 }
0x32a4   :  { %4641 = vadd.xlane.f32.xlu0 %v4640_v55 }
0x3331   :  { %v4642_v33 = vpop.xlane.xlu0 %4641 }
0x3332   :  { %v4643_v16 = vmul.f32 0.03125, %v4642_v33 }
0x3334   :  { %v4644_v19 = vadd.f32 1e-05, %v4643_v16 }
0x3336   :  { %6285 = vrsqrt.f32 %v4644_v19 }
0x3340   :  { %v6286_v56 = vpop.eup %6285 }
0x3341   :  { %v4646_v23 = vmul.f32 %v6286_v56, %v4638_v13 }
0x3343   :  { %v4653_v59 = vmul.f32 %v5053_v57, %v4646_v23 }
0x3345   :  { %v4660_v3 = vadd.f32 %v5054_v60, %v4653_v59 }
0x3347   :  { %v4663_v58 = vsel %vm276_vm1, %v4660_v3, 0.0 }
0x3348   :  { %4664 = vadd.xlane.f32.xlu1 %v4663_v58 }
0x33d5   :  { %v4665_v7 = vpop.xlane.xlu1 %4664 }
0x33d6   :  { %v4666_v43 = vmul.f32 0.03125, %v4665_v7 }
0x33d8   :  { %v4667_v20 = vsub.f32 %v4660_v3, %v4666_v43 }
0x33da   :  { %v4668_v21 = vmul.f32 %v4667_v20, %v4667_v20 }
0x33dc   :  { %v4669_v28 = vsel %vm276_vm1, %v4668_v21, 0.0 }
0x33dd   :  { %4670 = vadd.xlane.f32.xlu0 %v4669_v28 }
0x346a   :  { %v4671_v47 = vpop.xlane.xlu0 %4670 }
0x346b   :  { %v4672_v41 = vmul.f32 0.03125, %v4671_v47 }
0x346d   :  { %v4673_v37 = vadd.f32 1e-05, %v4672_v41 }
0x346f   :  { %6287 = vrsqrt.f32 %v4673_v37 }
0x3479   :  { %v6288_v40 = vpop.eup %6287 }
0x347a   :  { %v4675_v44 = vmul.f32 %v6288_v40, %v4667_v20 }
0x347c   :  { %v4682_v45 = vmul.f32 %v5055_v42, %v4675_v44 }
0x347e   :  { %v4689_v22 = vadd.f32 %v5056_v6, %v4682_v45 }
0x3480   :  { %5839 = vmatmul.mubr.msk.f32.vlgmr.msra.gmra.mrb[60].mxu0 %vm276_vm1, %v4689_v22 }
0x3553   :  { %v4770_v36 = vpop.f32.mrb[60].mxu0 }
0x3554   :  { %v4771_v11 = vadd.f32 %v5057_v48, %v4770_v36  ;;  %v5840_v49 = vpop.f32.mrb[61].mxu0 }
0x3556   :  { %4774 = vmax.xlane.f32.xlu1 %v4771_v11 }
0x35e3   :  { %v4775_v0 = vpop.xlane.xlu1 %4774 }
0x35e4   :  { %v4776_v24 = vsub.f32 %v4771_v11, %v4775_v0 }
0x35e6   :  { %v4777_v51 = vmul.f32 1.442695, %v4776_v24 }
0x35e8   :  { %6289 = vpow2.f32 %v4777_v51 }
0x35f2   :  { %v6290_v52 = vpop.eup %6289 }
0x35f3   :  { %4779 = vadd.xlane.f32.xlu0 %v6290_v52 }
0x3680   :  { %v4780_v53 = vpop.xlane.xlu0 %4779 }
0x3681   :  { %6291 = vrcp.f32 %v4780_v53 }
0x368b   :  { %v6292_v14 = vpop.eup %6291 }
0x368c   :  { %v4782_v25 = vmul.f32 %v6292_v14, %v6290_v52 }
0x368e   :  { %4783 = vst [vmem:[#allocation7] sm:$0xff] %v4782_v25 }
0x368f   :  { %6356 = shalt.err (!%p6353_p6)
}
0x3690   :  { %s6357_s24 = scalar_lea.hbm %s6689_s19, 128 }
0x3691   :  { %p6358_p7 = scmp.ne.s32.totalorder %s6689_s19, %s6357_s24  ;;  %p6361_p8 = scmp.lt.u32.totalorder %s6357_s24, %s6689_s19 }
0x3693   :  { %p6363_p9 = pnand %p6361_p8, %p6358_p7 }
0x3695   :  { %6366 = shalt.err (!%p6363_p9)
}
0x3696   :  { %4793 = dma.vmem_to_hbm [thread:$0]  %s4791_s9, 128, %s6689_s19, [#allocation4]  }
0x3697   :  { %6371 = dma.done.wait [#allocation4], 128  }
0x3698   :  { %6372 = vsyncadd [#allocation4], 4294967168 }
0x3699   :  { %4797 = vsyncpa [#allocation3], 1 }
0x369a   :  { %4798 = vsyncpa [#allocation6], 1 }
0x369b   :  { %4799 = vsyncpa [#allocation4], 1 }

</bundles_post_ra>
